<compile_context>
chip_gen: v7x
topology: tpu7x:2x2x1
jax: 0.10.0
libtpu: 0.0.40
codegen_flags: <defaults>
</compile_context>

<pallas_src>
import jax
import jax.numpy as jnp
from jax import lax
from jax.experimental import pallas as pl
from jax.experimental.pallas import tpu as pltpu

LANE = 128
SUBLANE = 8
NEG = -1e9                       # inert filler under logsumexp
# Conservative budget, safe on v5e/v6e/v7x; can be raised to ~100 MiB on
# v5e/v6e for large E/H configs (v7x has 64 MiB physical per TC).
VMEM_LIMIT = 32 * 1024 * 1024
UNROLL = 8                       # bounded unroll of the serial inner loops


def _round_up(x, m):
    return (x + m - 1) // m * m


# --------------------------- fused BiLSTM kernel -----------------------------
def _bilstm_kernel(x_ref, wih_ref, whh_ref, b_ref, h_out_ref, h_sc, c_sc, gx_sc):
    """One (direction, time-block) grid step.

    x_ref    : (T_BLK, Bp, Ep)      bf16  embedded inputs for this time block
    wih_ref  : (Ep, 4*Hp)           bf16  input->gate weights (this direction)
    whh_ref  : (Hp, 4*Hp)           bf16  hidden->gate weights
    b_ref    : (1, 4*Hp)            f32   b_ih + b_hh (zero in padded lanes)
    h_out_ref: (T_BLK, Bp, Hp)      bf16  hidden states for this time block
    h_sc,c_sc: (Bp, Hp)             f32   recurrent state carried across blocks
    gx_sc    : (T_BLK*Bp, 4*Hp)     f32   hoisted input-projection gates
    """
    t_blk, bp, ep = x_ref.shape
    hp = h_out_ref.shape[2]

    @pl.when(pl.program_id(1) == 0)          # new direction -> reset state
    def _():
        h_sc[...] = jnp.zeros_like(h_sc)
        c_sc[...] = jnp.zeros_like(c_sc)

    # ---- hoisted input projection: one big MXU matmul for the whole block
    x_flat = x_ref[...].reshape(t_blk * bp, ep)              # bf16
    gx_sc[...] = (jnp.dot(x_flat, wih_ref[...],
                          preferred_element_type=jnp.float32)
                  + b_ref[...])

    whh = whh_ref[...]

    def step(i, carry):
        h, c = carry
        base = pl.multiple_of(i * bp, bp)
        gates = (gx_sc[pl.ds(base, bp), :]
                 + jnp.dot(h.astype(jnp.bfloat16), whh,
                           preferred_element_type=jnp.float32))
        # PyTorch LSTM gate order: i, f, g, o (each padded to Hp lanes)
        i_g = jax.nn.sigmoid(gates[:, 0 * hp:1 * hp])
        f_g = jax.nn.sigmoid(gates[:, 1 * hp:2 * hp])
        g_g = jnp.tanh(gates[:, 2 * hp:3 * hp])
        o_g = jax.nn.sigmoid(gates[:, 3 * hp:4 * hp])
        c = f_g * c + i_g * g_g
        h = o_g * jnp.tanh(c)
        h_out_ref[i] = h.astype(h_out_ref.dtype)
        return (h, c)

    h, c = lax.fori_loop(0, t_blk, step, (h_sc[...], c_sc[...]), unroll=UNROLL)
    h_sc[...] = h
    c_sc[...] = c


def bilstm(x2, wih2, whh2, b2, t_blk):
    n_dir, t_pad, bp, ep = x2.shape
    h4p = wih2.shape[2]
    hp = h4p // 4
    return pl.pallas_call(
        _bilstm_kernel,
        out_shape=jax.ShapeDtypeStruct((n_dir, t_pad, bp, hp), jnp.bfloat16),
        grid=(n_dir, t_pad // t_blk),
        in_specs=[
            pl.BlockSpec((None, t_blk, bp, ep), lambda d, t: (d, t, 0, 0)),
            pl.BlockSpec((None, ep, h4p), lambda d, t: (d, 0, 0)),
            pl.BlockSpec((None, hp, h4p), lambda d, t: (d, 0, 0)),
            pl.BlockSpec((None, 1, h4p), lambda d, t: (d, 0, 0)),
        ],
        out_specs=pl.BlockSpec((None, t_blk, bp, hp),
                               lambda d, t: (d, t, 0, 0)),
        scratch_shapes=[pltpu.VMEM((bp, hp), jnp.float32),        # h state
                        pltpu.VMEM((bp, hp), jnp.float32),        # c state
                        pltpu.VMEM((t_blk * bp, h4p), jnp.float32)],  # gates_x
        compiler_params=pltpu.CompilerParams(
            dimension_semantics=("parallel", "arbitrary"),
            vmem_limit_bytes=VMEM_LIMIT),
    )(x2, wih2, whh2, b2)


# --------------------------- emission projection -----------------------------
def _emit_kernel(h_ref, w_ref, b_ref, o_ref):
    o_ref[...] = (jnp.dot(h_ref[...], w_ref[...],
                          preferred_element_type=jnp.float32)
                  + b_ref[...])


def emit_projection(hidden2, w_out_t, b_out, rows_blk):
    m, d2h = hidden2.shape
    kp = w_out_t.shape[1]
    return pl.pallas_call(
        _emit_kernel,
        out_shape=jax.ShapeDtypeStruct((m, kp), jnp.float32),
        grid=(m // rows_blk,),
        in_specs=[
            pl.BlockSpec((rows_blk, d2h), lambda i: (i, 0)),
            pl.BlockSpec((d2h, kp), lambda i: (0, 0)),
            pl.BlockSpec((1, kp), lambda i: (0, 0)),
        ],
        out_specs=pl.BlockSpec((rows_blk, kp), lambda i: (i, 0)),
        compiler_params=pltpu.CompilerParams(
            dimension_semantics=("parallel",),
            vmem_limit_bytes=VMEM_LIMIT),
    )(hidden2, w_out_t, b_out)


# ------------------------ CRF partition-function kernel ----------------------
def _crf_logz_kernel(emit_ref, trans_ref, lens_ref, logz_ref, d_sc):
    """Streamed forward recursion as a stabilized matmul.

    emit_ref : (T_BLK, B_BLK, Kp) f32  (padded tag lanes hold NEG)
    trans_ref: (Kp, Kp)           f32  (padded rows/cols hold NEG)
    lens_ref : (B_BLK, 1)         i32  per-example sequence lengths
    logz_ref : (B_BLK, 1)         f32  log partition function
    d_sc     : (B_BLK, Kp)        f32  alpha (forward) vector
    """
    t_blk = emit_ref.shape[0]
    tb = pl.program_id(1)

    trans = trans_ref[...]
    cm = jnp.max(trans, axis=0, keepdims=True)               # (1, Kp)
    exp_trans = jnp.exp(trans - cm)                          # (Kp, Kp)
    lens = lens_ref[...]                                     # (B_BLK, 1) int32

    @pl.when(tb == 0)                                        # d_0 = emit_0
    def _():
        d_sc[...] = emit_ref[0]

    def step(i, d):
        g = tb * t_blk + i                                   # global time index
        emit_i = emit_ref[i]                                 # (B_BLK, Kp)
        mx = jnp.max(d, axis=1, keepdims=True)               # (B_BLK, 1)
        p = jnp.exp(d - mx)                                  # (B_BLK, Kp)
        s = jnp.dot(p, exp_trans, preferred_element_type=jnp.float32)
        d_new = mx + cm + jnp.log(s) + emit_i
        live = jnp.logical_and(g >= 1, g < lens)             # (B_BLK, 1)
        return jnp.where(live, d_new, d)                     # freeze finished

    d = lax.fori_loop(0, t_blk, step, d_sc[...], unroll=UNROLL)
    d_sc[...] = d

    @pl.when(tb == pl.num_programs(1) - 1)
    def _():
        mx = jnp.max(d, axis=1, keepdims=True)
        logz_ref[...] = mx + jnp.log(
            jnp.sum(jnp.exp(d - mx), axis=1, keepdims=True))


def crf_logz(emit_tm, trans_p, lens_2d, t_blk, b_blk):
    t_pad, bp, kp = emit_tm.shape
    return pl.pallas_call(
        _crf_logz_kernel,
        out_shape=jax.ShapeDtypeStruct((bp, 1), jnp.float32),
        grid=(bp // b_blk, t_pad // t_blk),
        in_specs=[
            pl.BlockSpec((t_blk, b_blk, kp), lambda b, t: (t, b, 0)),
            pl.BlockSpec((kp, kp), lambda b, t: (0, 0)),
            pl.BlockSpec((b_blk, 1), lambda b, t: (b, 0)),
        ],
        out_specs=pl.BlockSpec((b_blk, 1), lambda b, t: (b, 0)),
        scratch_shapes=[pltpu.VMEM((b_blk, kp), jnp.float32)],   # alpha vector
        compiler_params=pltpu.CompilerParams(
            dimension_semantics=("parallel", "arbitrary"),
            vmem_limit_bytes=VMEM_LIMIT),
    )(emit_tm, trans_p, lens_2d)


# ------------------------------ params & glue --------------------------------
def init_params(key, vocab_size, num_tags, embedding_dim, hidden_size):
    ks = jax.random.split(key, 12)
    E, H, K = embedding_dim, hidden_size, num_tags
    s = 1.0 / jnp.sqrt(jnp.float32(H))

    def u(k, shape):
        return jax.random.uniform(k, shape, jnp.float32, -s, s)

    return dict(
        embedding=jax.random.normal(ks[0], (vocab_size, E), jnp.float32),
        w_ih_f=u(ks[1], (4 * H, E)), w_hh_f=u(ks[2], (4 * H, H)),
        b_ih_f=u(ks[3], (4 * H,)), b_hh_f=u(ks[4], (4 * H,)),
        w_ih_b=u(ks[5], (4 * H, E)), w_hh_b=u(ks[6], (4 * H, H)),
        b_ih_b=u(ks[7], (4 * H,)), b_hh_b=u(ks[8], (4 * H,)),
        w_out=u(ks[9], (K, 2 * H)), b_out=u(ks[10], (K,)),
        transition=jax.random.normal(ks[11], (K, K), jnp.float32),
    )


def _pack_lstm_dir(w_ih, w_hh, b_ih, b_hh, h, hp, e, ep):
    """PyTorch (4H,E),(4H,H),(4H,) -> gate-padded, transposed (Ep,4Hp),(Hp,4Hp),(1,4Hp).
    Zero padding keeps padded hidden columns identically zero through the recurrence."""
    w_ih4 = w_ih.reshape(4, h, e)
    w_hh4 = w_hh.reshape(4, h, h)
    b4 = (b_ih + b_hh).reshape(4, h)
    w_ih_p = jnp.zeros((4, hp, ep), jnp.float32).at[:, :h, :e].set(w_ih4)
    w_hh_p = jnp.zeros((4, hp, hp), jnp.float32).at[:, :h, :h].set(w_hh4)
    b_p = jnp.zeros((4, hp), jnp.float32).at[:, :h].set(b4)
    return (w_ih_p.reshape(4 * hp, ep).T,       # (Ep, 4Hp)
            w_hh_p.reshape(4 * hp, hp).T,       # (Hp, 4Hp)
            b_p.reshape(1, 4 * hp))


def bilstm_crf_forward(params, sentences, tags, lengths, pad_idx=0, t_blk=32):
    """sentences, tags: (B, T) int32 ; lengths: (B,) int32 sorted descending.
    Returns per-example CRF loss, shape (B,)."""
    b, t = sentences.shape
    k = params["transition"].shape[0]
    e = params["embedding"].shape[1]
    h = params["w_hh_f"].shape[1]
    hp = _round_up(h, LANE)
    ep = _round_up(e, LANE)
    kp = _round_up(k, LANE)
    bp = _round_up(b, SUBLANE)
    t_blk = max(SUBLANE, min(t_blk, _round_up(t, SUBLANE)))
    tp = _round_up(t, t_blk)

    # ---- pad batch (sublanes) and time (t_blk multiple); loss sliced back later
    sent_p = jnp.full((bp, tp), pad_idx, jnp.int32).at[:b, :t].set(sentences)
    tags_p = jnp.zeros((bp, tp), jnp.int32).at[:b, :t].set(tags)
    lens_p = jnp.ones((bp,), jnp.int32).at[:b].set(lengths.astype(jnp.int32))

    t_idx = jnp.arange(tp)[:, None]
    b_idx = jnp.arange(bp)[None, :]
    valid = t_idx < lens_p[None, :]                              # (Tp, Bp) bool
    mask_tm = valid.astype(jnp.float32)
    tags_tm = tags_p.T                                           # (Tp, Bp)

    # ---- embedding lookup (table zero-padded to Ep lanes), time-major, bf16
    emb_table = (jnp.zeros((params["embedding"].shape[0], ep), jnp.float32)
                 .at[:, :e].set(params["embedding"])).astype(jnp.bfloat16)
    emb = jnp.take(emb_table, sent_p.T, axis=0)                  # (Tp, Bp, Ep)

    # packed-sequence backward direction == per-sequence reversal within length.
    # Padded timesteps re-process the clipped embedding; outputs are masked
    # below and the recurrence is causal, so valid positions are exact.
    rev_idx = jnp.clip(lens_p[None, :] - 1 - t_idx, 0, tp - 1)   # (Tp, Bp)
    emb_rev = emb[rev_idx, b_idx, :]
    x2 = jnp.stack([emb, emb_rev], axis=0)                       # (2,Tp,Bp,Ep) bf16

    # ---- direction-stacked, gate-padded LSTM weights (bf16 MXU operands)
    wih_f, whh_f, b_f = _pack_lstm_dir(params["w_ih_f"], params["w_hh_f"],
                                       params["b_ih_f"], params["b_hh_f"],
                                       h, hp, e, ep)
    wih_b, whh_b, b_b = _pack_lstm_dir(params["w_ih_b"], params["w_hh_b"],
                                       params["b_ih_b"], params["b_hh_b"],
                                       h, hp, e, ep)
    wih2 = jnp.stack([wih_f, wih_b]).astype(jnp.bfloat16)        # (2, Ep, 4Hp)
    whh2 = jnp.stack([whh_f, whh_b]).astype(jnp.bfloat16)        # (2, Hp, 4Hp)
    b2 = jnp.stack([b_f, b_b])                                   # (2, 1, 4Hp)

    # ---- fused input-projection + recurrence, both directions in one kernel
    h_all = bilstm(x2, wih2, whh2, b2, t_blk)                    # (2,Tp,Bp,Hp) bf16

    # pad_packed_sequence semantics: zero hidden states at padded positions
    h_f = jnp.where(valid[:, :, None], h_all[0], 0.0)
    h_b = jnp.where(valid[:, :, None], h_all[1][rev_idx, b_idx, :], 0.0)
    hidden = jnp.concatenate([h_f, h_b], axis=-1)                # (Tp,Bp,2Hp) bf16
    # TODO(synk): fuse emission projection into the BiLSTM kernel to skip this
    # HBM round trip (needs the reversal index via scalar prefetch).

    # ---- emission projection (row-tiled matmul kernel, K padded to 128 lanes)
    w_out_p = (jnp.zeros((kp, 2 * hp), jnp.float32)
               .at[:k, :h].set(params["w_out"][:, :h])
               .at[:k, hp:hp + h].set(params["w_out"][:, h:2 * h]))
    b_out_p = jnp.full((kp,), NEG, jnp.float32).at[:k].set(params["b_out"])

    m = tp * bp
    rows_blk = min(512, m)
    m_pad = _round_up(m, rows_blk)
    hid_flat = hidden.reshape(m, 2 * hp)
    if m_pad > m:
        hid_flat = jnp.concatenate(
            [hid_flat, jnp.zeros((m_pad - m, 2 * hp), hidden.dtype)], axis=0)
    emit2 = emit_projection(hid_flat, w_out_p.T.astype(jnp.bfloat16),
                            b_out_p[None, :], rows_blk)
    emit_tm = emit2[:m].reshape(tp, bp, kp)                      # (Tp, Bp, Kp)
    # TODO(synk): Dropout(p=0.5) on emit_score omitted (eval-mode identity).

    # ---- gold path score via cheap gathers (no one-hot stream into the kernel)
    gold_emit = jnp.take_along_axis(emit_tm, tags_tm[:, :, None],
                                    axis=2)[..., 0]              # (Tp, Bp)
    gold_trans = params["transition"][tags_tm[:-1], tags_tm[1:]]  # (Tp-1, Bp)
    gold = (jnp.sum(gold_emit * mask_tm, axis=0)
            + jnp.sum(gold_trans * mask_tm[1:], axis=0))         # (Bp,)

    # ---- CRF partition function (streamed stabilized-matmul forward recursion)
    trans_p = jnp.full((kp, kp), NEG, jnp.float32).at[:k, :k].set(
        params["transition"])
    b_blk = bp // 2 if bp % 16 == 0 else bp        # v7x megacore batch split
    logz = crf_logz(emit_tm, trans_p, lens_p[:, None], t_blk, b_blk)[:, 0]

    return (logz - gold)[:b]                                     # -log-likelihood


if __name__ == "__main__":
    key = jax.random.PRNGKey(0)
    V, K, E, H = 50, 6, 32, 32          # vocab, tags, embedding_dim, hidden_size
    B, T = 2, 8                          # batch, max_len
    lengths = jnp.array([8, 5], dtype=jnp.int32)   # sorted descending

    kp_, ks_, kt_ = jax.random.split(key, 3)
    params = init_params(kp_, V, K, E, H)

    sentences = jax.random.randint(ks_, (B, T), 1, V, dtype=jnp.int32)
    tags = jax.random.randint(kt_, (B, T), 0, K, dtype=jnp.int32)
    pos = jnp.arange(T)[None, :]
    valid = pos < lengths[:, None]
    sentences = jnp.where(valid, sentences, 0)   # pad_idx = 0
    tags = jnp.where(valid, tags, 0)

    fwd = jax.jit(bilstm_crf_forward, static_argnames=("pad_idx", "t_blk"))
    loss = fwd(params, sentences, tags, lengths)
    jax.block_until_ready(loss)
    if not bool(jnp.all(jnp.isfinite(loss))):
        raise RuntimeError("non-finite loss")
    print("KERNEL_OK")
</pallas_src>

<mosaic_0001>
module attributes {stable_mosaic.version = 11 : i64} {
  func.func @_bilstm_kernel(%arg0: i32, %arg1: i32, %arg2: memref<1x8x8x128xbf16, #tpu.memory_space<vmem>>, %arg3: memref<1x128x512xbf16, #tpu.memory_space<vmem>>, %arg4: memref<1x128x512xbf16, #tpu.memory_space<vmem>>, %arg5: memref<1x1x512xf32, #tpu.memory_space<vmem>>, %arg6: memref<1x8x8x128xbf16, #tpu.memory_space<vmem>>, %arg7: memref<8x128xf32, #tpu.memory_space<vmem>>, %arg8: memref<8x128xf32, #tpu.memory_space<vmem>>, %arg9: memref<64x512xf32, #tpu.memory_space<vmem>>) attributes {dimension_semantics = [#tpu.dimension_semantics<parallel>, #tpu.dimension_semantics<arbitrary>], iteration_bounds = array<i64: 2, 1>, scalar_prefetch = 0 : i64, scratch_operands = 3 : i64, tpu.core_type = #tpu.core_type<tc>, window_params = [{transform_indices = @transform_0, window_bounds = array<i64: 1, 8, 8, 128>}, {transform_indices = @transform_1, window_bounds = array<i64: 1, 128, 512>}, {transform_indices = @transform_2, window_bounds = array<i64: 1, 128, 512>}, {transform_indices = @transform_3, window_bounds = array<i64: 1, 1, 512>}, {transform_indices = @transform_4, window_bounds = array<i64: 1, 8, 8, 128>}]} {
    %c0_i32 = arith.constant 0 : i32
    %0 = arith.cmpi eq, %arg1, %c0_i32 : i32
    %1 = arith.extui %0 : i1 to i32
    %c0_i32_0 = arith.constant 0 : i32
    %2 = arith.cmpi ne, %1, %c0_i32_0 : i32
    scf.if %2 {
      %cst_96 = arith.constant 0.000000e+00 : f32
      %316 = vector.broadcast %cst_96 : f32 to vector<8x128xf32>
      %c0_97 = arith.constant 0 : index
      %c0_98 = arith.constant 0 : index
      %317 = vector.load %arg7[%c0_97, %c0_98] : memref<8x128xf32, #tpu.memory_space<vmem>>, vector<8x128xf32>
      tpu.vector_store %arg7[%c0_97, %c0_98], %316 {strides = array<i32>} : memref<8x128xf32, #tpu.memory_space<vmem>>, vector<8x128xf32>,
      %cst_99 = arith.constant 0.000000e+00 : f32
      %318 = vector.broadcast %cst_99 : f32 to vector<8x128xf32>
      %c0_100 = arith.constant 0 : index
      %c0_101 = arith.constant 0 : index
      %319 = vector.load %arg8[%c0_100, %c0_101] : memref<8x128xf32, #tpu.memory_space<vmem>>, vector<8x128xf32>
      tpu.vector_store %arg8[%c0_100, %c0_101], %318 {strides = array<i32>} : memref<8x128xf32, #tpu.memory_space<vmem>>, vector<8x128xf32>,
    } else {
    }
    %c0 = arith.constant 0 : index
    %c0_1 = arith.constant 0 : index
    %c0_2 = arith.constant 0 : index
    %c0_3 = arith.constant 0 : index
    %3 = vector.load %arg2[%c0, %c0_1, %c0_2, %c0_3] : memref<1x8x8x128xbf16, #tpu.memory_space<vmem>>, vector<1x8x8x128xbf16>
    %4 = vector.shape_cast %3 : vector<1x8x8x128xbf16> to vector<8x8x128xbf16>
    %5 = vector.shape_cast %4 : vector<8x8x128xbf16> to vector<64x128xbf16>
    %c0_4 = arith.constant 0 : index
    %c0_5 = arith.constant 0 : index
    %c0_6 = arith.constant 0 : index
    %6 = vector.load %arg3[%c0_4, %c0_5, %c0_6] : memref<1x128x512xbf16, #tpu.memory_space<vmem>>, vector<1x128x512xbf16>
    %7 = vector.shape_cast %6 : vector<1x128x512xbf16> to vector<128x512xbf16>
    %cst = arith.constant dense<0.000000e+00> : vector<64x512xf32>
    %8 = tpu.matmul %5, %7, %cst {dimension_numbers = #tpu.dot_dimension_numbers<[1], [0], [0], [1], [0, 0, 1, 1], [], []>} : vector<64x128xbf16>, vector<128x512xbf16>, vector<64x512xf32> -> vector<64x512xf32>
    %c0_7 = arith.constant 0 : index
    %c0_8 = arith.constant 0 : index
    %c0_9 = arith.constant 0 : index
    %9 = vector.load %arg5[%c0_7, %c0_8, %c0_9] : memref<1x1x512xf32, #tpu.memory_space<vmem>>, vector<1x1x512xf32>
    %10 = vector.shape_cast %9 : vector<1x1x512xf32> to vector<1x512xf32>
    %11 = vector.broadcast %10 : vector<1x512xf32> to vector<64x512xf32>
    %12 = arith.addf %8, %11 : vector<64x512xf32>
    %c0_10 = arith.constant 0 : index
    %c0_11 = arith.constant 0 : index
    %13 = vector.load %arg9[%c0_10, %c0_11] : memref<64x512xf32, #tpu.memory_space<vmem>>, vector<64x512xf32>
    tpu.vector_store %arg9[%c0_10, %c0_11], %12 {strides = array<i32>} : memref<64x512xf32, #tpu.memory_space<vmem>>, vector<64x512xf32>,
    %c0_12 = arith.constant 0 : index
    %c0_13 = arith.constant 0 : index
    %c0_14 = arith.constant 0 : index
    %14 = vector.load %arg4[%c0_12, %c0_13, %c0_14] : memref<1x128x512xbf16, #tpu.memory_space<vmem>>, vector<1x128x512xbf16>
    %15 = vector.shape_cast %14 : vector<1x128x512xbf16> to vector<128x512xbf16>
    %c0_15 = arith.constant 0 : index
    %c0_16 = arith.constant 0 : index
    %16 = vector.load %arg7[%c0_15, %c0_16] : memref<8x128xf32, #tpu.memory_space<vmem>>, vector<8x128xf32>
    %c0_17 = arith.constant 0 : index
    %c0_18 = arith.constant 0 : index
    %17 = vector.load %arg8[%c0_17, %c0_18] : memref<8x128xf32, #tpu.memory_space<vmem>>, vector<8x128xf32>
    %c0_i32_19 = arith.constant 0 : i32
    %c8_i32 = arith.constant 8 : i32
    %18 = arith.muli %c0_i32_19, %c8_i32 : i32
    %19 = tpu.assume_multiple %18, 8 : i32
    %20 = arith.index_cast %19 : i32 to index
    %c0_20 = arith.constant 0 : index
    %21 = vector.load %arg9[%20, %c0_20] : memref<64x512xf32, #tpu.memory_space<vmem>>, vector<8x512xf32>
    %22 = arith.truncf %16 : vector<8x128xf32> to vector<8x128xbf16>
    %cst_21 = arith.constant dense<0.000000e+00> : vector<8x512xf32>
    %23 = tpu.matmul %22, %15, %cst_21 {dimension_numbers = #tpu.dot_dimension_numbers<[1], [0], [0], [1], [0, 0, 1, 1], [], []>} : vector<8x128xbf16>, vector<128x512xbf16>, vector<8x512xf32> -> vector<8x512xf32>
    %24 = arith.addf %21, %23 : vector<8x512xf32>
    %25 = vector.extract_strided_slice %24 {offsets = [0, 0], sizes = [8, 128], strides = [1, 1]} : vector<8x512xf32> to vector<8x128xf32>
    %26 = arith.negf %25 : vector<8x128xf32>
    %27 = math.exp %26 : vector<8x128xf32>
    %cst_22 = arith.constant 1.000000e+00 : f32
    %28 = vector.broadcast %cst_22 : f32 to vector<8x128xf32>
    %29 = arith.addf %28, %27 : vector<8x128xf32>
    %30 = arith.divf %28, %29 : vector<8x128xf32>
    %31 = vector.extract_strided_slice %24 {offsets = [0, 128], sizes = [8, 128], strides = [1, 1]} : vector<8x512xf32> to vector<8x128xf32>
    %32 = arith.negf %31 : vector<8x128xf32>
    %33 = math.exp %32 : vector<8x128xf32>
    %cst_23 = arith.constant 1.000000e+00 : f32
    %34 = vector.broadcast %cst_23 : f32 to vector<8x128xf32>
    %35 = arith.addf %34, %33 : vector<8x128xf32>
    %36 = arith.divf %34, %35 : vector<8x128xf32>
    %37 = vector.extract_strided_slice %24 {offsets = [0, 256], sizes = [8, 128], strides = [1, 1]} : vector<8x512xf32> to vector<8x128xf32>
    %38 = math.tanh %37 : vector<8x128xf32>
    %39 = vector.extract_strided_slice %24 {offsets = [0, 384], sizes = [8, 128], strides = [1, 1]} : vector<8x512xf32> to vector<8x128xf32>
    %40 = arith.negf %39 : vector<8x128xf32>
    %41 = math.exp %40 : vector<8x128xf32>
    %cst_24 = arith.constant 1.000000e+00 : f32
    %42 = vector.broadcast %cst_24 : f32 to vector<8x128xf32>
    %43 = arith.addf %42, %41 : vector<8x128xf32>
    %44 = arith.divf %42, %43 : vector<8x128xf32>
    %45 = arith.mulf %36, %17 : vector<8x128xf32>
    %46 = arith.mulf %30, %38 : vector<8x128xf32>
    %47 = arith.addf %45, %46 : vector<8x128xf32>
    %48 = math.tanh %47 : vector<8x128xf32>
    %49 = arith.mulf %44, %48 : vector<8x128xf32>
    %50 = arith.truncf %49 : vector<8x128xf32> to vector<8x128xbf16>
    %c0_25 = arith.constant 0 : index
    %51 = arith.index_cast %c0_i32_19 : i32 to index
    %c0_26 = arith.constant 0 : index
    %c0_27 = arith.constant 0 : index
    %52 = vector.load %arg6[%c0_25, %51, %c0_26, %c0_27] : memref<1x8x8x128xbf16, #tpu.memory_space<vmem>>, vector<1x1x8x128xbf16>
    %53 = vector.shape_cast %52 : vector<1x1x8x128xbf16> to vector<8x128xbf16>
    %54 = vector.shape_cast %50 : vector<8x128xbf16> to vector<1x1x8x128xbf16>
    tpu.vector_store %arg6[%c0_25, %51, %c0_26, %c0_27], %54 {strides = array<i32>} : memref<1x8x8x128xbf16, #tpu.memory_space<vmem>>, vector<1x1x8x128xbf16>,
    %c1_i32 = arith.constant 1 : i32
    %c8_i32_28 = arith.constant 8 : i32
    %55 = arith.muli %c1_i32, %c8_i32_28 : i32
    %56 = tpu.assume_multiple %55, 8 : i32
    %57 = arith.index_cast %56 : i32 to index
    %c0_29 = arith.constant 0 : index
    %58 = vector.load %arg9[%57, %c0_29] : memref<64x512xf32, #tpu.memory_space<vmem>>, vector<8x512xf32>
    %59 = arith.truncf %49 : vector<8x128xf32> to vector<8x128xbf16>
    %cst_30 = arith.constant dense<0.000000e+00> : vector<8x512xf32>
    %60 = tpu.matmul %59, %15, %cst_30 {dimension_numbers = #tpu.dot_dimension_numbers<[1], [0], [0], [1], [0, 0, 1, 1], [], []>} : vector<8x128xbf16>, vector<128x512xbf16>, vector<8x512xf32> -> vector<8x512xf32>
    %61 = arith.addf %58, %60 : vector<8x512xf32>
    %62 = vector.extract_strided_slice %61 {offsets = [0, 0], sizes = [8, 128], strides = [1, 1]} : vector<8x512xf32> to vector<8x128xf32>
    %63 = arith.negf %62 : vector<8x128xf32>
    %64 = math.exp %63 : vector<8x128xf32>
    %cst_31 = arith.constant 1.000000e+00 : f32
    %65 = vector.broadcast %cst_31 : f32 to vector<8x128xf32>
    %66 = arith.addf %65, %64 : vector<8x128xf32>
    %67 = arith.divf %65, %66 : vector<8x128xf32>
    %68 = vector.extract_strided_slice %61 {offsets = [0, 128], sizes = [8, 128], strides = [1, 1]} : vector<8x512xf32> to vector<8x128xf32>
    %69 = arith.negf %68 : vector<8x128xf32>
    %70 = math.exp %69 : vector<8x128xf32>
    %cst_32 = arith.constant 1.000000e+00 : f32
    %71 = vector.broadcast %cst_32 : f32 to vector<8x128xf32>
    %72 = arith.addf %71, %70 : vector<8x128xf32>
    %73 = arith.divf %71, %72 : vector<8x128xf32>
    %74 = vector.extract_strided_slice %61 {offsets = [0, 256], sizes = [8, 128], strides = [1, 1]} : vector<8x512xf32> to vector<8x128xf32>
    %75 = math.tanh %74 : vector<8x128xf32>
    %76 = vector.extract_strided_slice %61 {offsets = [0, 384], sizes = [8, 128], strides = [1, 1]} : vector<8x512xf32> to vector<8x128xf32>
    %77 = arith.negf %76 : vector<8x128xf32>
    %78 = math.exp %77 : vector<8x128xf32>
    %cst_33 = arith.constant 1.000000e+00 : f32
    %79 = vector.broadcast %cst_33 : f32 to vector<8x128xf32>
    %80 = arith.addf %79, %78 : vector<8x128xf32>
    %81 = arith.divf %79, %80 : vector<8x128xf32>
    %82 = arith.mulf %73, %47 : vector<8x128xf32>
    %83 = arith.mulf %67, %75 : vector<8x128xf32>
    %84 = arith.addf %82, %83 : vector<8x128xf32>
    %85 = math.tanh %84 : vector<8x128xf32>
    %86 = arith.mulf %81, %85 : vector<8x128xf32>
    %87 = arith.truncf %86 : vector<8x128xf32> to vector<8x128xbf16>
    %c0_34 = arith.constant 0 : index
    %88 = arith.index_cast %c1_i32 : i32 to index
    %c0_35 = arith.constant 0 : index
    %c0_36 = arith.constant 0 : index
    %89 = vector.load %arg6[%c0_34, %88, %c0_35, %c0_36] : memref<1x8x8x128xbf16, #tpu.memory_space<vmem>>, vector<1x1x8x128xbf16>
    %90 = vector.shape_cast %89 : vector<1x1x8x128xbf16> to vector<8x128xbf16>
    %91 = vector.shape_cast %87 : vector<8x128xbf16> to vector<1x1x8x128xbf16>
    tpu.vector_store %arg6[%c0_34, %88, %c0_35, %c0_36], %91 {strides = array<i32>} : memref<1x8x8x128xbf16, #tpu.memory_space<vmem>>, vector<1x1x8x128xbf16>,
    %c2_i32 = arith.constant 2 : i32
    %c8_i32_37 = arith.constant 8 : i32
    %92 = arith.muli %c2_i32, %c8_i32_37 : i32
    %93 = tpu.assume_multiple %92, 8 : i32
    %94 = arith.index_cast %93 : i32 to index
    %c0_38 = arith.constant 0 : index
    %95 = vector.load %arg9[%94, %c0_38] : memref<64x512xf32, #tpu.memory_space<vmem>>, vector<8x512xf32>
    %96 = arith.truncf %86 : vector<8x128xf32> to vector<8x128xbf16>
    %cst_39 = arith.constant dense<0.000000e+00> : vector<8x512xf32>
    %97 = tpu.matmul %96, %15, %cst_39 {dimension_numbers = #tpu.dot_dimension_numbers<[1], [0], [0], [1], [0, 0, 1, 1], [], []>} : vector<8x128xbf16>, vector<128x512xbf16>, vector<8x512xf32> -> vector<8x512xf32>
    %98 = arith.addf %95, %97 : vector<8x512xf32>
    %99 = vector.extract_strided_slice %98 {offsets = [0, 0], sizes = [8, 128], strides = [1, 1]} : vector<8x512xf32> to vector<8x128xf32>
    %100 = arith.negf %99 : vector<8x128xf32>
    %101 = math.exp %100 : vector<8x128xf32>
    %cst_40 = arith.constant 1.000000e+00 : f32
    %102 = vector.broadcast %cst_40 : f32 to vector<8x128xf32>
    %103 = arith.addf %102, %101 : vector<8x128xf32>
    %104 = arith.divf %102, %103 : vector<8x128xf32>
    %105 = vector.extract_strided_slice %98 {offsets = [0, 128], sizes = [8, 128], strides = [1, 1]} : vector<8x512xf32> to vector<8x128xf32>
    %106 = arith.negf %105 : vector<8x128xf32>
    %107 = math.exp %106 : vector<8x128xf32>
    %cst_41 = arith.constant 1.000000e+00 : f32
    %108 = vector.broadcast %cst_41 : f32 to vector<8x128xf32>
    %109 = arith.addf %108, %107 : vector<8x128xf32>
    %110 = arith.divf %108, %109 : vector<8x128xf32>
    %111 = vector.extract_strided_slice %98 {offsets = [0, 256], sizes = [8, 128], strides = [1, 1]} : vector<8x512xf32> to vector<8x128xf32>
    %112 = math.tanh %111 : vector<8x128xf32>
    %113 = vector.extract_strided_slice %98 {offsets = [0, 384], sizes = [8, 128], strides = [1, 1]} : vector<8x512xf32> to vector<8x128xf32>
    %114 = arith.negf %113 : vector<8x128xf32>
    %115 = math.exp %114 : vector<8x128xf32>
    %cst_42 = arith.constant 1.000000e+00 : f32
    %116 = vector.broadcast %cst_42 : f32 to vector<8x128xf32>
    %117 = arith.addf %116, %115 : vector<8x128xf32>
    %118 = arith.divf %116, %117 : vector<8x128xf32>
    %119 = arith.mulf %110, %84 : vector<8x128xf32>
    %120 = arith.mulf %104, %112 : vector<8x128xf32>
    %121 = arith.addf %119, %120 : vector<8x128xf32>
    %122 = math.tanh %121 : vector<8x128xf32>
    %123 = arith.mulf %118, %122 : vector<8x128xf32>
    %124 = arith.truncf %123 : vector<8x128xf32> to vector<8x128xbf16>
    %c0_43 = arith.constant 0 : index
    %125 = arith.index_cast %c2_i32 : i32 to index
    %c0_44 = arith.constant 0 : index
    %c0_45 = arith.constant 0 : index
    %126 = vector.load %arg6[%c0_43, %125, %c0_44, %c0_45] : memref<1x8x8x128xbf16, #tpu.memory_space<vmem>>, vector<1x1x8x128xbf16>
    %127 = vector.shape_cast %126 : vector<1x1x8x128xbf16> to vector<8x128xbf16>
    %128 = vector.shape_cast %124 : vector<8x128xbf16> to vector<1x1x8x128xbf16>
    tpu.vector_store %arg6[%c0_43, %125, %c0_44, %c0_45], %128 {strides = array<i32>} : memref<1x8x8x128xbf16, #tpu.memory_space<vmem>>, vector<1x1x8x128xbf16>,
    %c3_i32 = arith.constant 3 : i32
    %c8_i32_46 = arith.constant 8 : i32
    %129 = arith.muli %c3_i32, %c8_i32_46 : i32
    %130 = tpu.assume_multiple %129, 8 : i32
    %131 = arith.index_cast %130 : i32 to index
    %c0_47 = arith.constant 0 : index
    %132 = vector.load %arg9[%131, %c0_47] : memref<64x512xf32, #tpu.memory_space<vmem>>, vector<8x512xf32>
    %133 = arith.truncf %123 : vector<8x128xf32> to vector<8x128xbf16>
    %cst_48 = arith.constant dense<0.000000e+00> : vector<8x512xf32>
    %134 = tpu.matmul %133, %15, %cst_48 {dimension_numbers = #tpu.dot_dimension_numbers<[1], [0], [0], [1], [0, 0, 1, 1], [], []>} : vector<8x128xbf16>, vector<128x512xbf16>, vector<8x512xf32> -> vector<8x512xf32>
    %135 = arith.addf %132, %134 : vector<8x512xf32>
    %136 = vector.extract_strided_slice %135 {offsets = [0, 0], sizes = [8, 128], strides = [1, 1]} : vector<8x512xf32> to vector<8x128xf32>
    %137 = arith.negf %136 : vector<8x128xf32>
    %138 = math.exp %137 : vector<8x128xf32>
    %cst_49 = arith.constant 1.000000e+00 : f32
    %139 = vector.broadcast %cst_49 : f32 to vector<8x128xf32>
    %140 = arith.addf %139, %138 : vector<8x128xf32>
    %141 = arith.divf %139, %140 : vector<8x128xf32>
    %142 = vector.extract_strided_slice %135 {offsets = [0, 128], sizes = [8, 128], strides = [1, 1]} : vector<8x512xf32> to vector<8x128xf32>
    %143 = arith.negf %142 : vector<8x128xf32>
    %144 = math.exp %143 : vector<8x128xf32>
    %cst_50 = arith.constant 1.000000e+00 : f32
    %145 = vector.broadcast %cst_50 : f32 to vector<8x128xf32>
    %146 = arith.addf %145, %144 : vector<8x128xf32>
    %147 = arith.divf %145, %146 : vector<8x128xf32>
    %148 = vector.extract_strided_slice %135 {offsets = [0, 256], sizes = [8, 128], strides = [1, 1]} : vector<8x512xf32> to vector<8x128xf32>
    %149 = math.tanh %148 : vector<8x128xf32>
    %150 = vector.extract_strided_slice %135 {offsets = [0, 384], sizes = [8, 128], strides = [1, 1]} : vector<8x512xf32> to vector<8x128xf32>
    %151 = arith.negf %150 : vector<8x128xf32>
    %152 = math.exp %151 : vector<8x128xf32>
    %cst_51 = arith.constant 1.000000e+00 : f32
    %153 = vector.broadcast %cst_51 : f32 to vector<8x128xf32>
    %154 = arith.addf %153, %152 : vector<8x128xf32>
    %155 = arith.divf %153, %154 : vector<8x128xf32>
    %156 = arith.mulf %147, %121 : vector<8x128xf32>
    %157 = arith.mulf %141, %149 : vector<8x128xf32>
    %158 = arith.addf %156, %157 : vector<8x128xf32>
    %159 = math.tanh %158 : vector<8x128xf32>
    %160 = arith.mulf %155, %159 : vector<8x128xf32>
    %161 = arith.truncf %160 : vector<8x128xf32> to vector<8x128xbf16>
    %c0_52 = arith.constant 0 : index
    %162 = arith.index_cast %c3_i32 : i32 to index
    %c0_53 = arith.constant 0 : index
    %c0_54 = arith.constant 0 : index
    %163 = vector.load %arg6[%c0_52, %162, %c0_53, %c0_54] : memref<1x8x8x128xbf16, #tpu.memory_space<vmem>>, vector<1x1x8x128xbf16>
    %164 = vector.shape_cast %163 : vector<1x1x8x128xbf16> to vector<8x128xbf16>
    %165 = vector.shape_cast %161 : vector<8x128xbf16> to vector<1x1x8x128xbf16>
    tpu.vector_store %arg6[%c0_52, %162, %c0_53, %c0_54], %165 {strides = array<i32>} : memref<1x8x8x128xbf16, #tpu.memory_space<vmem>>, vector<1x1x8x128xbf16>,
    %c4_i32 = arith.constant 4 : i32
    %c8_i32_55 = arith.constant 8 : i32
    %166 = arith.muli %c4_i32, %c8_i32_55 : i32
    %167 = tpu.assume_multiple %166, 8 : i32
    %168 = arith.index_cast %167 : i32 to index
    %c0_56 = arith.constant 0 : index
    %169 = vector.load %arg9[%168, %c0_56] : memref<64x512xf32, #tpu.memory_space<vmem>>, vector<8x512xf32>
    %170 = arith.truncf %160 : vector<8x128xf32> to vector<8x128xbf16>
    %cst_57 = arith.constant dense<0.000000e+00> : vector<8x512xf32>
    %171 = tpu.matmul %170, %15, %cst_57 {dimension_numbers = #tpu.dot_dimension_numbers<[1], [0], [0], [1], [0, 0, 1, 1], [], []>} : vector<8x128xbf16>, vector<128x512xbf16>, vector<8x512xf32> -> vector<8x512xf32>
    %172 = arith.addf %169, %171 : vector<8x512xf32>
    %173 = vector.extract_strided_slice %172 {offsets = [0, 0], sizes = [8, 128], strides = [1, 1]} : vector<8x512xf32> to vector<8x128xf32>
    %174 = arith.negf %173 : vector<8x128xf32>
    %175 = math.exp %174 : vector<8x128xf32>
    %cst_58 = arith.constant 1.000000e+00 : f32
    %176 = vector.broadcast %cst_58 : f32 to vector<8x128xf32>
    %177 = arith.addf %176, %175 : vector<8x128xf32>
    %178 = arith.divf %176, %177 : vector<8x128xf32>
    %179 = vector.extract_strided_slice %172 {offsets = [0, 128], sizes = [8, 128], strides = [1, 1]} : vector<8x512xf32> to vector<8x128xf32>
    %180 = arith.negf %179 : vector<8x128xf32>
    %181 = math.exp %180 : vector<8x128xf32>
    %cst_59 = arith.constant 1.000000e+00 : f32
    %182 = vector.broadcast %cst_59 : f32 to vector<8x128xf32>
    %183 = arith.addf %182, %181 : vector<8x128xf32>
    %184 = arith.divf %182, %183 : vector<8x128xf32>
    %185 = vector.extract_strided_slice %172 {offsets = [0, 256], sizes = [8, 128], strides = [1, 1]} : vector<8x512xf32> to vector<8x128xf32>
    %186 = math.tanh %185 : vector<8x128xf32>
    %187 = vector.extract_strided_slice %172 {offsets = [0, 384], sizes = [8, 128], strides = [1, 1]} : vector<8x512xf32> to vector<8x128xf32>
    %188 = arith.negf %187 : vector<8x128xf32>
    %189 = math.exp %188 : vector<8x128xf32>
    %cst_60 = arith.constant 1.000000e+00 : f32
    %190 = vector.broadcast %cst_60 : f32 to vector<8x128xf32>
    %191 = arith.addf %190, %189 : vector<8x128xf32>
    %192 = arith.divf %190, %191 : vector<8x128xf32>
    %193 = arith.mulf %184, %158 : vector<8x128xf32>
    %194 = arith.mulf %178, %186 : vector<8x128xf32>
    %195 = arith.addf %193, %194 : vector<8x128xf32>
    %196 = math.tanh %195 : vector<8x128xf32>
    %197 = arith.mulf %192, %196 : vector<8x128xf32>
    %198 = arith.truncf %197 : vector<8x128xf32> to vector<8x128xbf16>
    %c0_61 = arith.constant 0 : index
    %199 = arith.index_cast %c4_i32 : i32 to index
    %c0_62 = arith.constant 0 : index
    %c0_63 = arith.constant 0 : index
    %200 = vector.load %arg6[%c0_61, %199, %c0_62, %c0_63] : memref<1x8x8x128xbf16, #tpu.memory_space<vmem>>, vector<1x1x8x128xbf16>
    %201 = vector.shape_cast %200 : vector<1x1x8x128xbf16> to vector<8x128xbf16>
    %202 = vector.shape_cast %198 : vector<8x128xbf16> to vector<1x1x8x128xbf16>
    tpu.vector_store %arg6[%c0_61, %199, %c0_62, %c0_63], %202 {strides = array<i32>} : memref<1x8x8x128xbf16, #tpu.memory_space<vmem>>, vector<1x1x8x128xbf16>,
    %c5_i32 = arith.constant 5 : i32
    %c8_i32_64 = arith.constant 8 : i32
    %203 = arith.muli %c5_i32, %c8_i32_64 : i32
    %204 = tpu.assume_multiple %203, 8 : i32
    %205 = arith.index_cast %204 : i32 to index
    %c0_65 = arith.constant 0 : index
    %206 = vector.load %arg9[%205, %c0_65] : memref<64x512xf32, #tpu.memory_space<vmem>>, vector<8x512xf32>
    %207 = arith.truncf %197 : vector<8x128xf32> to vector<8x128xbf16>
    %cst_66 = arith.constant dense<0.000000e+00> : vector<8x512xf32>
    %208 = tpu.matmul %207, %15, %cst_66 {dimension_numbers = #tpu.dot_dimension_numbers<[1], [0], [0], [1], [0, 0, 1, 1], [], []>} : vector<8x128xbf16>, vector<128x512xbf16>, vector<8x512xf32> -> vector<8x512xf32>
    %209 = arith.addf %206, %208 : vector<8x512xf32>
    %210 = vector.extract_strided_slice %209 {offsets = [0, 0], sizes = [8, 128], strides = [1, 1]} : vector<8x512xf32> to vector<8x128xf32>
    %211 = arith.negf %210 : vector<8x128xf32>
    %212 = math.exp %211 : vector<8x128xf32>
    %cst_67 = arith.constant 1.000000e+00 : f32
    %213 = vector.broadcast %cst_67 : f32 to vector<8x128xf32>
    %214 = arith.addf %213, %212 : vector<8x128xf32>
    %215 = arith.divf %213, %214 : vector<8x128xf32>
    %216 = vector.extract_strided_slice %209 {offsets = [0, 128], sizes = [8, 128], strides = [1, 1]} : vector<8x512xf32> to vector<8x128xf32>
    %217 = arith.negf %216 : vector<8x128xf32>
    %218 = math.exp %217 : vector<8x128xf32>
    %cst_68 = arith.constant 1.000000e+00 : f32
    %219 = vector.broadcast %cst_68 : f32 to vector<8x128xf32>
    %220 = arith.addf %219, %218 : vector<8x128xf32>
    %221 = arith.divf %219, %220 : vector<8x128xf32>
    %222 = vector.extract_strided_slice %209 {offsets = [0, 256], sizes = [8, 128], strides = [1, 1]} : vector<8x512xf32> to vector<8x128xf32>
    %223 = math.tanh %222 : vector<8x128xf32>
    %224 = vector.extract_strided_slice %209 {offsets = [0, 384], sizes = [8, 128], strides = [1, 1]} : vector<8x512xf32> to vector<8x128xf32>
    %225 = arith.negf %224 : vector<8x128xf32>
    %226 = math.exp %225 : vector<8x128xf32>
    %cst_69 = arith.constant 1.000000e+00 : f32
    %227 = vector.broadcast %cst_69 : f32 to vector<8x128xf32>
    %228 = arith.addf %227, %226 : vector<8x128xf32>
    %229 = arith.divf %227, %228 : vector<8x128xf32>
    %230 = arith.mulf %221, %195 : vector<8x128xf32>
    %231 = arith.mulf %215, %223 : vector<8x128xf32>
    %232 = arith.addf %230, %231 : vector<8x128xf32>
    %233 = math.tanh %232 : vector<8x128xf32>
    %234 = arith.mulf %229, %233 : vector<8x128xf32>
    %235 = arith.truncf %234 : vector<8x128xf32> to vector<8x128xbf16>
    %c0_70 = arith.constant 0 : index
    %236 = arith.index_cast %c5_i32 : i32 to index
    %c0_71 = arith.constant 0 : index
    %c0_72 = arith.constant 0 : index
    %237 = vector.load %arg6[%c0_70, %236, %c0_71, %c0_72] : memref<1x8x8x128xbf16, #tpu.memory_space<vmem>>, vector<1x1x8x128xbf16>
    %238 = vector.shape_cast %237 : vector<1x1x8x128xbf16> to vector<8x128xbf16>
    %239 = vector.shape_cast %235 : vector<8x128xbf16> to vector<1x1x8x128xbf16>
    tpu.vector_store %arg6[%c0_70, %236, %c0_71, %c0_72], %239 {strides = array<i32>} : memref<1x8x8x128xbf16, #tpu.memory_space<vmem>>, vector<1x1x8x128xbf16>,
    %c6_i32 = arith.constant 6 : i32
    %c8_i32_73 = arith.constant 8 : i32
    %240 = arith.muli %c6_i32, %c8_i32_73 : i32
    %241 = tpu.assume_multiple %240, 8 : i32
    %242 = arith.index_cast %241 : i32 to index
    %c0_74 = arith.constant 0 : index
    %243 = vector.load %arg9[%242, %c0_74] : memref<64x512xf32, #tpu.memory_space<vmem>>, vector<8x512xf32>
    %244 = arith.truncf %234 : vector<8x128xf32> to vector<8x128xbf16>
    %cst_75 = arith.constant dense<0.000000e+00> : vector<8x512xf32>
    %245 = tpu.matmul %244, %15, %cst_75 {dimension_numbers = #tpu.dot_dimension_numbers<[1], [0], [0], [1], [0, 0, 1, 1], [], []>} : vector<8x128xbf16>, vector<128x512xbf16>, vector<8x512xf32> -> vector<8x512xf32>
    %246 = arith.addf %243, %245 : vector<8x512xf32>
    %247 = vector.extract_strided_slice %246 {offsets = [0, 0], sizes = [8, 128], strides = [1, 1]} : vector<8x512xf32> to vector<8x128xf32>
    %248 = arith.negf %247 : vector<8x128xf32>
    %249 = math.exp %248 : vector<8x128xf32>
    %cst_76 = arith.constant 1.000000e+00 : f32
    %250 = vector.broadcast %cst_76 : f32 to vector<8x128xf32>
    %251 = arith.addf %250, %249 : vector<8x128xf32>
    %252 = arith.divf %250, %251 : vector<8x128xf32>
    %253 = vector.extract_strided_slice %246 {offsets = [0, 128], sizes = [8, 128], strides = [1, 1]} : vector<8x512xf32> to vector<8x128xf32>
    %254 = arith.negf %253 : vector<8x128xf32>
    %255 = math.exp %254 : vector<8x128xf32>
    %cst_77 = arith.constant 1.000000e+00 : f32
    %256 = vector.broadcast %cst_77 : f32 to vector<8x128xf32>
    %257 = arith.addf %256, %255 : vector<8x128xf32>
    %258 = arith.divf %256, %257 : vector<8x128xf32>
    %259 = vector.extract_strided_slice %246 {offsets = [0, 256], sizes = [8, 128], strides = [1, 1]} : vector<8x512xf32> to vector<8x128xf32>
    %260 = math.tanh %259 : vector<8x128xf32>
    %261 = vector.extract_strided_slice %246 {offsets = [0, 384], sizes = [8, 128], strides = [1, 1]} : vector<8x512xf32> to vector<8x128xf32>
    %262 = arith.negf %261 : vector<8x128xf32>
    %263 = math.exp %262 : vector<8x128xf32>
    %cst_78 = arith.constant 1.000000e+00 : f32
    %264 = vector.broadcast %cst_78 : f32 to vector<8x128xf32>
    %265 = arith.addf %264, %263 : vector<8x128xf32>
    %266 = arith.divf %264, %265 : vector<8x128xf32>
    %267 = arith.mulf %258, %232 : vector<8x128xf32>
    %268 = arith.mulf %252, %260 : vector<8x128xf32>
    %269 = arith.addf %267, %268 : vector<8x128xf32>
    %270 = math.tanh %269 : vector<8x128xf32>
    %271 = arith.mulf %266, %270 : vector<8x128xf32>
    %272 = arith.truncf %271 : vector<8x128xf32> to vector<8x128xbf16>
    %c0_79 = arith.constant 0 : index
    %273 = arith.index_cast %c6_i32 : i32 to index
    %c0_80 = arith.constant 0 : index
    %c0_81 = arith.constant 0 : index
    %274 = vector.load %arg6[%c0_79, %273, %c0_80, %c0_81] : memref<1x8x8x128xbf16, #tpu.memory_space<vmem>>, vector<1x1x8x128xbf16>
    %275 = vector.shape_cast %274 : vector<1x1x8x128xbf16> to vector<8x128xbf16>
    %276 = vector.shape_cast %272 : vector<8x128xbf16> to vector<1x1x8x128xbf16>
    tpu.vector_store %arg6[%c0_79, %273, %c0_80, %c0_81], %276 {strides = array<i32>} : memref<1x8x8x128xbf16, #tpu.memory_space<vmem>>, vector<1x1x8x128xbf16>,
    %c7_i32 = arith.constant 7 : i32
    %c8_i32_82 = arith.constant 8 : i32
    %277 = arith.muli %c7_i32, %c8_i32_82 : i32
    %278 = tpu.assume_multiple %277, 8 : i32
    %279 = arith.index_cast %278 : i32 to index
    %c0_83 = arith.constant 0 : index
    %280 = vector.load %arg9[%279, %c0_83] : memref<64x512xf32, #tpu.memory_space<vmem>>, vector<8x512xf32>
    %281 = arith.truncf %271 : vector<8x128xf32> to vector<8x128xbf16>
    %cst_84 = arith.constant dense<0.000000e+00> : vector<8x512xf32>
    %282 = tpu.matmul %281, %15, %cst_84 {dimension_numbers = #tpu.dot_dimension_numbers<[1], [0], [0], [1], [0, 0, 1, 1], [], []>} : vector<8x128xbf16>, vector<128x512xbf16>, vector<8x512xf32> -> vector<8x512xf32>
    %283 = arith.addf %280, %282 : vector<8x512xf32>
    %284 = vector.extract_strided_slice %283 {offsets = [0, 0], sizes = [8, 128], strides = [1, 1]} : vector<8x512xf32> to vector<8x128xf32>
    %285 = arith.negf %284 : vector<8x128xf32>
    %286 = math.exp %285 : vector<8x128xf32>
    %cst_85 = arith.constant 1.000000e+00 : f32
    %287 = vector.broadcast %cst_85 : f32 to vector<8x128xf32>
    %288 = arith.addf %287, %286 : vector<8x128xf32>
    %289 = arith.divf %287, %288 : vector<8x128xf32>
    %290 = vector.extract_strided_slice %283 {offsets = [0, 128], sizes = [8, 128], strides = [1, 1]} : vector<8x512xf32> to vector<8x128xf32>
    %291 = arith.negf %290 : vector<8x128xf32>
    %292 = math.exp %291 : vector<8x128xf32>
    %cst_86 = arith.constant 1.000000e+00 : f32
    %293 = vector.broadcast %cst_86 : f32 to vector<8x128xf32>
    %294 = arith.addf %293, %292 : vector<8x128xf32>
    %295 = arith.divf %293, %294 : vector<8x128xf32>
    %296 = vector.extract_strided_slice %283 {offsets = [0, 256], sizes = [8, 128], strides = [1, 1]} : vector<8x512xf32> to vector<8x128xf32>
    %297 = math.tanh %296 : vector<8x128xf32>
    %298 = vector.extract_strided_slice %283 {offsets = [0, 384], sizes = [8, 128], strides = [1, 1]} : vector<8x512xf32> to vector<8x128xf32>
    %299 = arith.negf %298 : vector<8x128xf32>
    %300 = math.exp %299 : vector<8x128xf32>
    %cst_87 = arith.constant 1.000000e+00 : f32
    %301 = vector.broadcast %cst_87 : f32 to vector<8x128xf32>
    %302 = arith.addf %301, %300 : vector<8x128xf32>
    %303 = arith.divf %301, %302 : vector<8x128xf32>
    %304 = arith.mulf %295, %269 : vector<8x128xf32>
    %305 = arith.mulf %289, %297 : vector<8x128xf32>
    %306 = arith.addf %304, %305 : vector<8x128xf32>
    %307 = math.tanh %306 : vector<8x128xf32>
    %308 = arith.mulf %303, %307 : vector<8x128xf32>
    %309 = arith.truncf %308 : vector<8x128xf32> to vector<8x128xbf16>
    %c0_88 = arith.constant 0 : index
    %310 = arith.index_cast %c7_i32 : i32 to index
    %c0_89 = arith.constant 0 : index
    %c0_90 = arith.constant 0 : index
    %311 = vector.load %arg6[%c0_88, %310, %c0_89, %c0_90] : memref<1x8x8x128xbf16, #tpu.memory_space<vmem>>, vector<1x1x8x128xbf16>
    %312 = vector.shape_cast %311 : vector<1x1x8x128xbf16> to vector<8x128xbf16>
    %313 = vector.shape_cast %309 : vector<8x128xbf16> to vector<1x1x8x128xbf16>
    tpu.vector_store %arg6[%c0_88, %310, %c0_89, %c0_90], %313 {strides = array<i32>} : memref<1x8x8x128xbf16, #tpu.memory_space<vmem>>, vector<1x1x8x128xbf16>,
    %c8_i32_91 = arith.constant 8 : i32
    %c0_92 = arith.constant 0 : index
    %c0_93 = arith.constant 0 : index
    %314 = vector.load %arg7[%c0_92, %c0_93] : memref<8x128xf32, #tpu.memory_space<vmem>>, vector<8x128xf32>
    tpu.vector_store %arg7[%c0_92, %c0_93], %308 {strides = array<i32>} : memref<8x128xf32, #tpu.memory_space<vmem>>, vector<8x128xf32>,
    %c0_94 = arith.constant 0 : index
    %c0_95 = arith.constant 0 : index
    %315 = vector.load %arg8[%c0_94, %c0_95] : memref<8x128xf32, #tpu.memory_space<vmem>>, vector<8x128xf32>
    tpu.vector_store %arg8[%c0_94, %c0_95], %306 {strides = array<i32>} : memref<8x128xf32, #tpu.memory_space<vmem>>, vector<8x128xf32>,
    return
  }
  func.func @transform_0(%arg0: i32, %arg1: i32) -> (i32, i32, i32, i32) {
    %c0_i32 = arith.constant 0 : i32
    %c0_i32_0 = arith.constant 0 : i32
    %c0_i32_1 = arith.constant 0 : i32
    return %arg0, %arg1, %c0_i32, %c0_i32_0 : i32, i32, i32, i32
  }
  func.func @transform_1(%arg0: i32, %arg1: i32) -> (i32, i32, i32) {
    %c0_i32 = arith.constant 0 : i32
    %c0_i32_0 = arith.constant 0 : i32
    %c0_i32_1 = arith.constant 0 : i32
    return %arg0, %c0_i32, %c0_i32_0 : i32, i32, i32
  }
  func.func @transform_2(%arg0: i32, %arg1: i32) -> (i32, i32, i32) {
    %c0_i32 = arith.constant 0 : i32
    %c0_i32_0 = arith.constant 0 : i32
    %c0_i32_1 = arith.constant 0 : i32
    return %arg0, %c0_i32, %c0_i32_0 : i32, i32, i32
  }
  func.func @transform_3(%arg0: i32, %arg1: i32) -> (i32, i32, i32) {
    %c0_i32 = arith.constant 0 : i32
    %c0_i32_0 = arith.constant 0 : i32
    %c0_i32_1 = arith.constant 0 : i32
    return %arg0, %c0_i32, %c0_i32_0 : i32, i32, i32
  }
  func.func @transform_4(%arg0: i32, %arg1: i32) -> (i32, i32, i32, i32) {
    %c0_i32 = arith.constant 0 : i32
    %c0_i32_0 = arith.constant 0 : i32
    %c0_i32_1 = arith.constant 0 : i32
    return %arg0, %arg1, %c0_i32, %c0_i32_0 : i32, i32, i32, i32
  }
}

module attributes {stable_mosaic.version = 11 : i64} {
  func.func @_emit_kernel(%arg0: i32, %arg1: memref<64x256xbf16, #tpu.memory_space<vmem>>, %arg2: memref<256x128xbf16, #tpu.memory_space<vmem>>, %arg3: memref<1x128xf32, #tpu.memory_space<vmem>>, %arg4: memref<64x128xf32, #tpu.memory_space<vmem>>) attributes {dimension_semantics = [#tpu.dimension_semantics<parallel>], iteration_bounds = array<i64: 1>, scalar_prefetch = 0 : i64, scratch_operands = 0 : i64, tpu.core_type = #tpu.core_type<tc>, window_params = [{transform_indices = @transform_0, window_bounds = array<i64: 64, 256>}, {pipeline_mode = #tpu.pipeline_mode<synchronous>, transform_indices = @transform_1, window_bounds = array<i64: 256, 128>}, {pipeline_mode = #tpu.pipeline_mode<synchronous>, transform_indices = @transform_2, window_bounds = array<i64: 1, 128>}, {transform_indices = @transform_3, window_bounds = array<i64: 64, 128>}]} {
    %c0 = arith.constant 0 : index
    %c0_0 = arith.constant 0 : index
    %0 = vector.load %arg1[%c0, %c0_0] : memref<64x256xbf16, #tpu.memory_space<vmem>>, vector<64x256xbf16>
    %c0_1 = arith.constant 0 : index
    %c0_2 = arith.constant 0 : index
    %1 = vector.load %arg2[%c0_1, %c0_2] : memref<256x128xbf16, #tpu.memory_space<vmem>>, vector<256x128xbf16>
    %cst = arith.constant dense<0.000000e+00> : vector<64x128xf32>
    %2 = tpu.matmul %0, %1, %cst {dimension_numbers = #tpu.dot_dimension_numbers<[1], [0], [0], [1], [0, 0, 1, 1], [], []>} : vector<64x256xbf16>, vector<256x128xbf16>, vector<64x128xf32> -> vector<64x128xf32>
    %c0_3 = arith.constant 0 : index
    %c0_4 = arith.constant 0 : index
    %3 = vector.load %arg3[%c0_3, %c0_4] : memref<1x128xf32, #tpu.memory_space<vmem>>, vector<1x128xf32>
    %4 = vector.broadcast %3 : vector<1x128xf32> to vector<64x128xf32>
    %5 = arith.addf %2, %4 : vector<64x128xf32>
    %c0_5 = arith.constant 0 : index
    %c0_6 = arith.constant 0 : index
    %6 = vector.load %arg4[%c0_5, %c0_6] : memref<64x128xf32, #tpu.memory_space<vmem>>, vector<64x128xf32>
    tpu.vector_store %arg4[%c0_5, %c0_6], %5 {strides = array<i32>} : memref<64x128xf32, #tpu.memory_space<vmem>>, vector<64x128xf32>,
    return
  }
  func.func @transform_0(%arg0: i32) -> (i32, i32) {
    %c0_i32 = arith.constant 0 : i32
    %c0_i32_0 = arith.constant 0 : i32
    return %arg0, %c0_i32 : i32, i32
  }
  func.func @transform_1(%arg0: i32) -> (i32, i32) {
    %c0_i32 = arith.constant 0 : i32
    %c0_i32_0 = arith.constant 0 : i32
    %c0_i32_1 = arith.constant 0 : i32
    return %c0_i32, %c0_i32_0 : i32, i32
  }
  func.func @transform_2(%arg0: i32) -> (i32, i32) {
    %c0_i32 = arith.constant 0 : i32
    %c0_i32_0 = arith.constant 0 : i32
    %c0_i32_1 = arith.constant 0 : i32
    return %c0_i32, %c0_i32_0 : i32, i32
  }
  func.func @transform_3(%arg0: i32) -> (i32, i32) {
    %c0_i32 = arith.constant 0 : i32
    %c0_i32_0 = arith.constant 0 : i32
    return %arg0, %c0_i32 : i32, i32
  }
}

module attributes {stable_mosaic.version = 11 : i64} {
  func.func @_crf_logz_kernel(%arg0: i32, %arg1: i32, %arg2: memref<8x8x128xf32, #tpu.memory_space<vmem>>, %arg3: memref<128x128xf32, #tpu.memory_space<vmem>>, %arg4: memref<8x1xi32, #tpu.memory_space<vmem>>, %arg5: memref<8x1xf32, #tpu.memory_space<vmem>>, %arg6: memref<8x128xf32, #tpu.memory_space<vmem>>) attributes {dimension_semantics = [#tpu.dimension_semantics<parallel>, #tpu.dimension_semantics<arbitrary>], iteration_bounds = array<i64: 1, 1>, scalar_prefetch = 0 : i64, scratch_operands = 1 : i64, tpu.core_type = #tpu.core_type<tc>, window_params = [{transform_indices = @transform_0, window_bounds = array<i64: 8, 8, 128>}, {pipeline_mode = #tpu.pipeline_mode<synchronous>, transform_indices = @transform_1, window_bounds = array<i64: 128, 128>}, {transform_indices = @transform_2, window_bounds = array<i64: 8, 1>}, {transform_indices = @transform_3, window_bounds = array<i64: 8, 1>}]} {
    %c0 = arith.constant 0 : index
    %c0_0 = arith.constant 0 : index
    %0 = vector.load %arg3[%c0, %c0_0] : memref<128x128xf32, #tpu.memory_space<vmem>>, vector<128x128xf32>
    %cst = arith.constant dense<0xFF800000> : vector<128xf32>
    %1 = vector.multi_reduction <maximumf>, %0, %cst [0] : vector<128x128xf32> to vector<128xf32>
    %2 = vector.shape_cast %1 : vector<128xf32> to vector<1x128xf32>
    %3 = vector.broadcast %2 : vector<1x128xf32> to vector<128x128xf32>
    %4 = arith.subf %0, %3 : vector<128x128xf32>
    %5 = math.exp %4 : vector<128x128xf32>
    %c0_1 = arith.constant 0 : index
    %c0_2 = arith.constant 0 : index
    %6 = vector.load %arg4[%c0_1, %c0_2] : memref<8x1xi32, #tpu.memory_space<vmem>>, vector<8x1xi32>
    %c0_i32 = arith.constant 0 : i32
    %7 = arith.cmpi eq, %arg1, %c0_i32 : i32
    %8 = arith.extui %7 : i1 to i32
    %c0_i32_3 = arith.constant 0 : i32
    %9 = arith.cmpi ne, %8, %c0_i32_3 : i32
    scf.if %9 {
      %c0_59 = arith.constant 0 : index
      %c0_60 = arith.constant 0 : index
      %c0_61 = arith.constant 0 : index
      %215 = vector.load %arg2[%c0_59, %c0_60, %c0_61] : memref<8x8x128xf32, #tpu.memory_space<vmem>>, vector<1x8x128xf32>
      %216 = vector.shape_cast %215 : vector<1x8x128xf32> to vector<8x128xf32>
      %c0_62 = arith.constant 0 : index
      %c0_63 = arith.constant 0 : index
      %217 = vector.load %arg6[%c0_62, %c0_63] : memref<8x128xf32, #tpu.memory_space<vmem>>, vector<8x128xf32>
      tpu.vector_store %arg6[%c0_62, %c0_63], %216 {strides = array<i32>} : memref<8x128xf32, #tpu.memory_space<vmem>>, vector<8x128xf32>,
    } else {
    }
    %c0_4 = arith.constant 0 : index
    %c0_5 = arith.constant 0 : index
    %10 = vector.load %arg6[%c0_4, %c0_5] : memref<8x128xf32, #tpu.memory_space<vmem>>, vector<8x128xf32>
    %c0_i32_6 = arith.constant 0 : i32
    %c8_i32 = arith.constant 8 : i32
    %11 = arith.muli %arg1, %c8_i32 : i32
    %12 = arith.addi %11, %c0_i32_6 : i32
    %13 = arith.index_cast %c0_i32_6 : i32 to index
    %c0_7 = arith.constant 0 : index
    %c0_8 = arith.constant 0 : index
    %14 = vector.load %arg2[%13, %c0_7, %c0_8] : memref<8x8x128xf32, #tpu.memory_space<vmem>>, vector<1x8x128xf32>
    %15 = vector.shape_cast %14 : vector<1x8x128xf32> to vector<8x128xf32>
    %cst_9 = arith.constant dense<0xFF800000> : vector<8xf32>
    %16 = vector.multi_reduction <maximumf>, %10, %cst_9 [1] : vector<8x128xf32> to vector<8xf32>
    %17 = vector.shape_cast %16 : vector<8xf32> to vector<8x1xf32>
    %18 = vector.broadcast %17 : vector<8x1xf32> to vector<8x128xf32>
    %19 = arith.subf %10, %18 : vector<8x128xf32>
    %20 = math.exp %19 : vector<8x128xf32>
    %cst_10 = arith.constant dense<0.000000e+00> : vector<8x128xf32>
    %21 = tpu.matmul %20, %5, %cst_10 {dimension_numbers = #tpu.dot_dimension_numbers<[1], [0], [0], [1], [0, 0, 1, 1], [], []>} : vector<8x128xf32>, vector<128x128xf32>, vector<8x128xf32> -> vector<8x128xf32>
    %22 = vector.broadcast %17 : vector<8x1xf32> to vector<8x128xf32>
    %23 = vector.broadcast %2 : vector<1x128xf32> to vector<8x128xf32>
    %24 = arith.addf %22, %23 : vector<8x128xf32>
    %25 = math.log %21 : vector<8x128xf32>
    %26 = arith.addf %24, %25 : vector<8x128xf32>
    %27 = arith.addf %26, %15 : vector<8x128xf32>
    %c1_i32 = arith.constant 1 : i32
    %28 = arith.cmpi sge, %12, %c1_i32 : i32
    %29 = vector.broadcast %12 : i32 to vector<8x1xi32>
    %30 = arith.cmpi slt, %29, %6 : vector<8x1xi32>
    %31 = vector.broadcast %28 : i1 to vector<8x1xi1>
    %32 = arith.andi %31, %30 : vector<8x1xi1>
    %33 = vector.shape_cast %32 : vector<8x1xi1> to vector<8x1xi1>
    %34 = vector.broadcast %33 : vector<8x1xi1> to vector<8x128xi1>
    %35 = arith.select %34, %27, %10 : vector<8x128xi1>, vector<8x128xf32>
    %c1_i32_11 = arith.constant 1 : i32
    %c8_i32_12 = arith.constant 8 : i32
    %36 = arith.muli %arg1, %c8_i32_12 : i32
    %37 = arith.addi %36, %c1_i32_11 : i32
    %38 = arith.index_cast %c1_i32_11 : i32 to index
    %c0_13 = arith.constant 0 : index
    %c0_14 = arith.constant 0 : index
    %39 = vector.load %arg2[%38, %c0_13, %c0_14] : memref<8x8x128xf32, #tpu.memory_space<vmem>>, vector<1x8x128xf32>
    %40 = vector.shape_cast %39 : vector<1x8x128xf32> to vector<8x128xf32>
    %cst_15 = arith.constant dense<0xFF800000> : vector<8xf32>
    %41 = vector.multi_reduction <maximumf>, %35, %cst_15 [1] : vector<8x128xf32> to vector<8xf32>
    %42 = vector.shape_cast %41 : vector<8xf32> to vector<8x1xf32>
    %43 = vector.broadcast %42 : vector<8x1xf32> to vector<8x128xf32>
    %44 = arith.subf %35, %43 : vector<8x128xf32>
    %45 = math.exp %44 : vector<8x128xf32>
    %cst_16 = arith.constant dense<0.000000e+00> : vector<8x128xf32>
    %46 = tpu.matmul %45, %5, %cst_16 {dimension_numbers = #tpu.dot_dimension_numbers<[1], [0], [0], [1], [0, 0, 1, 1], [], []>} : vector<8x128xf32>, vector<128x128xf32>, vector<8x128xf32> -> vector<8x128xf32>
    %47 = vector.broadcast %42 : vector<8x1xf32> to vector<8x128xf32>
    %48 = vector.broadcast %2 : vector<1x128xf32> to vector<8x128xf32>
    %49 = arith.addf %47, %48 : vector<8x128xf32>
    %50 = math.log %46 : vector<8x128xf32>
    %51 = arith.addf %49, %50 : vector<8x128xf32>
    %52 = arith.addf %51, %40 : vector<8x128xf32>
    %c1_i32_17 = arith.constant 1 : i32
    %53 = arith.cmpi sge, %37, %c1_i32_17 : i32
    %54 = vector.broadcast %37 : i32 to vector<8x1xi32>
    %55 = arith.cmpi slt, %54, %6 : vector<8x1xi32>
    %56 = vector.broadcast %53 : i1 to vector<8x1xi1>
    %57 = arith.andi %56, %55 : vector<8x1xi1>
    %58 = vector.shape_cast %57 : vector<8x1xi1> to vector<8x1xi1>
    %59 = vector.broadcast %58 : vector<8x1xi1> to vector<8x128xi1>
    %60 = arith.select %59, %52, %35 : vector<8x128xi1>, vector<8x128xf32>
    %c2_i32 = arith.constant 2 : i32
    %c8_i32_18 = arith.constant 8 : i32
    %61 = arith.muli %arg1, %c8_i32_18 : i32
    %62 = arith.addi %61, %c2_i32 : i32
    %63 = arith.index_cast %c2_i32 : i32 to index
    %c0_19 = arith.constant 0 : index
    %c0_20 = arith.constant 0 : index
    %64 = vector.load %arg2[%63, %c0_19, %c0_20] : memref<8x8x128xf32, #tpu.memory_space<vmem>>, vector<1x8x128xf32>
    %65 = vector.shape_cast %64 : vector<1x8x128xf32> to vector<8x128xf32>
    %cst_21 = arith.constant dense<0xFF800000> : vector<8xf32>
    %66 = vector.multi_reduction <maximumf>, %60, %cst_21 [1] : vector<8x128xf32> to vector<8xf32>
    %67 = vector.shape_cast %66 : vector<8xf32> to vector<8x1xf32>
    %68 = vector.broadcast %67 : vector<8x1xf32> to vector<8x128xf32>
    %69 = arith.subf %60, %68 : vector<8x128xf32>
    %70 = math.exp %69 : vector<8x128xf32>
    %cst_22 = arith.constant dense<0.000000e+00> : vector<8x128xf32>
    %71 = tpu.matmul %70, %5, %cst_22 {dimension_numbers = #tpu.dot_dimension_numbers<[1], [0], [0], [1], [0, 0, 1, 1], [], []>} : vector<8x128xf32>, vector<128x128xf32>, vector<8x128xf32> -> vector<8x128xf32>
    %72 = vector.broadcast %67 : vector<8x1xf32> to vector<8x128xf32>
    %73 = vector.broadcast %2 : vector<1x128xf32> to vector<8x128xf32>
    %74 = arith.addf %72, %73 : vector<8x128xf32>
    %75 = math.log %71 : vector<8x128xf32>
    %76 = arith.addf %74, %75 : vector<8x128xf32>
    %77 = arith.addf %76, %65 : vector<8x128xf32>
    %c1_i32_23 = arith.constant 1 : i32
    %78 = arith.cmpi sge, %62, %c1_i32_23 : i32
    %79 = vector.broadcast %62 : i32 to vector<8x1xi32>
    %80 = arith.cmpi slt, %79, %6 : vector<8x1xi32>
    %81 = vector.broadcast %78 : i1 to vector<8x1xi1>
    %82 = arith.andi %81, %80 : vector<8x1xi1>
    %83 = vector.shape_cast %82 : vector<8x1xi1> to vector<8x1xi1>
    %84 = vector.broadcast %83 : vector<8x1xi1> to vector<8x128xi1>
    %85 = arith.select %84, %77, %60 : vector<8x128xi1>, vector<8x128xf32>
    %c3_i32 = arith.constant 3 : i32
    %c8_i32_24 = arith.constant 8 : i32
    %86 = arith.muli %arg1, %c8_i32_24 : i32
    %87 = arith.addi %86, %c3_i32 : i32
    %88 = arith.index_cast %c3_i32 : i32 to index
    %c0_25 = arith.constant 0 : index
    %c0_26 = arith.constant 0 : index
    %89 = vector.load %arg2[%88, %c0_25, %c0_26] : memref<8x8x128xf32, #tpu.memory_space<vmem>>, vector<1x8x128xf32>
    %90 = vector.shape_cast %89 : vector<1x8x128xf32> to vector<8x128xf32>
    %cst_27 = arith.constant dense<0xFF800000> : vector<8xf32>
    %91 = vector.multi_reduction <maximumf>, %85, %cst_27 [1] : vector<8x128xf32> to vector<8xf32>
    %92 = vector.shape_cast %91 : vector<8xf32> to vector<8x1xf32>
    %93 = vector.broadcast %92 : vector<8x1xf32> to vector<8x128xf32>
    %94 = arith.subf %85, %93 : vector<8x128xf32>
    %95 = math.exp %94 : vector<8x128xf32>
    %cst_28 = arith.constant dense<0.000000e+00> : vector<8x128xf32>
    %96 = tpu.matmul %95, %5, %cst_28 {dimension_numbers = #tpu.dot_dimension_numbers<[1], [0], [0], [1], [0, 0, 1, 1], [], []>} : vector<8x128xf32>, vector<128x128xf32>, vector<8x128xf32> -> vector<8x128xf32>
    %97 = vector.broadcast %92 : vector<8x1xf32> to vector<8x128xf32>
    %98 = vector.broadcast %2 : vector<1x128xf32> to vector<8x128xf32>
    %99 = arith.addf %97, %98 : vector<8x128xf32>
    %100 = math.log %96 : vector<8x128xf32>
    %101 = arith.addf %99, %100 : vector<8x128xf32>
    %102 = arith.addf %101, %90 : vector<8x128xf32>
    %c1_i32_29 = arith.constant 1 : i32
    %103 = arith.cmpi sge, %87, %c1_i32_29 : i32
    %104 = vector.broadcast %87 : i32 to vector<8x1xi32>
    %105 = arith.cmpi slt, %104, %6 : vector<8x1xi32>
    %106 = vector.broadcast %103 : i1 to vector<8x1xi1>
    %107 = arith.andi %106, %105 : vector<8x1xi1>
    %108 = vector.shape_cast %107 : vector<8x1xi1> to vector<8x1xi1>
    %109 = vector.broadcast %108 : vector<8x1xi1> to vector<8x128xi1>
    %110 = arith.select %109, %102, %85 : vector<8x128xi1>, vector<8x128xf32>
    %c4_i32 = arith.constant 4 : i32
    %c8_i32_30 = arith.constant 8 : i32
    %111 = arith.muli %arg1, %c8_i32_30 : i32
    %112 = arith.addi %111, %c4_i32 : i32
    %113 = arith.index_cast %c4_i32 : i32 to index
    %c0_31 = arith.constant 0 : index
    %c0_32 = arith.constant 0 : index
    %114 = vector.load %arg2[%113, %c0_31, %c0_32] : memref<8x8x128xf32, #tpu.memory_space<vmem>>, vector<1x8x128xf32>
    %115 = vector.shape_cast %114 : vector<1x8x128xf32> to vector<8x128xf32>
    %cst_33 = arith.constant dense<0xFF800000> : vector<8xf32>
    %116 = vector.multi_reduction <maximumf>, %110, %cst_33 [1] : vector<8x128xf32> to vector<8xf32>
    %117 = vector.shape_cast %116 : vector<8xf32> to vector<8x1xf32>
    %118 = vector.broadcast %117 : vector<8x1xf32> to vector<8x128xf32>
    %119 = arith.subf %110, %118 : vector<8x128xf32>
    %120 = math.exp %119 : vector<8x128xf32>
    %cst_34 = arith.constant dense<0.000000e+00> : vector<8x128xf32>
    %121 = tpu.matmul %120, %5, %cst_34 {dimension_numbers = #tpu.dot_dimension_numbers<[1], [0], [0], [1], [0, 0, 1, 1], [], []>} : vector<8x128xf32>, vector<128x128xf32>, vector<8x128xf32> -> vector<8x128xf32>
    %122 = vector.broadcast %117 : vector<8x1xf32> to vector<8x128xf32>
    %123 = vector.broadcast %2 : vector<1x128xf32> to vector<8x128xf32>
    %124 = arith.addf %122, %123 : vector<8x128xf32>
    %125 = math.log %121 : vector<8x128xf32>
    %126 = arith.addf %124, %125 : vector<8x128xf32>
    %127 = arith.addf %126, %115 : vector<8x128xf32>
    %c1_i32_35 = arith.constant 1 : i32
    %128 = arith.cmpi sge, %112, %c1_i32_35 : i32
    %129 = vector.broadcast %112 : i32 to vector<8x1xi32>
    %130 = arith.cmpi slt, %129, %6 : vector<8x1xi32>
    %131 = vector.broadcast %128 : i1 to vector<8x1xi1>
    %132 = arith.andi %131, %130 : vector<8x1xi1>
    %133 = vector.shape_cast %132 : vector<8x1xi1> to vector<8x1xi1>
    %134 = vector.broadcast %133 : vector<8x1xi1> to vector<8x128xi1>
    %135 = arith.select %134, %127, %110 : vector<8x128xi1>, vector<8x128xf32>
    %c5_i32 = arith.constant 5 : i32
    %c8_i32_36 = arith.constant 8 : i32
    %136 = arith.muli %arg1, %c8_i32_36 : i32
    %137 = arith.addi %136, %c5_i32 : i32
    %138 = arith.index_cast %c5_i32 : i32 to index
    %c0_37 = arith.constant 0 : index
    %c0_38 = arith.constant 0 : index
    %139 = vector.load %arg2[%138, %c0_37, %c0_38] : memref<8x8x128xf32, #tpu.memory_space<vmem>>, vector<1x8x128xf32>
    %140 = vector.shape_cast %139 : vector<1x8x128xf32> to vector<8x128xf32>
    %cst_39 = arith.constant dense<0xFF800000> : vector<8xf32>
    %141 = vector.multi_reduction <maximumf>, %135, %cst_39 [1] : vector<8x128xf32> to vector<8xf32>
    %142 = vector.shape_cast %141 : vector<8xf32> to vector<8x1xf32>
    %143 = vector.broadcast %142 : vector<8x1xf32> to vector<8x128xf32>
    %144 = arith.subf %135, %143 : vector<8x128xf32>
    %145 = math.exp %144 : vector<8x128xf32>
    %cst_40 = arith.constant dense<0.000000e+00> : vector<8x128xf32>
    %146 = tpu.matmul %145, %5, %cst_40 {dimension_numbers = #tpu.dot_dimension_numbers<[1], [0], [0], [1], [0, 0, 1, 1], [], []>} : vector<8x128xf32>, vector<128x128xf32>, vector<8x128xf32> -> vector<8x128xf32>
    %147 = vector.broadcast %142 : vector<8x1xf32> to vector<8x128xf32>
    %148 = vector.broadcast %2 : vector<1x128xf32> to vector<8x128xf32>
    %149 = arith.addf %147, %148 : vector<8x128xf32>
    %150 = math.log %146 : vector<8x128xf32>
    %151 = arith.addf %149, %150 : vector<8x128xf32>
    %152 = arith.addf %151, %140 : vector<8x128xf32>
    %c1_i32_41 = arith.constant 1 : i32
    %153 = arith.cmpi sge, %137, %c1_i32_41 : i32
    %154 = vector.broadcast %137 : i32 to vector<8x1xi32>
    %155 = arith.cmpi slt, %154, %6 : vector<8x1xi32>
    %156 = vector.broadcast %153 : i1 to vector<8x1xi1>
    %157 = arith.andi %156, %155 : vector<8x1xi1>
    %158 = vector.shape_cast %157 : vector<8x1xi1> to vector<8x1xi1>
    %159 = vector.broadcast %158 : vector<8x1xi1> to vector<8x128xi1>
    %160 = arith.select %159, %152, %135 : vector<8x128xi1>, vector<8x128xf32>
    %c6_i32 = arith.constant 6 : i32
    %c8_i32_42 = arith.constant 8 : i32
    %161 = arith.muli %arg1, %c8_i32_42 : i32
    %162 = arith.addi %161, %c6_i32 : i32
    %163 = arith.index_cast %c6_i32 : i32 to index
    %c0_43 = arith.constant 0 : index
    %c0_44 = arith.constant 0 : index
    %164 = vector.load %arg2[%163, %c0_43, %c0_44] : memref<8x8x128xf32, #tpu.memory_space<vmem>>, vector<1x8x128xf32>
    %165 = vector.shape_cast %164 : vector<1x8x128xf32> to vector<8x128xf32>
    %cst_45 = arith.constant dense<0xFF800000> : vector<8xf32>
    %166 = vector.multi_reduction <maximumf>, %160, %cst_45 [1] : vector<8x128xf32> to vector<8xf32>
    %167 = vector.shape_cast %166 : vector<8xf32> to vector<8x1xf32>
    %168 = vector.broadcast %167 : vector<8x1xf32> to vector<8x128xf32>
    %169 = arith.subf %160, %168 : vector<8x128xf32>
    %170 = math.exp %169 : vector<8x128xf32>
    %cst_46 = arith.constant dense<0.000000e+00> : vector<8x128xf32>
    %171 = tpu.matmul %170, %5, %cst_46 {dimension_numbers = #tpu.dot_dimension_numbers<[1], [0], [0], [1], [0, 0, 1, 1], [], []>} : vector<8x128xf32>, vector<128x128xf32>, vector<8x128xf32> -> vector<8x128xf32>
    %172 = vector.broadcast %167 : vector<8x1xf32> to vector<8x128xf32>
    %173 = vector.broadcast %2 : vector<1x128xf32> to vector<8x128xf32>
    %174 = arith.addf %172, %173 : vector<8x128xf32>
    %175 = math.log %171 : vector<8x128xf32>
    %176 = arith.addf %174, %175 : vector<8x128xf32>
    %177 = arith.addf %176, %165 : vector<8x128xf32>
    %c1_i32_47 = arith.constant 1 : i32
    %178 = arith.cmpi sge, %162, %c1_i32_47 : i32
    %179 = vector.broadcast %162 : i32 to vector<8x1xi32>
    %180 = arith.cmpi slt, %179, %6 : vector<8x1xi32>
    %181 = vector.broadcast %178 : i1 to vector<8x1xi1>
    %182 = arith.andi %181, %180 : vector<8x1xi1>
    %183 = vector.shape_cast %182 : vector<8x1xi1> to vector<8x1xi1>
    %184 = vector.broadcast %183 : vector<8x1xi1> to vector<8x128xi1>
    %185 = arith.select %184, %177, %160 : vector<8x128xi1>, vector<8x128xf32>
    %c7_i32 = arith.constant 7 : i32
    %c8_i32_48 = arith.constant 8 : i32
    %186 = arith.muli %arg1, %c8_i32_48 : i32
    %187 = arith.addi %186, %c7_i32 : i32
    %188 = arith.index_cast %c7_i32 : i32 to index
    %c0_49 = arith.constant 0 : index
    %c0_50 = arith.constant 0 : index
    %189 = vector.load %arg2[%188, %c0_49, %c0_50] : memref<8x8x128xf32, #tpu.memory_space<vmem>>, vector<1x8x128xf32>
    %190 = vector.shape_cast %189 : vector<1x8x128xf32> to vector<8x128xf32>
    %cst_51 = arith.constant dense<0xFF800000> : vector<8xf32>
    %191 = vector.multi_reduction <maximumf>, %185, %cst_51 [1] : vector<8x128xf32> to vector<8xf32>
    %192 = vector.shape_cast %191 : vector<8xf32> to vector<8x1xf32>
    %193 = vector.broadcast %192 : vector<8x1xf32> to vector<8x128xf32>
    %194 = arith.subf %185, %193 : vector<8x128xf32>
    %195 = math.exp %194 : vector<8x128xf32>
    %cst_52 = arith.constant dense<0.000000e+00> : vector<8x128xf32>
    %196 = tpu.matmul %195, %5, %cst_52 {dimension_numbers = #tpu.dot_dimension_numbers<[1], [0], [0], [1], [0, 0, 1, 1], [], []>} : vector<8x128xf32>, vector<128x128xf32>, vector<8x128xf32> -> vector<8x128xf32>
    %197 = vector.broadcast %192 : vector<8x1xf32> to vector<8x128xf32>
    %198 = vector.broadcast %2 : vector<1x128xf32> to vector<8x128xf32>
    %199 = arith.addf %197, %198 : vector<8x128xf32>
    %200 = math.log %196 : vector<8x128xf32>
    %201 = arith.addf %199, %200 : vector<8x128xf32>
    %202 = arith.addf %201, %190 : vector<8x128xf32>
    %c1_i32_53 = arith.constant 1 : i32
    %203 = arith.cmpi sge, %187, %c1_i32_53 : i32
    %204 = vector.broadcast %187 : i32 to vector<8x1xi32>
    %205 = arith.cmpi slt, %204, %6 : vector<8x1xi32>
    %206 = vector.broadcast %203 : i1 to vector<8x1xi1>
    %207 = arith.andi %206, %205 : vector<8x1xi1>
    %208 = vector.shape_cast %207 : vector<8x1xi1> to vector<8x1xi1>
    %209 = vector.broadcast %208 : vector<8x1xi1> to vector<8x128xi1>
    %210 = arith.select %209, %202, %185 : vector<8x128xi1>, vector<8x128xf32>
    %c8_i32_54 = arith.constant 8 : i32
    %c0_55 = arith.constant 0 : index
    %c0_56 = arith.constant 0 : index
    %211 = vector.load %arg6[%c0_55, %c0_56] : memref<8x128xf32, #tpu.memory_space<vmem>>, vector<8x128xf32>
    tpu.vector_store %arg6[%c0_55, %c0_56], %210 {strides = array<i32>} : memref<8x128xf32, #tpu.memory_space<vmem>>, vector<8x128xf32>,
    %c0_i32_57 = arith.constant 0 : i32
    %212 = arith.cmpi eq, %arg1, %c0_i32_57 : i32
    %213 = arith.extui %212 : i1 to i32
    %c0_i32_58 = arith.constant 0 : i32
    %214 = arith.cmpi ne, %213, %c0_i32_58 : i32
    scf.if %214 {
      %cst_59 = arith.constant dense<0xFF800000> : vector<8xf32>
      %215 = vector.multi_reduction <maximumf>, %210, %cst_59 [1] : vector<8x128xf32> to vector<8xf32>
      %216 = vector.shape_cast %215 : vector<8xf32> to vector<8x1xf32>
      %217 = vector.broadcast %216 : vector<8x1xf32> to vector<8x128xf32>
      %218 = arith.subf %210, %217 : vector<8x128xf32>
      %219 = math.exp %218 : vector<8x128xf32>
      %cst_60 = arith.constant dense<0.000000e+00> : vector<8xf32>
      %220 = vector.multi_reduction <add>, %219, %cst_60 [1] : vector<8x128xf32> to vector<8xf32>
      %221 = vector.shape_cast %220 : vector<8xf32> to vector<8x1xf32>
      %222 = math.log %221 : vector<8x1xf32>
      %223 = arith.addf %216, %222 : vector<8x1xf32>
      %c0_61 = arith.constant 0 : index
      %c0_62 = arith.constant 0 : index
      %224 = vector.load %arg5[%c0_61, %c0_62] : memref<8x1xf32, #tpu.memory_space<vmem>>, vector<8x1xf32>
      tpu.vector_store %arg5[%c0_61, %c0_62], %223 {strides = array<i32>} : memref<8x1xf32, #tpu.memory_space<vmem>>, vector<8x1xf32>,
    } else {
    }
    return
  }
  func.func @transform_0(%arg0: i32, %arg1: i32) -> (i32, i32, i32) {
    %c0_i32 = arith.constant 0 : i32
    %c0_i32_0 = arith.constant 0 : i32
    return %arg1, %arg0, %c0_i32 : i32, i32, i32
  }
  func.func @transform_1(%arg0: i32, %arg1: i32) -> (i32, i32) {
    %c0_i32 = arith.constant 0 : i32
    %c0_i32_0 = arith.constant 0 : i32
    %c0_i32_1 = arith.constant 0 : i32
    return %c0_i32, %c0_i32_0 : i32, i32
  }
  func.func @transform_2(%arg0: i32, %arg1: i32) -> (i32, i32) {
    %c0_i32 = arith.constant 0 : i32
    %c0_i32_0 = arith.constant 0 : i32
    return %arg0, %c0_i32 : i32, i32
  }
  func.func @transform_3(%arg0: i32, %arg1: i32) -> (i32, i32) {
    %c0_i32 = arith.constant 0 : i32
    %c0_i32_0 = arith.constant 0 : i32
    return %arg0, %c0_i32 : i32, i32
  }
}

</mosaic_0001>

<bundles_post_ra>
// kernel: lt.12
= control target key start
LH: loop header
LB: loop body
LE: loop exit
PB: predicated region body
PF: predicated region fallthrough
CT: control target
= control target key end

     0   :  { %v15_v2 = vmov 0   ;;  %s40_s0 = inlined_call_operand.vmem [shape: s32[64], index: 0, kind: input, shape index: {}]   ;;  %s41_s1 = inlined_call_operand.vmem [shape: s32[64], index: 1, kind: input, shape index: {}]   ;;  %s42_s2 = inlined_call_operand.vmem [shape: pred[64], index: 2, kind: output, shape index: {}]  }
   0x1   :  { %v3_v0 = vld [vmem:[%s40_s0] sm:$0x1] }
   0x2   :  { %v4_v1 = vld [vmem:[%s41_s1] sm:$0x1] }
   0x3   :  { %vm7_vm0 = vcmp.lt.s32.totalorder %v3_v0, %v4_v1 }
   0x4   :  { %v8_v3 = vsel %vm7_vm0, 1, %v15_v2 }
   0x5   :  { %v10_v4 = vpack.c.b16 %v15_v2, %v8_v3 }
   0x7   :  { %v11_v5 = vpack.c.b8 %v15_v2, %v10_v4 }
   0x9   :  { %13 = vst [vmem:[%s42_s2] sm:$0x1] %v11_v5 }

// kernel: bilstm_crf_forward.4
= control target key start
LH: loop header
LB: loop body
LE: loop exit
PB: predicated region body
PF: predicated region fallthrough
CT: control target
= control target key end

     0   :  { %s503_s1 = inlined_call_operand.vmem [shape: bf16[256,128], index: 1, kind: input, shape index: {}]   ;;  %s504_s0 = inlined_call_operand.vmem [shape: bf16[64,256], index: 0, kind: input, shape index: {}]   ;;  %s505_s2 = inlined_call_operand.vmem [shape: f32[1,128], index: 2, kind: input, shape index: {}]   ;;  %s506_s3 = inlined_call_operand.vmem [shape: f32[64,128], index: 3, kind: output, shape index: {}]  }
   0x1   :  { %v356_v0 = vld [vmem:[%s503_s1 + $0x40] sm:$0xff]   ;;  %v358_v2 = vld [vmem:[%s503_s1 + $0x48] sm:$0xff]   ;;  %v360_v4 = vld [vmem:[%s503_s1 + $0x50] sm:$0xff]  }
   0x2   :  { %v357_v1 = vld [vmem:[%s503_s1] sm:$0xff]   ;;  %300 = vmatprep.subr.bf16.mxu0 %v356_v0  ;;  %340 = vmatprep.subr.bf16.mxu1 %v356_v0  ;;  %v359_v3 = vld [vmem:[%s503_s1 + $0x8] sm:$0xff]   ;;  %v361_v5 = vld [vmem:[%s503_s1 + $0x10] sm:$0xff]  }
   0x3   :  { %301 = vmatpush3.bf16.msra.mxu0 %v357_v1  ;;  %348 = vmatpush3.bf16.msra.mxu1 %v357_v1  ;;  %v362_v6 = vld [vmem:[%s503_s1 + $0x58] sm:$0xff]   ;;  %v364_v8 = vld [vmem:[%s503_s1 + $0x60] sm:$0xff]   ;;  %v366_v10 = vld [vmem:[%s503_s1 + $0x68] sm:$0xff]  }
   0x4   :  { %302 = vmatprep.subr.bf16.mxu0 %v358_v2  ;;  %341 = vmatprep.subr.bf16.mxu1 %v358_v2  ;;  %v363_v7 = vld [vmem:[%s503_s1 + $0x18] sm:$0xff]   ;;  %v365_v9 = vld [vmem:[%s503_s1 + $0x20] sm:$0xff]   ;;  %v367_v13 = vld [vmem:[%s503_s1 + $0x28] sm:$0xff]  }
   0x5   :  { %v374_v11 = vld [vmem:[%s504_s0 + $0x4] ss:$8 sps:$4 sm:$0xff]   ;;  %v368_v14 = vld [vmem:[%s503_s1 + $0x70] sm:$0xff]   ;;  %v370_v16 = vld [vmem:[%s503_s1 + $0x78] sm:$0xff]  }
   0x6   :  { %v377_v12 = vld [vmem:[%s504_s0 + $0x24] ss:$8 sps:$4 sm:$0xff]   ;;  %230 = vmatprep.mubr.bf16.mxu0 %v374_v11  ;;  %v369_v15 = vld [vmem:[%s503_s1 + $0x30] sm:$0xff]   ;;  %v371_v17 = vld [vmem:[%s503_s1 + $0x38] sm:$0xff]  }
   0x7   :  { %303 = vmatpush3.bf16.msra.mxu0 %v359_v3  ;;  %349 = vmatpush3.bf16.msra.mxu1 %v359_v3  ;;  %v372_v18 = vld [vmem:[%s504_s0] ss:$8 sps:$4 sm:$0xff]   ;;  %v378_v20 = vld [vmem:[%s504_s0 + $0x14] ss:$8 sps:$4 sm:$0xff]   ;;  %v382_v22 = vld [vmem:[%s504_s0 + $0x10] ss:$8 sps:$4 sm:$0xff]  }
   0x8   :  { %304 = vmatprep.subr.bf16.mxu0 %v360_v4  ;;  %342 = vmatprep.subr.bf16.mxu1 %v360_v4  ;;  %v375_v19 = vld [vmem:[%s504_s0 + $0x20] ss:$8 sps:$4 sm:$0xff]   ;;  %v380_v21 = vld [vmem:[%s504_s0 + $0x34] ss:$8 sps:$4 sm:$0xff]   ;;  %v383_v23 = vld [vmem:[%s504_s0 + $0x30] ss:$8 sps:$4 sm:$0xff]  }
   0x9   :  { %246 = vmatprep.mubr.bf16.mxu1 %v377_v12  ;;  %v275_v26 = vld [vmem:[%s505_s2] ss:$0 sm:$0xff] }
   0xb   :  { %305 = vmatpush3.bf16.msra.mxu0 %v361_v5  ;;  %350 = vmatpush3.bf16.msra.mxu1 %v361_v5 }
   0xc   :  { %306 = vmatprep.subr.bf16.mxu0 %v362_v6  ;;  %343 = vmatprep.subr.bf16.mxu1 %v362_v6 }
   0xf   :  { %307 = vmatpush3.bf16.msra.mxu0 %v363_v7  ;;  %351 = vmatpush3.bf16.msra.mxu1 %v363_v7 }
  0x10   :  { %308 = vmatprep.subr.bf16.mxu0 %v364_v8  ;;  %344 = vmatprep.subr.bf16.mxu1 %v364_v8 }
  0x13   :  { %309 = vmatpush3.bf16.msra.mxu0 %v365_v9  ;;  %352 = vmatpush3.bf16.msra.mxu1 %v365_v9 }
  0x14   :  { %310 = vmatprep.subr.bf16.mxu0 %v366_v10  ;;  %345 = vmatprep.subr.bf16.mxu1 %v366_v10 }
  0x17   :  { %311 = vmatpush3.bf16.msra.mxu0 %v367_v13  ;;  %353 = vmatpush3.bf16.msra.mxu1 %v367_v13 }
  0x18   :  { %312 = vmatprep.subr.bf16.mxu0 %v368_v14  ;;  %346 = vmatprep.subr.bf16.mxu1 %v368_v14 }
  0x1b   :  { %313 = vmatpush3.bf16.msra.mxu0 %v369_v15  ;;  %354 = vmatpush3.bf16.msra.mxu1 %v369_v15 }
  0x1c   :  { %314 = vmatprep.subr.bf16.mxu0 %v370_v16  ;;  %347 = vmatprep.subr.bf16.mxu1 %v370_v16 }
  0x1f   :  { %315 = vmatpush3.bf16.msra.mxu0 %v371_v17  ;;  %355 = vmatpush3.bf16.msra.mxu1 %v371_v17 }
  0x22   :  { %231 = vmatmul.mubr.bf16.vlgmr.msra.gmra.mrb[0].mxu0 %v372_v18  ;;  %247 = vmatmul.mubr.bf16.vlgmr.msra.gmra.mrb[0].mxu1 %v375_v19 }
  0x23   :  { %238 = vmatprep.mubr.bf16.mxu0 %v378_v20  ;;  %254 = vmatprep.mubr.bf16.mxu1 %v380_v21 }
  0x2a   :  { %239 = vmatmul.mubr.bf16.gmra.mrb[4].mxu0 %v382_v22  ;;  %255 = vmatmul.mubr.bf16.gmra.mrb[4].mxu1 %v383_v23 }
  0xf5   :  { %v316_v24 = vpop.f32.mrb[0].mxu0  ;;  %v328_v25 = vpop.f32.mrb[0].mxu1 }
  0xf6   :  { %v317_v27 = vpop.f32.mrb[1].mxu0  ;;  %v329_v28 = vpop.f32.mrb[1].mxu1 }
  0xf7   :  { %v318_v29 = vadd.f32 %v317_v27, %v316_v24  ;;  %v330_v30 = vadd.f32 %v329_v28, %v328_v25  ;;  %v319_v31 = vpop.f32.mrb[2].mxu0  ;;  %v331_v32 = vpop.f32.mrb[2].mxu1 }
  0xf8   :  { %v320_v33 = vpop.f32.mrb[3].mxu0  ;;  %v332_v34 = vpop.f32.mrb[3].mxu1 }
  0xf9   :  { %v233_v35 = vadd.f32 %v318_v29, %v275_v26  ;;  %v249_v36 = vadd.f32 %v330_v30, %v275_v26  ;;  %v321_v37 = vadd.f32 %v320_v33, %v319_v31  ;;  %v333_v38 = vadd.f32 %v332_v34, %v331_v32 }
  0xfb   :  { %263 = vst [vmem:[%s506_s3] sm:$0xff] %v233_v35  ;;  %267 = vst [vmem:[%s506_s3 + $0x20] sm:$0xff] %v249_v36  ;;  %v236_v39 = vadd.f32 %v321_v37, %v275_v26  ;;  %v252_v40 = vadd.f32 %v333_v38, %v275_v26 }
  0xfd   :  { %264 = vst [vmem:[%s506_s3 + $0x8] sm:$0xff] %v236_v39  ;;  %268 = vst [vmem:[%s506_s3 + $0x28] sm:$0xff] %v252_v40  ;;  %v322_v41 = vpop.f32.mrb[4].mxu0  ;;  %v334_v42 = vpop.f32.mrb[4].mxu1 }
  0xfe   :  { %v323_v43 = vpop.f32.mrb[5].mxu0  ;;  %v335_v44 = vpop.f32.mrb[5].mxu1 }
  0xff   :  { %v324_v45 = vadd.f32 %v323_v43, %v322_v41  ;;  %v336_v46 = vadd.f32 %v335_v44, %v334_v42  ;;  %v325_v47 = vpop.f32.mrb[6].mxu0  ;;  %v337_v48 = vpop.f32.mrb[6].mxu1 }
 0x100   :  { %v326_v49 = vpop.f32.mrb[7].mxu0  ;;  %v338_v50 = vpop.f32.mrb[7].mxu1 }
 0x101   :  { %v241_v51 = vadd.f32 %v324_v45, %v275_v26  ;;  %v257_v52 = vadd.f32 %v336_v46, %v275_v26  ;;  %v327_v53 = vadd.f32 %v326_v49, %v325_v47  ;;  %v339_v54 = vadd.f32 %v338_v50, %v337_v48 }
 0x103   :  { %265 = vst [vmem:[%s506_s3 + $0x10] sm:$0xff] %v241_v51  ;;  %269 = vst [vmem:[%s506_s3 + $0x30] sm:$0xff] %v257_v52  ;;  %v244_v55 = vadd.f32 %v327_v53, %v275_v26  ;;  %v260_v56 = vadd.f32 %v339_v54, %v275_v26 }
 0x105   :  { %266 = vst [vmem:[%s506_s3 + $0x18] sm:$0xff] %v244_v55  ;;  %270 = vst [vmem:[%s506_s3 + $0x38] sm:$0xff] %v260_v56 }

// kernel: bilstm_crf_forward.3
= control target key start
LH: loop header
LB: loop body
LE: loop exit
PB: predicated region body
PF: predicated region fallthrough
CT: control target
= control target key end

     0   :  { %s2467_s15 = smov 0   ;;  %s2469_s16 = smov 0   ;;  %s3178_s0 = inlined_call_operand.vmem [shape: bf16[2,8,8,128], index: 0, kind: input, shape index: {}]   ;;  %s3179_s1 = inlined_call_operand.vmem [shape: bf16[2,128,512], index: 1, kind: input, shape index: {}]   ;;  %s3180_s2 = inlined_call_operand.vmem [shape: bf16[2,128,512], index: 2, kind: input, shape index: {}]   ;;  %s3181_s3 = inlined_call_operand.vmem [shape: f32[2,1,512], index: 3, kind: input, shape index: {}]   ;;  %s3182_s4 = inlined_call_operand.vmem [shape: bf16[2,8,8,128], index: 4, kind: output, shape index: {}]  }
   0x1   :  { %s2471_s17 = smov 0  }
   0x2 LB: > { %s26_s18 = sadd.s32 1, %s2434_s16  ;;  %p2015_p0 = scmp.ge.s32.totalorder %s2438_s17, 1  ;;  %s2438_s17 = sphi %s2471_s17, %s14_s17   ;;  %s2434_s16 = sphi %s2469_s16, %s3221_s16   ;;  %s2430_s15 = sphi %s2467_s15, %s3220_s15  }
   0x3   : > { %p28_p1 = scmp.ge.s32.totalorder %s26_s18, 2  ;;  %p212_p2 = scmp.lt.s32.totalorder %s2438_s17, 3 }
   0x5   : > { %s3223_s18 = smov (%p28_p1, %s26_s18), 0  ;;  %p213_p3 = pnand %p2015_p0, %p212_p2 }
   0x7   : > { %216 = sbr.rel (%p213_p3) target bundleno = 2165 (0x875), region = 36 }
   0xe   : > { %p261_p4 = scmp.lt.s32.totalorder %s2430_s15, 1  ;;  %v3183_v0 = vmov 0  }
   0xf   : > { %579 = vmatprep.mubr.bf16.mxu0 %v3183_v0  ;;  %652 = vmatprep.mubr.bf16.mxu1 %v3183_v0 }
  0x10   : > { %s3225_s15 = smov (!%p261_p4, %s2430_s15), 1 }
  0x11   : > { %s2127_s19 = sshll.u32 %s3225_s15, 8  ;;  %s2126_s23 = sshll.u32 %s3225_s15, 5 }
  0x12   : > { %s2495_s22 = scalar_lea.vmem %s3179_s1, %s2127_s19  ;;  %s2528_s26 = scalar_lea.vmem %s3178_s0, %s2126_s23 }
  0x13   : > { %v2156_v1 = vld [vmem:[%s2495_s22 + $0x4] ss:$16 sps:$4 sm:$0xff]   ;;  %v2158_v2 = vld [vmem:[%s2495_s22 + $0xc] ss:$16 sps:$4 sm:$0xff]   ;;  %v2160_v3 = vld [vmem:[%s2495_s22] ss:$16 sps:$4 sm:$0xff]   ;;  %s2535_s29 = scalar_lea.vmem %s3180_s2, %s2127_s19  ;;  %s2830_s10 = scalar_lea.vmem %s3182_s4, %s2126_s23 }
  0x14   : > { %547 = vmatprep.subr.bf16.mxu0 %v2156_v1  ;;  %v2161_v4 = vld [vmem:[%s2495_s22 + $0x8] ss:$16 sps:$4 sm:$0xff]   ;;  %620 = vmatprep.subr.bf16.mxu1 %v2158_v2  ;;  %v2162_v5 = vld [vmem:[%s2495_s22 + $0x24] ss:$16 sps:$4 sm:$0xff]   ;;  %v2164_v6 = vld [vmem:[%s2495_s22 + $0x2c] ss:$16 sps:$4 sm:$0xff]  }
  0x15   : > { %548 = vmatpush1.bf16.msra.mxu0 %v2160_v3  ;;  %621 = vmatpush1.bf16.msra.mxu1 %v2161_v4  ;;  %v2166_v7 = vld [vmem:[%s2495_s22 + $0x20] ss:$16 sps:$4 sm:$0xff]   ;;  %v2167_v8 = vld [vmem:[%s2495_s22 + $0x28] ss:$16 sps:$4 sm:$0xff]   ;;  %v2168_v9 = vld [vmem:[%s2495_s22 + $0x44] ss:$16 sps:$4 sm:$0xff]  }
  0x16   : > { %549 = vmatprep.subr.bf16.mxu0 %v2162_v5  ;;  %622 = vmatprep.subr.bf16.mxu1 %v2164_v6  ;;  %v2170_v10 = vld [vmem:[%s2495_s22 + $0x4c] ss:$16 sps:$4 sm:$0xff]   ;;  %v2172_v11 = vld [vmem:[%s2495_s22 + $0x40] ss:$16 sps:$4 sm:$0xff]   ;;  %v2173_v12 = vld [vmem:[%s2495_s22 + $0x48] ss:$16 sps:$4 sm:$0xff]  }
  0x17   : > { %v2174_v13 = vld [vmem:[%s2495_s22 + $0x64] ss:$16 sps:$4 sm:$0xff]   ;;  %v2176_v14 = vld [vmem:[%s2495_s22 + $0x6c] ss:$16 sps:$4 sm:$0xff]   ;;  %v2178_v15 = vld [vmem:[%s2495_s22 + $0x60] ss:$16 sps:$4 sm:$0xff]  }
  0x18   : > { %v2179_v16 = vld [vmem:[%s2495_s22 + $0x68] ss:$16 sps:$4 sm:$0xff]   ;;  %v2180_v17 = vld [vmem:[%s2495_s22 + $0x84] ss:$16 sps:$4 sm:$0xff]   ;;  %v2182_v18 = vld [vmem:[%s2495_s22 + $0x8c] ss:$16 sps:$4 sm:$0xff]  }
  0x19   : > { %550 = vmatpush1.bf16.msra.mxu0 %v2166_v7  ;;  %623 = vmatpush1.bf16.msra.mxu1 %v2167_v8  ;;  %v2184_v19 = vld [vmem:[%s2495_s22 + $0x80] ss:$16 sps:$4 sm:$0xff]   ;;  %v2185_v20 = vld [vmem:[%s2495_s22 + $0x88] ss:$16 sps:$4 sm:$0xff]   ;;  %v2186_v21 = vld [vmem:[%s2495_s22 + $0xa4] ss:$16 sps:$4 sm:$0xff]   ;;  %v343_v7 = vlaneseq }
  0x1a   : > { %551 = vmatprep.subr.bf16.mxu0 %v2168_v9  ;;  %624 = vmatprep.subr.bf16.mxu1 %v2170_v10  ;;  %v2188_v22 = vld [vmem:[%s2495_s22 + $0xac] ss:$16 sps:$4 sm:$0xff]   ;;  %v2190_v23 = vld [vmem:[%s2495_s22 + $0xa0] ss:$16 sps:$4 sm:$0xff]   ;;  %v2191_v24 = vld [vmem:[%s2495_s22 + $0xa8] ss:$16 sps:$4 sm:$0xff]  }
  0x1b   : > { %v2192_v25 = vld [vmem:[%s2495_s22 + $0xc4] ss:$16 sps:$4 sm:$0xff]   ;;  %v2194_v26 = vld [vmem:[%s2495_s22 + $0xcc] ss:$16 sps:$4 sm:$0xff]   ;;  %v2196_v27 = vld [vmem:[%s2495_s22 + $0xc0] ss:$16 sps:$4 sm:$0xff]  }
  0x1c   : > { %v2197_v28 = vld [vmem:[%s2495_s22 + $0xc8] ss:$16 sps:$4 sm:$0xff]   ;;  %v2198_v29 = vld [vmem:[%s2495_s22 + $0xe4] ss:$16 sps:$4 sm:$0xff]   ;;  %v2200_v30 = vld [vmem:[%s2495_s22 + $0xec] ss:$16 sps:$4 sm:$0xff]  }
  0x1d   : > { %552 = vmatpush1.bf16.msra.mxu0 %v2172_v11  ;;  %625 = vmatpush1.bf16.msra.mxu1 %v2173_v12  ;;  %v2202_v31 = vld [vmem:[%s2495_s22 + $0xe0] ss:$16 sps:$4 sm:$0xff]   ;;  %v2203_v32 = vld [vmem:[%s2495_s22 + $0xe8] ss:$16 sps:$4 sm:$0xff]   ;;  %v2545_v33 = vld [vmem:[%s2535_s29 + $0x4] ss:$16 sps:$4 sm:$0xff]  }
  0x1e   : > { %553 = vmatprep.subr.bf16.mxu0 %v2174_v13  ;;  %626 = vmatprep.subr.bf16.mxu1 %v2176_v14  ;;  %v2548_v34 = vld [vmem:[%s2535_s29 + $0xc] ss:$16 sps:$4 sm:$0xff]   ;;  %v2204_v35 = vld [vmem:[%s2528_s26] sm:$0xff]   ;;  %v2555_v37 = vld [vmem:[%s2535_s29 + $0x8] ss:$16 sps:$4 sm:$0xff]   ;;  %v2441_v6 = vmov 0.0|0.0  }
  0x1f   : > { %v2552_v36 = vld [vmem:[%s2535_s29] ss:$16 sps:$4 sm:$0xff]   ;;  %v2560_v38 = vld [vmem:[%s2535_s29 + $0x24] ss:$16 sps:$4 sm:$0xff]   ;;  %v2563_v39 = vld [vmem:[%s2535_s29 + $0x2c] ss:$16 sps:$4 sm:$0xff]  }
  0x20   : > { %v2566_v40 = vld [vmem:[%s2535_s29 + $0x20] ss:$16 sps:$4 sm:$0xff]   ;;  %v2571_v41 = vld [vmem:[%s2535_s29 + $0x28] ss:$16 sps:$4 sm:$0xff]   ;;  %v2576_v42 = vld [vmem:[%s2535_s29 + $0x44] ss:$16 sps:$4 sm:$0xff]  }
  0x21   : > { %554 = vmatpush1.bf16.msra.mxu0 %v2178_v15  ;;  %627 = vmatpush1.bf16.msra.mxu1 %v2179_v16  ;;  %v2579_v43 = vld [vmem:[%s2535_s29 + $0x4c] ss:$16 sps:$4 sm:$0xff]   ;;  %v2585_v45 = vld [vmem:[%s2535_s29 + $0x40] ss:$16 sps:$4 sm:$0xff]   ;;  %v2588_v46 = vld [vmem:[%s2535_s29 + $0x48] ss:$16 sps:$4 sm:$0xff]  }
  0x22   : > { %555 = vmatprep.subr.bf16.mxu0 %v2180_v17  ;;  %628 = vmatprep.subr.bf16.mxu1 %v2182_v18  ;;  %v2217_v44 = vld [vmem:[%s2528_s26 + $0x8] sm:$0xff]   ;;  %v2593_v47 = vld [vmem:[%s2535_s29 + $0x64] ss:$16 sps:$4 sm:$0xff]   ;;  %v2601_v49 = vld [vmem:[%s2535_s29 + $0x60] ss:$16 sps:$4 sm:$0xff]   ;;  %s2022_s30 = sshll.u32 %s3225_s15, 2 }
  0x23   : > { %v2598_v48 = vld [vmem:[%s2535_s29 + $0x6c] ss:$16 sps:$4 sm:$0xff]   ;;  %v2604_v50 = vld [vmem:[%s2535_s29 + $0x68] ss:$16 sps:$4 sm:$0xff]   ;;  %v2609_v51 = vld [vmem:[%s2535_s29 + $0x84] ss:$16 sps:$4 sm:$0xff]   ;;  %s283_s7 = scalar_lea.vmem %s3181_s3, %s2022_s30 }
  0x24   : > { %v2614_v52 = vld [vmem:[%s2535_s29 + $0x8c] ss:$16 sps:$4 sm:$0xff]   ;;  %v2230_v53 = vld [vmem:[%s2528_s26 + $0x10] sm:$0xff]   ;;  %v2625_v55 = vld [vmem:[%s2535_s29 + $0x88] ss:$16 sps:$4 sm:$0xff]   ;;  %v344_v8 = vshrl.u32 %v343_v7, 7 }
  0x25   : > { %556 = vmatpush1.bf16.msra.mxu0 %v2184_v19  ;;  %629 = vmatpush1.bf16.msra.mxu1 %v2185_v20  ;;  %v2622_v54 = vld [vmem:[%s2535_s29 + $0x80] ss:$16 sps:$4 sm:$0xff]   ;;  %v2630_v56 = vld [vmem:[%s2535_s29 + $0xa4] ss:$16 sps:$4 sm:$0xff]   ;;  %v2633_v57 = vld [vmem:[%s2535_s29 + $0xac] ss:$16 sps:$4 sm:$0xff]  }
  0x26   : > { %557 = vmatprep.subr.bf16.mxu0 %v2186_v21  ;;  %630 = vmatprep.subr.bf16.mxu1 %v2188_v22  ;;  %v2638_v58 = vld [vmem:[%s2535_s29 + $0xa0] ss:$16 sps:$4 sm:$0xff]   ;;  %v2641_v59 = vld [vmem:[%s2535_s29 + $0xa8] ss:$16 sps:$4 sm:$0xff]   ;;  %v2646_v60 = vld [vmem:[%s2535_s29 + $0xc4] ss:$16 sps:$4 sm:$0xff]  }
  0x27   : > { %v2649_v61 = vld [vmem:[%s2535_s29 + $0xcc] ss:$16 sps:$4 sm:$0xff]   ;;  %v2657_v63 = vld [vmem:[%s2535_s29 + $0xc0] ss:$16 sps:$4 sm:$0xff]   ;;  %v2660_v1 = vld [vmem:[%s2535_s29 + $0xc8] ss:$16 sps:$4 sm:$0xff]  }
  0x28   : > { %v2243_v62 = vld [vmem:[%s2528_s26 + $0x18] sm:$0xff]   ;;  %v2665_v2 = vld [vmem:[%s2535_s29 + $0xe4] ss:$16 sps:$4 sm:$0xff]   ;;  %v2673_v4 = vld [vmem:[%s2535_s29 + $0xe0] ss:$16 sps:$4 sm:$0xff]   ;;  %v345_v9 = vsub.s32 0, %v344_v8 }
  0x29   : > { %558 = vmatpush1.bf16.msra.mxu0 %v2190_v23  ;;  %631 = vmatpush1.bf16.msra.mxu1 %v2191_v24  ;;  %v2668_v3 = vld [vmem:[%s2535_s29 + $0xec] ss:$16 sps:$4 sm:$0xff]   ;;  %v2676_v5 = vld [vmem:[%s2535_s29 + $0xe8] ss:$16 sps:$4 sm:$0xff]   ;;  %v353_v10 = vsub.s32 2, %v344_v8  ;;  %v349_v12 = vsub.s32 1, %v344_v8 }
  0x2a   : > { %559 = vmatprep.subr.bf16.mxu0 %v2192_v25  ;;  %632 = vmatprep.subr.bf16.mxu1 %v2194_v26  ;;  %v341_v11 = vld [vmem:[%s283_s7] sm:$0xf]  ;;  %v357_v13 = vsub.s32 3, %v344_v8 }
  0x2b   : > { %v346_v14 = vrot.slane %v341_v11, %v345_v9  ;;  %v2724_v15 = vrot.slane %v341_v11, %v353_v10  ;;  %v2726_v16 = vrot.slane %v341_v11, %v349_v12 }
  0x2c   : > { %v2728_v17 = vrot.slane %v341_v11, %v357_v13 }
  0x2d   : > { %560 = vmatpush1.bf16.msra.mxu0 %v2196_v27  ;;  %633 = vmatpush1.bf16.msra.mxu1 %v2197_v28 }
  0x2e   : > { %561 = vmatprep.subr.bf16.mxu0 %v2198_v29  ;;  %634 = vmatprep.subr.bf16.mxu1 %v2200_v30 }
  0x31   : > { %562 = vmatpush1.bf16.msra.mxu0 %v2202_v31  ;;  %635 = vmatpush1.bf16.msra.mxu1 %v2203_v32 }
  0x32   : > { %927 = vmatprep.subr.bf16.mxu0 %v2545_v33  ;;  %968 = vmatprep.subr.bf16.mxu1 %v2548_v34 }
  0x34   : > { %580 = vmatmul.mubr.bf16.vlgmr.msra.gmra.mrb[0].mxu0 %v2204_v35  ;;  %653 = vmatmul.mubr.bf16.vlgmr.msra.gmra.mrb[0].mxu1 %v2204_v35 }
  0x35   : > { %928 = vmatpush1.bf16.msra.mxu0 %v2552_v36  ;;  %969 = vmatpush1.bf16.msra.mxu1 %v2555_v37 }
  0x36   : > { %929 = vmatprep.subr.bf16.mxu0 %v2560_v38  ;;  %970 = vmatprep.subr.bf16.mxu1 %v2563_v39 }
  0x37   : > { %589 = vmatprep.mubr.bf16.mxu0 %v3183_v0  ;;  %662 = vmatprep.mubr.bf16.mxu1 %v3183_v0 }
  0x39   : > { %930 = vmatpush1.bf16.msra.mxu0 %v2566_v40  ;;  %971 = vmatpush1.bf16.msra.mxu1 %v2571_v41 }
  0x3a   : > { %931 = vmatprep.subr.bf16.mxu0 %v2576_v42  ;;  %972 = vmatprep.subr.bf16.mxu1 %v2579_v43 }
  0x3c   : > { %590 = vmatmul.mubr.bf16.gmra.mrb[4].mxu0 %v2217_v44  ;;  %663 = vmatmul.mubr.bf16.gmra.mrb[4].mxu1 %v2217_v44 }
  0x3d   : > { %932 = vmatpush1.bf16.msra.mxu0 %v2585_v45  ;;  %973 = vmatpush1.bf16.msra.mxu1 %v2588_v46 }
  0x3e   : > { %933 = vmatprep.subr.bf16.mxu0 %v2593_v47  ;;  %974 = vmatprep.subr.bf16.mxu1 %v2598_v48 }
  0x3f   : > { %599 = vmatprep.mubr.bf16.mxu0 %v3183_v0  ;;  %672 = vmatprep.mubr.bf16.mxu1 %v3183_v0 }
  0x41   : > { %934 = vmatpush1.bf16.msra.mxu0 %v2601_v49  ;;  %975 = vmatpush1.bf16.msra.mxu1 %v2604_v50 }
  0x42   : > { %935 = vmatprep.subr.bf16.mxu0 %v2609_v51  ;;  %976 = vmatprep.subr.bf16.mxu1 %v2614_v52 }
  0x44   : > { %600 = vmatmul.mubr.bf16.gmra.mrb[8].mxu0 %v2230_v53  ;;  %673 = vmatmul.mubr.bf16.gmra.mrb[8].mxu1 %v2230_v53 }
  0x45   : > { %936 = vmatpush1.bf16.msra.mxu0 %v2622_v54  ;;  %977 = vmatpush1.bf16.msra.mxu1 %v2625_v55 }
  0x46   : > { %937 = vmatprep.subr.bf16.mxu0 %v2630_v56  ;;  %978 = vmatprep.subr.bf16.mxu1 %v2633_v57 }
  0x47   : > { %609 = vmatprep.mubr.bf16.mxu0 %v3183_v0  ;;  %682 = vmatprep.mubr.bf16.mxu1 %v3183_v0 }
  0x49   : > { %938 = vmatpush1.bf16.msra.mxu0 %v2638_v58  ;;  %979 = vmatpush1.bf16.msra.mxu1 %v2641_v59 }
  0x4a   : > { %939 = vmatprep.subr.bf16.mxu0 %v2646_v60  ;;  %980 = vmatprep.subr.bf16.mxu1 %v2649_v61 }
  0x4c   : > { %610 = vmatmul.mubr.bf16.gmra.mrb[12].mxu0 %v2243_v62  ;;  %683 = vmatmul.mubr.bf16.gmra.mrb[12].mxu1 %v2243_v62 }
  0x4d   : > { %940 = vmatpush1.bf16.msra.mxu0 %v2657_v63  ;;  %981 = vmatpush1.bf16.msra.mxu1 %v2660_v1 }
  0x4e   : > { %941 = vmatprep.subr.bf16.mxu0 %v2665_v2  ;;  %982 = vmatprep.subr.bf16.mxu1 %v2668_v3 }
  0x4f   : > { %959 = vmatprep.mubr.bf16.mxu0 %v3183_v0  ;;  %1000 = vmatprep.mubr.bf16.mxu1 %v3183_v0 }
  0x51   : > { %942 = vmatpush1.bf16.msra.mxu0 %v2673_v4  ;;  %983 = vmatpush1.bf16.msra.mxu1 %v2676_v5 }
  0x52   : > { %1046 = vmatprep.subr.bf16.mxu0 %v2545_v33  ;;  %1087 = vmatprep.subr.bf16.mxu1 %v2548_v34 }
  0x54   : > { %960 = vmatmul.mubr.bf16.vlgmr.msra.gmra.mrb[16].mxu0 %v2441_v6  ;;  %1001 = vmatmul.mubr.bf16.vlgmr.msra.gmra.mrb[16].mxu1 %v2441_v6 }
  0x55   : > { %1047 = vmatpush1.bf16.msra.mxu0 %v2552_v36  ;;  %1088 = vmatpush1.bf16.msra.mxu1 %v2555_v37 }
  0x56   : > { %1048 = vmatprep.subr.bf16.mxu0 %v2560_v38  ;;  %1089 = vmatprep.subr.bf16.mxu1 %v2563_v39 }
  0x57   : > { %1078 = vmatprep.mubr.bf16.mxu0 %v3183_v0  ;;  %1119 = vmatprep.mubr.bf16.mxu1 %v3183_v0 }
  0x59   : > { %1049 = vmatpush1.bf16.msra.mxu0 %v2566_v40  ;;  %1090 = vmatpush1.bf16.msra.mxu1 %v2571_v41 }
  0x5a   : > { %1050 = vmatprep.subr.bf16.mxu0 %v2576_v42  ;;  %1091 = vmatprep.subr.bf16.mxu1 %v2579_v43 }
  0x5d   : > { %1051 = vmatpush1.bf16.msra.mxu0 %v2585_v45  ;;  %1092 = vmatpush1.bf16.msra.mxu1 %v2588_v46 }
  0x5e   : > { %1052 = vmatprep.subr.bf16.mxu0 %v2593_v47  ;;  %1093 = vmatprep.subr.bf16.mxu1 %v2598_v48 }
  0x61   : > { %1053 = vmatpush1.bf16.msra.mxu0 %v2601_v49  ;;  %1094 = vmatpush1.bf16.msra.mxu1 %v2604_v50 }
  0x62   : > { %1054 = vmatprep.subr.bf16.mxu0 %v2609_v51  ;;  %1095 = vmatprep.subr.bf16.mxu1 %v2614_v52 }
  0x65   : > { %1055 = vmatpush1.bf16.msra.mxu0 %v2622_v54  ;;  %1096 = vmatpush1.bf16.msra.mxu1 %v2625_v55 }
  0x66   : > { %1056 = vmatprep.subr.bf16.mxu0 %v2630_v56  ;;  %1097 = vmatprep.subr.bf16.mxu1 %v2633_v57 }
  0x69   : > { %1057 = vmatpush1.bf16.msra.mxu0 %v2638_v58  ;;  %1098 = vmatpush1.bf16.msra.mxu1 %v2641_v59 }
  0x6a   : > { %1058 = vmatprep.subr.bf16.mxu0 %v2646_v60  ;;  %1099 = vmatprep.subr.bf16.mxu1 %v2649_v61 }
  0x6d   : > { %1059 = vmatpush1.bf16.msra.mxu0 %v2657_v63  ;;  %1100 = vmatpush1.bf16.msra.mxu1 %v2660_v1 }
  0x6e   : > { %1060 = vmatprep.subr.bf16.mxu0 %v2665_v2  ;;  %1101 = vmatprep.subr.bf16.mxu1 %v2668_v3 }
  0x71   : > { %1061 = vmatpush1.bf16.msra.mxu0 %v2673_v4  ;;  %1102 = vmatpush1.bf16.msra.mxu1 %v2676_v5 }
  0x72   : > { %1166 = vmatprep.subr.bf16.mxu0 %v2545_v33  ;;  %1207 = vmatprep.subr.bf16.mxu1 %v2548_v34 }
 0x107   : > { %v581_v18 = vpop.f32.mrb[0].mxu0  ;;  %v654_v19 = vpop.f32.mrb[0].mxu1 }
 0x108   : > { %v2730_v20 = vadd.f32 %v581_v18, %v346_v14  ;;  %v583_v21 = vpop.f32.mrb[1].mxu0  ;;  %v2733_v22 = vadd.f32 %v654_v19, %v2724_v15  ;;  %v656_v23 = vpop.f32.mrb[1].mxu1 }
 0x109   : > { %v2736_v24 = vadd.f32 %v583_v21, %v2726_v16  ;;  %v585_v25 = vpop.f32.mrb[2].mxu0  ;;  %v2739_v26 = vadd.f32 %v656_v23, %v2728_v17  ;;  %v658_v27 = vpop.f32.mrb[2].mxu1 }
 0x10a   : > { %v2741_v28 = vadd.f32 %v585_v25, %v346_v14  ;;  %v587_v29 = vpop.f32.mrb[3].mxu0  ;;  %v2744_v30 = vadd.f32 %v658_v27, %v2724_v15  ;;  %v660_v31 = vpop.f32.mrb[3].mxu1 }
 0x10b   : > { %v2747_v32 = vadd.f32 %v587_v29, %v2726_v16  ;;  %v2750_v35 = vadd.f32 %v660_v31, %v2728_v17 }
 0x10f   : > { %v591_v44 = vpop.f32.mrb[4].mxu0  ;;  %v664_v53 = vpop.f32.mrb[4].mxu1 }
 0x110   : > { %v2752_v62 = vadd.f32 %v591_v44, %v346_v14  ;;  %v593_v6 = vpop.f32.mrb[5].mxu0  ;;  %v2755_v7 = vadd.f32 %v664_v53, %v2724_v15  ;;  %v666_v8 = vpop.f32.mrb[5].mxu1 }
 0x111   : > { %v2758_v9 = vadd.f32 %v593_v6, %v2726_v16  ;;  %v595_v10 = vpop.f32.mrb[6].mxu0  ;;  %v2761_v11 = vadd.f32 %v666_v8, %v2728_v17  ;;  %v668_v12 = vpop.f32.mrb[6].mxu1 }
 0x112   : > { %v2763_v13 = vadd.f32 %v595_v10, %v346_v14  ;;  %v597_v18 = vpop.f32.mrb[7].mxu0  ;;  %v2766_v19 = vadd.f32 %v668_v12, %v2724_v15  ;;  %v670_v21 = vpop.f32.mrb[7].mxu1 }
 0x113   : > { %v2769_v23 = vadd.f32 %v597_v18, %v2726_v16  ;;  %v2772_v25 = vadd.f32 %v670_v21, %v2728_v17 }
 0x115   : > { %3185 = vst [vmem:[#allocation5_spill] sm:$0xff] %v2772_v25 }
 0x117   : > { %v601_v27 = vpop.f32.mrb[8].mxu0  ;;  %v674_v29 = vpop.f32.mrb[8].mxu1 }
 0x118   : > { %v2774_v31 = vadd.f32 %v601_v27, %v346_v14  ;;  %v603_v44 = vpop.f32.mrb[9].mxu0  ;;  %v2777_v53 = vadd.f32 %v674_v29, %v2724_v15  ;;  %v676_v6 = vpop.f32.mrb[9].mxu1 }
 0x119   : > { %v2780_v8 = vadd.f32 %v603_v44, %v2726_v16  ;;  %v605_v10 = vpop.f32.mrb[10].mxu0  ;;  %v2783_v12 = vadd.f32 %v676_v6, %v2728_v17  ;;  %v678_v18 = vpop.f32.mrb[10].mxu1 }
 0x11a   : > { %3186 = vst [vmem:[#allocation6_spill] sm:$0xff] %v2774_v31  ;;  %3187 = vst [vmem:[#allocation7_spill] sm:$0xff] %v2777_v53  ;;  %v2785_v0 = vadd.f32 %v605_v10, %v346_v14  ;;  %v607_v21 = vpop.f32.mrb[11].mxu0  ;;  %v2788_v25 = vadd.f32 %v678_v18, %v2724_v15  ;;  %v680_v27 = vpop.f32.mrb[11].mxu1 }
 0x11b   : > { %3188 = vst [vmem:[#allocation8_spill] sm:$0xff] %v2780_v8  ;;  %3189 = vst [vmem:[#allocation9_spill] sm:$0xff] %v2783_v12  ;;  %v2791_v31 = vadd.f32 %v607_v21, %v2726_v16  ;;  %v2794_v29 = vadd.f32 %v680_v27, %v2728_v17 }
 0x11c   : > { %3190 = vst [vmem:[#allocation10_spill] sm:$0xff] %v2785_v0  ;;  %3191 = vst [vmem:[#allocation11_spill] sm:$0xff] %v2788_v25 }
 0x11d   : > { %3192 = vst [vmem:[#allocation12_spill] sm:$0xff] %v2791_v31  ;;  %3193 = vst [vmem:[#allocation13_spill] sm:$0xff] %v2794_v29 }
 0x11f   : > { %v611_v44 = vpop.f32.mrb[12].mxu0  ;;  %v684_v8 = vpop.f32.mrb[12].mxu1 }
 0x120   : > { %v2796_v53 = vadd.f32 %v611_v44, %v346_v14  ;;  %v613_v6 = vpop.f32.mrb[13].mxu0  ;;  %v2799_v12 = vadd.f32 %v684_v8, %v2724_v15  ;;  %v686_v10 = vpop.f32.mrb[13].mxu1 }
 0x121   : > { %v2802_v0 = vadd.f32 %v613_v6, %v2726_v16  ;;  %v615_v18 = vpop.f32.mrb[14].mxu0  ;;  %v2805_v25 = vadd.f32 %v686_v10, %v2728_v17  ;;  %v688_v21 = vpop.f32.mrb[14].mxu1 }
 0x122   : > { %3194 = vst [vmem:[#allocation14_spill] sm:$0xff] %v2796_v53  ;;  %3195 = vst [vmem:[#allocation15_spill] sm:$0xff] %v2799_v12  ;;  %v2807_v31 = vadd.f32 %v615_v18, %v346_v14  ;;  %v617_v27 = vpop.f32.mrb[15].mxu0  ;;  %v2810_v29 = vadd.f32 %v688_v21, %v2724_v15  ;;  %v690_v44 = vpop.f32.mrb[15].mxu1 }
 0x123   : > { %3196 = vst [vmem:[#allocation16_spill] sm:$0xff] %v2802_v0  ;;  %3197 = vst [vmem:[#allocation17_spill] sm:$0xff] %v2805_v25  ;;  %v2813_v53 = vadd.f32 %v617_v27, %v2726_v16  ;;  %v2816_v8 = vadd.f32 %v690_v44, %v2728_v17 }
 0x124   : > { %3198 = vst [vmem:[#allocation18_spill] sm:$0xff] %v2807_v31  ;;  %3199 = vst [vmem:[#allocation19_spill] sm:$0xff] %v2810_v29 }
 0x125   : > { %3200 = vst [vmem:[#allocation20_spill] sm:$0xff] %v2813_v53  ;;  %3201 = vst [vmem:[#allocation21_spill] sm:$0xff] %v2816_v8 }
 0x127   : > { %v961_v6 = vpop.f32.mrb[16].mxu0  ;;  %v1002_v0 = vpop.f32.mrb[16].mxu1 }
 0x128   : > { %v1009_v12 = vadd.f32 %v961_v6, %v2730_v20  ;;  %v1011_v10 = vadd.f32 %v1002_v0, %v2733_v22  ;;  %v963_v25 = vpop.f32.mrb[17].mxu0  ;;  %v1004_v14 = vpop.f32.mrb[17].mxu1 }
 0x129   : > { %v1010_v18 = vadd.f32 %v963_v25, %v2736_v24  ;;  %v1012_v15 = vadd.f32 %v1004_v14, %v2739_v26  ;;  %v965_v21 = vpop.f32.mrb[18].mxu0  ;;  %v1006_v29 = vpop.f32.mrb[18].mxu1 }
 0x12a   : > { %v2093_v31 = vmul.f32 -1.442695, %v1009_v12  ;;  %v966_v16 = vpop.f32.mrb[19].mxu0  ;;  %v1007_v27 = vpop.f32.mrb[19].mxu1 }
 0x12b   : > { %v2094_v53 = vmul.f32 -1.442695, %v1010_v18  ;;  %v2095_v17 = vmul.f32 -1.442695, %v1012_v15 }
 0x12c   : > { %2256 = vpow2.f32 %v2093_v31 }
 0x12d   : > { %2258 = vpow2.f32 %v2094_v53 }
 0x12e   : > { %2260 = vpow2.f32 %v2095_v17 }
 0x12f   : > { %2262 = vtanh.f32 %v1011_v10  ;;  %v3202_v10 = vmov 0  }
 0x136   : > { %v2257_v44 = vpop.eup %2256 }
 0x137   : > { %v2259_v8 = vpop.eup %2258  ;;  %v1016_v20 = vadd.f32 1.0, %v2257_v44 }
 0x138   : > { %v1022_v0 = vadd.f32 1.0, %v2259_v8  ;;  %v2261_v22 = vpop.eup %2260 }
 0x139   : > { %2264 = vrcp.f32 %v1016_v20  ;;  %v2263_v24 = vpop.eup %2262  ;;  %v1029_v29 = vadd.f32 1.0, %v2261_v22 }
 0x13a   : > { %2266 = vrcp.f32 %v1022_v0 }
 0x13b   : > { %2268 = vrcp.f32 %v1029_v29 }
 0x143   : > { %v2265_v26 = vpop.eup %2264 }
 0x144   : > { %v2267_v25 = vpop.eup %2266  ;;  %v1033_v12 = vmul.f32 %v2265_v26, %v2263_v24 }
 0x145   : > { %v1032_v6 = vmul.f32 0.0, %v2267_v25  ;;  %v2269_v31 = vpop.eup %2268 }
 0x147   : > { %v2822_v14 = vadd.f32 %v1033_v12, %v1032_v6 }
 0x149   : > { %2270 = vtanh.f32 %v2822_v14 }
 0x153   : > { %v2271_v53 = vpop.eup %2270 }
 0x154   : > { %v1036_v18 = vmul.f32 %v2271_v53, %v2269_v31 }
 0x156   : > { %v1037_v8 = vpack.c.bf16 %v1036_v18, %v1036_v18 }
 0x158   : > { %1038 = vst [vmem:[%s2830_s10] sm:$0xf] %v1037_v8  ;;  %1079 = vmatmul.mubr.bf16.vlgmr.msra.gmra.mrb[20].mxu0 %v1037_v8  ;;  %1120 = vmatmul.mubr.bf16.vlgmr.msra.gmra.mrb[20].mxu1 %v1037_v8 }
 0x159   : > { %1167 = vmatpush1.bf16.msra.mxu0 %v2552_v36  ;;  %1208 = vmatpush1.bf16.msra.mxu1 %v2555_v37 }
 0x15a   : > { %1168 = vmatprep.subr.bf16.mxu0 %v2560_v38  ;;  %1209 = vmatprep.subr.bf16.mxu1 %v2563_v39 }
 0x15b   : > { %1198 = vmatprep.mubr.bf16.mxu0 %v3202_v10  ;;  %1239 = vmatprep.mubr.bf16.mxu1 %v3202_v10 }
 0x15d   : > { %1169 = vmatpush1.bf16.msra.mxu0 %v2566_v40  ;;  %1210 = vmatpush1.bf16.msra.mxu1 %v2571_v41 }
 0x15e   : > { %1170 = vmatprep.subr.bf16.mxu0 %v2576_v42  ;;  %1211 = vmatprep.subr.bf16.mxu1 %v2579_v43 }
 0x161   : > { %1171 = vmatpush1.bf16.msra.mxu0 %v2585_v45  ;;  %1212 = vmatpush1.bf16.msra.mxu1 %v2588_v46 }
 0x162   : > { %1172 = vmatprep.subr.bf16.mxu0 %v2593_v47  ;;  %1213 = vmatprep.subr.bf16.mxu1 %v2598_v48 }
 0x165   : > { %1173 = vmatpush1.bf16.msra.mxu0 %v2601_v49  ;;  %1214 = vmatpush1.bf16.msra.mxu1 %v2604_v50 }
 0x166   : > { %1174 = vmatprep.subr.bf16.mxu0 %v2609_v51  ;;  %1215 = vmatprep.subr.bf16.mxu1 %v2614_v52 }
 0x169   : > { %1175 = vmatpush1.bf16.msra.mxu0 %v2622_v54  ;;  %1216 = vmatpush1.bf16.msra.mxu1 %v2625_v55 }
 0x16a   : > { %1176 = vmatprep.subr.bf16.mxu0 %v2630_v56  ;;  %1217 = vmatprep.subr.bf16.mxu1 %v2633_v57 }
 0x16d   : > { %1177 = vmatpush1.bf16.msra.mxu0 %v2638_v58  ;;  %1218 = vmatpush1.bf16.msra.mxu1 %v2641_v59 }
 0x16e   : > { %1178 = vmatprep.subr.bf16.mxu0 %v2646_v60  ;;  %1219 = vmatprep.subr.bf16.mxu1 %v2649_v61 }
 0x171   : > { %1179 = vmatpush1.bf16.msra.mxu0 %v2657_v63  ;;  %1220 = vmatpush1.bf16.msra.mxu1 %v2660_v1 }
 0x172   : > { %1180 = vmatprep.subr.bf16.mxu0 %v2665_v2  ;;  %1221 = vmatprep.subr.bf16.mxu1 %v2668_v3 }
 0x175   : > { %1181 = vmatpush1.bf16.msra.mxu0 %v2673_v4  ;;  %1222 = vmatpush1.bf16.msra.mxu1 %v2676_v5 }
 0x176   : > { %1286 = vmatprep.subr.bf16.mxu0 %v2545_v33  ;;  %1327 = vmatprep.subr.bf16.mxu1 %v2548_v34 }
 0x22b   : > { %v1080_v15 = vpop.f32.mrb[20].mxu0  ;;  %v1121_v21 = vpop.f32.mrb[20].mxu1 }
 0x22c   : > { %v1128_v16 = vadd.f32 %v1080_v15, %v2741_v28  ;;  %v1130_v27 = vadd.f32 %v1121_v21, %v2744_v30  ;;  %v1082_v17 = vpop.f32.mrb[21].mxu0  ;;  %v1123_v44 = vpop.f32.mrb[21].mxu1 }
 0x22d   : > { %v1129_v20 = vadd.f32 %v1082_v17, %v2747_v32  ;;  %v1131_v0 = vadd.f32 %v1123_v44, %v2750_v35  ;;  %v1084_v22 = vpop.f32.mrb[22].mxu0  ;;  %v1125_v24 = vpop.f32.mrb[22].mxu1 }
 0x22e   : > { %v2096_v26 = vmul.f32 -1.442695, %v1128_v16  ;;  %v1085_v25 = vpop.f32.mrb[23].mxu0  ;;  %v1126_v12 = vpop.f32.mrb[23].mxu1 }
 0x22f   : > { %v2097_v29 = vmul.f32 -1.442695, %v1129_v20  ;;  %v2098_v6 = vmul.f32 -1.442695, %v1131_v0 }
 0x230   : > { %2272 = vpow2.f32 %v2096_v26 }
 0x231   : > { %2274 = vpow2.f32 %v2097_v29 }
 0x232   : > { %2276 = vpow2.f32 %v2098_v6 }
 0x233   : > { %2278 = vtanh.f32 %v1130_v27 }
 0x23a   : > { %v2273_v31 = vpop.eup %2272 }
 0x23b   : > { %v2275_v53 = vpop.eup %2274  ;;  %v1135_v28 = vadd.f32 1.0, %v2273_v31 }
 0x23c   : > { %v1141_v30 = vadd.f32 1.0, %v2275_v53  ;;  %v2277_v32 = vpop.eup %2276 }
 0x23d   : > { %2280 = vrcp.f32 %v1135_v28  ;;  %v2279_v35 = vpop.eup %2278  ;;  %v1148_v21 = vadd.f32 1.0, %v2277_v32 }
 0x23e   : > { %2282 = vrcp.f32 %v1141_v30 }
 0x23f   : > { %2284 = vrcp.f32 %v1148_v21 }
 0x247   : > { %v2281_v18 = vpop.eup %2280 }
 0x248   : > { %v2283_v8 = vpop.eup %2282  ;;  %v1152_v15 = vmul.f32 %v2281_v18, %v2279_v35 }
 0x249   : > { %v1151_v16 = vmul.f32 %v2283_v8, %v2822_v14  ;;  %v2285_v44 = vpop.eup %2284 }
 0x24b   : > { %v2872_v17 = vadd.f32 %v1152_v15, %v1151_v16 }
 0x24d   : > { %2286 = vtanh.f32 %v2872_v17 }
 0x257   : > { %v2287_v20 = vpop.eup %2286 }
 0x258   : > { %v1155_v27 = vmul.f32 %v2287_v20, %v2285_v44 }
 0x25a   : > { %v1156_v0 = vpack.c.bf16 %v1155_v27, %v1155_v27 }
 0x25c   : > { %2099 = vst [vmem:[%s2830_s10 + $0x4] sm:$0xf] %v1156_v0  ;;  %1199 = vmatmul.mubr.bf16.vlgmr.msra.gmra.mrb[24].mxu0 %v1156_v0  ;;  %1240 = vmatmul.mubr.bf16.vlgmr.msra.gmra.mrb[24].mxu1 %v1156_v0 }
 0x25d   : > { %1287 = vmatpush1.bf16.msra.mxu0 %v2552_v36  ;;  %1328 = vmatpush1.bf16.msra.mxu1 %v2555_v37 }
 0x25e   : > { %1288 = vmatprep.subr.bf16.mxu0 %v2560_v38  ;;  %1329 = vmatprep.subr.bf16.mxu1 %v2563_v39 }
 0x25f   : > { %1318 = vmatprep.mubr.bf16.mxu0 %v3202_v10  ;;  %1359 = vmatprep.mubr.bf16.mxu1 %v3202_v10 }
 0x261   : > { %1289 = vmatpush1.bf16.msra.mxu0 %v2566_v40  ;;  %1330 = vmatpush1.bf16.msra.mxu1 %v2571_v41 }
 0x262   : > { %1290 = vmatprep.subr.bf16.mxu0 %v2576_v42  ;;  %1331 = vmatprep.subr.bf16.mxu1 %v2579_v43 }
 0x265   : > { %1291 = vmatpush1.bf16.msra.mxu0 %v2585_v45  ;;  %1332 = vmatpush1.bf16.msra.mxu1 %v2588_v46 }
 0x266   : > { %1292 = vmatprep.subr.bf16.mxu0 %v2593_v47  ;;  %1333 = vmatprep.subr.bf16.mxu1 %v2598_v48 }
 0x269   : > { %1293 = vmatpush1.bf16.msra.mxu0 %v2601_v49  ;;  %1334 = vmatpush1.bf16.msra.mxu1 %v2604_v50 }
 0x26a   : > { %1294 = vmatprep.subr.bf16.mxu0 %v2609_v51  ;;  %1335 = vmatprep.subr.bf16.mxu1 %v2614_v52 }
 0x26d   : > { %1295 = vmatpush1.bf16.msra.mxu0 %v2622_v54  ;;  %1336 = vmatpush1.bf16.msra.mxu1 %v2625_v55 }
 0x26e   : > { %1296 = vmatprep.subr.bf16.mxu0 %v2630_v56  ;;  %1337 = vmatprep.subr.bf16.mxu1 %v2633_v57 }
 0x271   : > { %1297 = vmatpush1.bf16.msra.mxu0 %v2638_v58  ;;  %1338 = vmatpush1.bf16.msra.mxu1 %v2641_v59 }
 0x272   : > { %1298 = vmatprep.subr.bf16.mxu0 %v2646_v60  ;;  %1339 = vmatprep.subr.bf16.mxu1 %v2649_v61 }
 0x275   : > { %1299 = vmatpush1.bf16.msra.mxu0 %v2657_v63  ;;  %1340 = vmatpush1.bf16.msra.mxu1 %v2660_v1 }
 0x276   : > { %1300 = vmatprep.subr.bf16.mxu0 %v2665_v2  ;;  %1341 = vmatprep.subr.bf16.mxu1 %v2668_v3 }
 0x279   : > { %1301 = vmatpush1.bf16.msra.mxu0 %v2673_v4  ;;  %1342 = vmatpush1.bf16.msra.mxu1 %v2676_v5 }
 0x27a   : > { %1406 = vmatprep.subr.bf16.mxu0 %v2545_v33  ;;  %1447 = vmatprep.subr.bf16.mxu1 %v2548_v34 }
 0x32f   : > { %v1200_v14 = vpop.f32.mrb[24].mxu0  ;;  %v1241_v22 = vpop.f32.mrb[24].mxu1 }
 0x330   : > { %v1248_v24 = vadd.f32 %v1200_v14, %v2752_v62  ;;  %v1250_v26 = vadd.f32 %v1241_v22, %v2755_v7  ;;  %v1202_v25 = vpop.f32.mrb[25].mxu0  ;;  %v1243_v12 = vpop.f32.mrb[25].mxu1 }
 0x331   : > { %v1249_v29 = vadd.f32 %v1202_v25, %v2758_v9  ;;  %v1251_v6 = vadd.f32 %v1243_v12, %v2761_v11  ;;  %v1204_v31 = vpop.f32.mrb[26].mxu0  ;;  %v1245_v53 = vpop.f32.mrb[26].mxu1 }
 0x332   : > { %v2100_v28 = vmul.f32 -1.442695, %v1248_v24  ;;  %v1205_v30 = vpop.f32.mrb[27].mxu0  ;;  %v1246_v32 = vpop.f32.mrb[27].mxu1 }
 0x333   : > { %v2101_v35 = vmul.f32 -1.442695, %v1249_v29  ;;  %v2102_v18 = vmul.f32 -1.442695, %v1251_v6 }
 0x334   : > { %2288 = vpow2.f32 %v2100_v28  ;;  %v3203_v28 = vld [vmem:[#allocation5_spill] sm:$0xff] }
 0x335   : > { %2290 = vpow2.f32 %v2101_v35 }
 0x336   : > { %2292 = vpow2.f32 %v2102_v18 }
 0x337   : > { %2294 = vtanh.f32 %v1250_v26 }
 0x33e   : > { %v2289_v8 = vpop.eup %2288 }
 0x33f   : > { %v2291_v15 = vpop.eup %2290  ;;  %v1255_v62 = vadd.f32 1.0, %v2289_v8 }
 0x340   : > { %v1261_v7 = vadd.f32 1.0, %v2291_v15  ;;  %v2293_v9 = vpop.eup %2292 }
 0x341   : > { %2296 = vrcp.f32 %v1255_v62  ;;  %v2295_v11 = vpop.eup %2294  ;;  %v1268_v20 = vadd.f32 1.0, %v2293_v9 }
 0x342   : > { %2298 = vrcp.f32 %v1261_v7 }
 0x343   : > { %2300 = vrcp.f32 %v1268_v20 }
 0x34b   : > { %v2297_v21 = vpop.eup %2296 }
 0x34c   : > { %v2299_v16 = vpop.eup %2298  ;;  %v1272_v44 = vmul.f32 %v2297_v21, %v2295_v11 }
 0x34d   : > { %v1271_v27 = vmul.f32 %v2299_v16, %v2872_v17  ;;  %v2301_v14 = vpop.eup %2300 }
 0x34f   : > { %v2915_v0 = vadd.f32 %v1272_v44, %v1271_v27 }
 0x351   : > { %2302 = vtanh.f32 %v2915_v0 }
 0x35b   : > { %v2303_v22 = vpop.eup %2302 }
 0x35c   : > { %v1275_v24 = vmul.f32 %v2303_v22, %v2301_v14 }
 0x35e   : > { %v1276_v26 = vpack.c.bf16 %v1275_v24, %v1275_v24 }
 0x360   : > { %2103 = vst [vmem:[%s2830_s10 + $0x8] sm:$0xf] %v1276_v26  ;;  %1319 = vmatmul.mubr.bf16.vlgmr.msra.gmra.mrb[28].mxu0 %v1276_v26  ;;  %1360 = vmatmul.mubr.bf16.vlgmr.msra.gmra.mrb[28].mxu1 %v1276_v26 }
 0x361   : > { %1407 = vmatpush1.bf16.msra.mxu0 %v2552_v36  ;;  %1448 = vmatpush1.bf16.msra.mxu1 %v2555_v37 }
 0x362   : > { %1408 = vmatprep.subr.bf16.mxu0 %v2560_v38  ;;  %1449 = vmatprep.subr.bf16.mxu1 %v2563_v39 }
 0x363   : > { %1438 = vmatprep.mubr.bf16.mxu0 %v3202_v10  ;;  %1479 = vmatprep.mubr.bf16.mxu1 %v3202_v10 }
 0x365   : > { %1409 = vmatpush1.bf16.msra.mxu0 %v2566_v40  ;;  %1450 = vmatpush1.bf16.msra.mxu1 %v2571_v41 }
 0x366   : > { %1410 = vmatprep.subr.bf16.mxu0 %v2576_v42  ;;  %1451 = vmatprep.subr.bf16.mxu1 %v2579_v43 }
 0x369   : > { %1411 = vmatpush1.bf16.msra.mxu0 %v2585_v45  ;;  %1452 = vmatpush1.bf16.msra.mxu1 %v2588_v46 }
 0x36a   : > { %1412 = vmatprep.subr.bf16.mxu0 %v2593_v47  ;;  %1453 = vmatprep.subr.bf16.mxu1 %v2598_v48 }
 0x36d   : > { %1413 = vmatpush1.bf16.msra.mxu0 %v2601_v49  ;;  %1454 = vmatpush1.bf16.msra.mxu1 %v2604_v50 }
 0x36e   : > { %1414 = vmatprep.subr.bf16.mxu0 %v2609_v51  ;;  %1455 = vmatprep.subr.bf16.mxu1 %v2614_v52 }
 0x371   : > { %1415 = vmatpush1.bf16.msra.mxu0 %v2622_v54  ;;  %1456 = vmatpush1.bf16.msra.mxu1 %v2625_v55 }
 0x372   : > { %1416 = vmatprep.subr.bf16.mxu0 %v2630_v56  ;;  %1457 = vmatprep.subr.bf16.mxu1 %v2633_v57 }
 0x375   : > { %1417 = vmatpush1.bf16.msra.mxu0 %v2638_v58  ;;  %1458 = vmatpush1.bf16.msra.mxu1 %v2641_v59 }
 0x376   : > { %1418 = vmatprep.subr.bf16.mxu0 %v2646_v60  ;;  %1459 = vmatprep.subr.bf16.mxu1 %v2649_v61 }
 0x379   : > { %1419 = vmatpush1.bf16.msra.mxu0 %v2657_v63  ;;  %1460 = vmatpush1.bf16.msra.mxu1 %v2660_v1 }
 0x37a   : > { %1420 = vmatprep.subr.bf16.mxu0 %v2665_v2  ;;  %1461 = vmatprep.subr.bf16.mxu1 %v2668_v3 }
 0x37d   : > { %1421 = vmatpush1.bf16.msra.mxu0 %v2673_v4  ;;  %1462 = vmatpush1.bf16.msra.mxu1 %v2676_v5 }
 0x37e   : > { %1526 = vmatprep.subr.bf16.mxu0 %v2545_v33  ;;  %1567 = vmatprep.subr.bf16.mxu1 %v2548_v34 }
 0x433   : > { %v1320_v17 = vpop.f32.mrb[28].mxu0  ;;  %v1361_v25 = vpop.f32.mrb[28].mxu1 }
 0x434   : > { %v1368_v12 = vadd.f32 %v1320_v17, %v2763_v13  ;;  %v1370_v29 = vadd.f32 %v1361_v25, %v2766_v19  ;;  %v1322_v6 = vpop.f32.mrb[29].mxu0  ;;  %v1363_v31 = vpop.f32.mrb[29].mxu1 }
 0x435   : > { %v1369_v53 = vadd.f32 %v1322_v6, %v2769_v23  ;;  %v1371_v30 = vadd.f32 %v1363_v31, %v3203_v28  ;;  %v1324_v32 = vpop.f32.mrb[30].mxu0  ;;  %v1365_v35 = vpop.f32.mrb[30].mxu1 }
 0x436   : > { %v2104_v18 = vmul.f32 -1.442695, %v1368_v12  ;;  %v1325_v8 = vpop.f32.mrb[31].mxu0  ;;  %v1366_v15 = vpop.f32.mrb[31].mxu1 }
 0x437   : > { %v2105_v33 = vmul.f32 -1.442695, %v1369_v53  ;;  %v2106_v34 = vmul.f32 -1.442695, %v1371_v30  ;;  %v3012_v8 = vld [vmem:[%s2535_s29] ss:$16 sps:$4 sm:$0xff]  }
 0x438   : > { %2304 = vpow2.f32 %v2104_v18  ;;  %v3016_v15 = vld [vmem:[%s2535_s29 + $0x8] ss:$16 sps:$4 sm:$0xff]  }
 0x439   : > { %2306 = vpow2.f32 %v2105_v33  ;;  %v3020_v33 = vld [vmem:[%s2535_s29 + $0x24] ss:$16 sps:$4 sm:$0xff]  }
 0x43a   : > { %2308 = vpow2.f32 %v2106_v34  ;;  %v3024_v34 = vld [vmem:[%s2535_s29 + $0x2c] ss:$16 sps:$4 sm:$0xff]  }
 0x43b   : > { %2310 = vtanh.f32 %v1370_v29 }
 0x442   : > { %v2305_v62 = vpop.eup %2304 }
 0x443   : > { %v2307_v7 = vpop.eup %2306  ;;  %v1375_v13 = vadd.f32 1.0, %v2305_v62  ;;  %v3030_v62 = vld [vmem:[%s2535_s29 + $0x20] ss:$16 sps:$4 sm:$0xff]  }
 0x444   : > { %v1381_v19 = vadd.f32 1.0, %v2307_v7  ;;  %v2309_v23 = vpop.eup %2308  ;;  %v3034_v7 = vld [vmem:[%s2535_s29 + $0x28] ss:$16 sps:$4 sm:$0xff]  }
 0x445   : > { %2312 = vrcp.f32 %v1375_v13  ;;  %v2311_v9 = vpop.eup %2310  ;;  %v1388_v44 = vadd.f32 1.0, %v2309_v23  ;;  %v3038_v13 = vld [vmem:[%s2535_s29 + $0x44] ss:$16 sps:$4 sm:$0xff]   ;;  %v3046_v23 = vld [vmem:[%s2535_s29 + $0x40] ss:$16 sps:$4 sm:$0xff]  }
 0x446   : > { %2314 = vrcp.f32 %v1381_v19  ;;  %v3042_v19 = vld [vmem:[%s2535_s29 + $0x4c] ss:$16 sps:$4 sm:$0xff]  }
 0x447   : > { %2316 = vrcp.f32 %v1388_v44  ;;  %v3066_v44 = vld [vmem:[%s2535_s29 + $0x68] ss:$16 sps:$4 sm:$0xff]  }
 0x44f   : > { %v2313_v11 = vpop.eup %2312 }
 0x450   : > { %v2315_v21 = vpop.eup %2314  ;;  %v1392_v16 = vmul.f32 %v2313_v11, %v2311_v9  ;;  %v3050_v9 = vld [vmem:[%s2535_s29 + $0x48] ss:$16 sps:$4 sm:$0xff]   ;;  %v3054_v11 = vld [vmem:[%s2535_s29 + $0x64] ss:$16 sps:$4 sm:$0xff]  }
 0x451   : > { %v1391_v20 = vmul.f32 %v2315_v21, %v2915_v0  ;;  %v2317_v14 = vpop.eup %2316  ;;  %v3058_v21 = vld [vmem:[%s2535_s29 + $0x6c] ss:$16 sps:$4 sm:$0xff]  }
 0x453   : > { %v2958_v27 = vadd.f32 %v1392_v16, %v1391_v20  ;;  %v3062_v16 = vld [vmem:[%s2535_s29 + $0x60] ss:$16 sps:$4 sm:$0xff]   ;;  %v3070_v20 = vld [vmem:[%s2535_s29 + $0x84] ss:$16 sps:$4 sm:$0xff]  }
 0x455   : > { %2318 = vtanh.f32 %v2958_v27 }
 0x45f   : > { %v2319_v22 = vpop.eup %2318 }
 0x460   : > { %v1395_v24 = vmul.f32 %v2319_v22, %v2317_v14  ;;  %v3078_v14 = vld [vmem:[%s2535_s29 + $0x80] ss:$16 sps:$4 sm:$0xff]   ;;  %v3082_v22 = vld [vmem:[%s2535_s29 + $0x88] ss:$16 sps:$4 sm:$0xff]  }
 0x462   : > { %v1396_v26 = vpack.c.bf16 %v1395_v24, %v1395_v24  ;;  %v3086_v24 = vld [vmem:[%s2535_s29 + $0xa4] ss:$16 sps:$4 sm:$0xff]  }
 0x464   : > { %2107 = vst [vmem:[%s2830_s10 + $0xc] sm:$0xf] %v1396_v26  ;;  %1439 = vmatmul.mubr.bf16.vlgmr.msra.gmra.mrb[32].mxu0 %v1396_v26  ;;  %1480 = vmatmul.mubr.bf16.vlgmr.msra.gmra.mrb[32].mxu1 %v1396_v26  ;;  %v3090_v26 = vld [vmem:[%s2535_s29 + $0xac] ss:$16 sps:$4 sm:$0xff]  }
 0x465   : > { %1527 = vmatpush1.bf16.msra.mxu0 %v2552_v36  ;;  %1568 = vmatpush1.bf16.msra.mxu1 %v2555_v37  ;;  %v2995_v36 = vld [vmem:[%s2535_s29 + $0x4] ss:$16 sps:$4 sm:$0xff]   ;;  %v2999_v37 = vld [vmem:[%s2535_s29 + $0xc] ss:$16 sps:$4 sm:$0xff]  }
 0x466   : > { %1528 = vmatprep.subr.bf16.mxu0 %v2560_v38  ;;  %1569 = vmatprep.subr.bf16.mxu1 %v2563_v39 }
 0x467   : > { %1558 = vmatprep.mubr.bf16.mxu0 %v3202_v10  ;;  %1599 = vmatprep.mubr.bf16.mxu1 %v3202_v10 }
 0x469   : > { %1529 = vmatpush1.bf16.msra.mxu0 %v2566_v40  ;;  %1570 = vmatpush1.bf16.msra.mxu1 %v2571_v41  ;;  %v3204_v40 = vld [vmem:[#allocation6_spill] sm:$0xff] }
 0x46a   : > { %1530 = vmatprep.subr.bf16.mxu0 %v2576_v42  ;;  %1571 = vmatprep.subr.bf16.mxu1 %v2579_v43  ;;  %v3205_v42 = vld [vmem:[#allocation7_spill] sm:$0xff] }
 0x46d   : > { %1531 = vmatpush1.bf16.msra.mxu0 %v2585_v45  ;;  %1572 = vmatpush1.bf16.msra.mxu1 %v2588_v46 }
 0x46e   : > { %1532 = vmatprep.subr.bf16.mxu0 %v2593_v47  ;;  %1573 = vmatprep.subr.bf16.mxu1 %v2598_v48  ;;  %v3206_v47 = vld [vmem:[#allocation8_spill] sm:$0xff] }
 0x471   : > { %1533 = vmatpush1.bf16.msra.mxu0 %v2601_v49  ;;  %1574 = vmatpush1.bf16.msra.mxu1 %v2604_v50  ;;  %v3207_v49 = vld [vmem:[#allocation9_spill] sm:$0xff] }
 0x472   : > { %1534 = vmatprep.subr.bf16.mxu0 %v2609_v51  ;;  %1575 = vmatprep.subr.bf16.mxu1 %v2614_v52 }
 0x475   : > { %1535 = vmatpush1.bf16.msra.mxu0 %v2622_v54  ;;  %1576 = vmatpush1.bf16.msra.mxu1 %v2625_v55 }
 0x476   : > { %1536 = vmatprep.subr.bf16.mxu0 %v2630_v56  ;;  %1577 = vmatprep.subr.bf16.mxu1 %v2633_v57 }
 0x479   : > { %1537 = vmatpush1.bf16.msra.mxu0 %v2638_v58  ;;  %1578 = vmatpush1.bf16.msra.mxu1 %v2641_v59 }
 0x47a   : > { %1538 = vmatprep.subr.bf16.mxu0 %v2646_v60  ;;  %1579 = vmatprep.subr.bf16.mxu1 %v2649_v61 }
 0x47d   : > { %1539 = vmatpush1.bf16.msra.mxu0 %v2657_v63  ;;  %1580 = vmatpush1.bf16.msra.mxu1 %v2660_v1 }
 0x47e   : > { %1540 = vmatprep.subr.bf16.mxu0 %v2665_v2  ;;  %1581 = vmatprep.subr.bf16.mxu1 %v2668_v3 }
 0x481   : > { %1541 = vmatpush1.bf16.msra.mxu0 %v2673_v4  ;;  %1582 = vmatpush1.bf16.msra.mxu1 %v2676_v5 }
 0x482   : > { %1646 = vmatprep.subr.bf16.mxu0 %v2995_v36  ;;  %1687 = vmatprep.subr.bf16.mxu1 %v2999_v37 }
 0x537   : > { %v1440_v38 = vpop.f32.mrb[32].mxu0  ;;  %v1481_v39 = vpop.f32.mrb[32].mxu1 }
 0x538   : > { %v1488_v41 = vadd.f32 %v1440_v38, %v3204_v40  ;;  %v1490_v43 = vadd.f32 %v1481_v39, %v3205_v42  ;;  %v1442_v45 = vpop.f32.mrb[33].mxu0  ;;  %v1483_v46 = vpop.f32.mrb[33].mxu1  ;;  %v3094_v38 = vld [vmem:[%s2535_s29 + $0xa0] ss:$16 sps:$4 sm:$0xff]   ;;  %v3098_v39 = vld [vmem:[%s2535_s29 + $0xa8] ss:$16 sps:$4 sm:$0xff]  }
 0x539   : > { %v1489_v48 = vadd.f32 %v1442_v45, %v3206_v47  ;;  %v1491_v50 = vadd.f32 %v1483_v46, %v3207_v49  ;;  %v1444_v51 = vpop.f32.mrb[34].mxu0  ;;  %v1485_v52 = vpop.f32.mrb[34].mxu1  ;;  %v3102_v40 = vld [vmem:[%s2535_s29 + $0xc4] ss:$16 sps:$4 sm:$0xff]   ;;  %v3208_v45 = vld [vmem:[#allocation10_spill] sm:$0xff]  ;;  %v3210_v49 = vld [vmem:[#allocation12_spill] sm:$0xff] }
 0x53a   : > { %v2108_v54 = vmul.f32 -1.442695, %v1488_v41  ;;  %v1445_v55 = vpop.f32.mrb[35].mxu0  ;;  %v1486_v56 = vpop.f32.mrb[35].mxu1  ;;  %v3106_v41 = vld [vmem:[%s2535_s29 + $0xcc] ss:$16 sps:$4 sm:$0xff]  }
 0x53b   : > { %v2109_v57 = vmul.f32 -1.442695, %v1489_v48  ;;  %v2110_v58 = vmul.f32 -1.442695, %v1491_v50  ;;  %v3209_v47 = vld [vmem:[#allocation11_spill] sm:$0xff]  ;;  %v3211_v50 = vld [vmem:[#allocation13_spill] sm:$0xff] }
 0x53c   : > { %2320 = vpow2.f32 %v2108_v54 }
 0x53d   : > { %2322 = vpow2.f32 %v2109_v57 }
 0x53e   : > { %2324 = vpow2.f32 %v2110_v58 }
 0x53f   : > { %2326 = vtanh.f32 %v1490_v43 }
 0x546   : > { %v2321_v59 = vpop.eup %2320 }
 0x547   : > { %v2323_v60 = vpop.eup %2322  ;;  %v1495_v61 = vadd.f32 1.0, %v2321_v59 }
 0x548   : > { %v1501_v0 = vadd.f32 1.0, %v2323_v60  ;;  %v2325_v17 = vpop.eup %2324 }
 0x549   : > { %2328 = vrcp.f32 %v1495_v61  ;;  %v2327_v25 = vpop.eup %2326  ;;  %v1508_v31 = vadd.f32 1.0, %v2325_v17 }
 0x54a   : > { %2330 = vrcp.f32 %v1501_v0 }
 0x54b   : > { %2332 = vrcp.f32 %v1508_v31 }
 0x553   : > { %v2329_v12 = vpop.eup %2328 }
 0x554   : > { %v2331_v29 = vpop.eup %2330  ;;  %v1512_v6 = vmul.f32 %v2329_v12, %v2327_v25 }
 0x555   : > { %v1511_v53 = vmul.f32 %v2331_v29, %v2958_v27  ;;  %v2333_v30 = vpop.eup %2332  ;;  %v3074_v27 = vld [vmem:[%s2535_s29 + $0x8c] ss:$16 sps:$4 sm:$0xff]  }
 0x557   : > { %v3007_v28 = vadd.f32 %v1512_v6, %v1511_v53 }
 0x559   : > { %2334 = vtanh.f32 %v3007_v28 }
 0x563   : > { %v2335_v32 = vpop.eup %2334 }
 0x564   : > { %v1515_v35 = vmul.f32 %v2335_v32, %v2333_v30  ;;  %v2412_v32 = vld [vmem:[%s2535_s29 + $0xe4] ss:$16 sps:$4 sm:$0xff]  }
 0x566   : > { %v1516_v18 = vpack.c.bf16 %v1515_v35, %v1515_v35  ;;  %v2413_v35 = vld [vmem:[%s2535_s29 + $0xec] ss:$16 sps:$4 sm:$0xff]  }
 0x568   : > { %2111 = vst [vmem:[%s2830_s10 + $0x10] sm:$0xf] %v1516_v18  ;;  %1559 = vmatmul.mubr.bf16.vlgmr.msra.gmra.mrb[36].mxu0 %v1516_v18  ;;  %1600 = vmatmul.mubr.bf16.vlgmr.msra.gmra.mrb[36].mxu1 %v1516_v18  ;;  %v2414_v18 = vld [vmem:[%s2535_s29 + $0xe0] ss:$16 sps:$4 sm:$0xff]  }
 0x569   : > { %1647 = vmatpush1.bf16.msra.mxu0 %v3012_v8  ;;  %1688 = vmatpush1.bf16.msra.mxu1 %v3016_v15 }
 0x56a   : > { %1648 = vmatprep.subr.bf16.mxu0 %v3020_v33  ;;  %1689 = vmatprep.subr.bf16.mxu1 %v3024_v34 }
 0x56b   : > { %1678 = vmatprep.mubr.bf16.mxu0 %v3202_v10  ;;  %1719 = vmatprep.mubr.bf16.mxu1 %v3202_v10 }
 0x56d   : > { %1649 = vmatpush1.bf16.msra.mxu0 %v3030_v62  ;;  %1690 = vmatpush1.bf16.msra.mxu1 %v3034_v7 }
 0x56e   : > { %1650 = vmatprep.subr.bf16.mxu0 %v3038_v13  ;;  %1691 = vmatprep.subr.bf16.mxu1 %v3042_v19 }
 0x571   : > { %1651 = vmatpush1.bf16.msra.mxu0 %v3046_v23  ;;  %1692 = vmatpush1.bf16.msra.mxu1 %v3050_v9 }
 0x572   : > { %1652 = vmatprep.subr.bf16.mxu0 %v3054_v11  ;;  %1693 = vmatprep.subr.bf16.mxu1 %v3058_v21 }
 0x575   : > { %1653 = vmatpush1.bf16.msra.mxu0 %v3062_v16  ;;  %1694 = vmatpush1.bf16.msra.mxu1 %v3066_v44 }
 0x576   : > { %1654 = vmatprep.subr.bf16.mxu0 %v3070_v20  ;;  %1695 = vmatprep.subr.bf16.mxu1 %v3074_v27 }
 0x579   : > { %1655 = vmatpush1.bf16.msra.mxu0 %v3078_v14  ;;  %1696 = vmatpush1.bf16.msra.mxu1 %v3082_v22 }
 0x57a   : > { %1656 = vmatprep.subr.bf16.mxu0 %v3086_v24  ;;  %1697 = vmatprep.subr.bf16.mxu1 %v3090_v26 }
 0x57d   : > { %1657 = vmatpush1.bf16.msra.mxu0 %v3094_v38  ;;  %1698 = vmatpush1.bf16.msra.mxu1 %v3098_v39 }
 0x57e   : > { %1658 = vmatprep.subr.bf16.mxu0 %v3102_v40  ;;  %1699 = vmatprep.subr.bf16.mxu1 %v3106_v41 }
 0x581   : > { %1659 = vmatpush1.bf16.msra.mxu0 %v2657_v63  ;;  %1700 = vmatpush1.bf16.msra.mxu1 %v2660_v1 }
 0x582   : > { %1660 = vmatprep.subr.bf16.mxu0 %v2665_v2  ;;  %1701 = vmatprep.subr.bf16.mxu1 %v2668_v3 }
 0x585   : > { %1661 = vmatpush1.bf16.msra.mxu0 %v2673_v4  ;;  %1702 = vmatpush1.bf16.msra.mxu1 %v2676_v5 }
 0x586   : > { %1766 = vmatprep.subr.bf16.mxu0 %v2995_v36  ;;  %1807 = vmatprep.subr.bf16.mxu1 %v2999_v37 }
 0x63b   : > { %v1560_v42 = vpop.f32.mrb[36].mxu0  ;;  %v1601_v43 = vpop.f32.mrb[36].mxu1 }
 0x63c   : > { %v1608_v46 = vadd.f32 %v1560_v42, %v3208_v45  ;;  %v1610_v63 = vadd.f32 %v1601_v43, %v3209_v47  ;;  %v1562_v48 = vpop.f32.mrb[37].mxu0  ;;  %v1603_v1 = vpop.f32.mrb[37].mxu1 }
 0x63d   : > { %v1609_v2 = vadd.f32 %v1562_v48, %v3210_v49  ;;  %v1611_v3 = vadd.f32 %v1603_v1, %v3211_v50  ;;  %v1564_v51 = vpop.f32.mrb[38].mxu0  ;;  %v1605_v4 = vpop.f32.mrb[38].mxu1 }
 0x63e   : > { %v2112_v52 = vmul.f32 -1.442695, %v1608_v46  ;;  %v1565_v5 = vpop.f32.mrb[39].mxu0  ;;  %v1606_v54 = vpop.f32.mrb[39].mxu1 }
 0x63f   : > { %v2113_v36 = vmul.f32 -1.442695, %v1609_v2  ;;  %v2114_v37 = vmul.f32 -1.442695, %v1611_v3  ;;  %v3217_v54 = vld [vmem:[#allocation19_spill] sm:$0xff] }
 0x640   : > { %2336 = vpow2.f32 %v2112_v52  ;;  %v3216_v52 = vld [vmem:[#allocation18_spill] sm:$0xff] }
 0x641   : > { %2338 = vpow2.f32 %v2113_v36 }
 0x642   : > { %2340 = vpow2.f32 %v2114_v37 }
 0x643   : > { %2342 = vtanh.f32 %v1610_v63 }
 0x64a   : > { %v2337_v55 = vpop.eup %2336 }
 0x64b   : > { %v2339_v56 = vpop.eup %2338  ;;  %v1615_v57 = vadd.f32 1.0, %v2337_v55 }
 0x64c   : > { %v1621_v58 = vadd.f32 1.0, %v2339_v56  ;;  %v2341_v59 = vpop.eup %2340  ;;  %v3218_v56 = vld [vmem:[#allocation20_spill] sm:$0xff] }
 0x64d   : > { %2344 = vrcp.f32 %v1615_v57  ;;  %v2343_v60 = vpop.eup %2342  ;;  %v1628_v25 = vadd.f32 1.0, %v2341_v59 }
 0x64e   : > { %2346 = vrcp.f32 %v1621_v58  ;;  %v3219_v58 = vld [vmem:[#allocation21_spill] sm:$0xff] }
 0x64f   : > { %2348 = vrcp.f32 %v1628_v25 }
 0x657   : > { %v2345_v61 = vpop.eup %2344 }
 0x658   : > { %v2347_v0 = vpop.eup %2346  ;;  %v1632_v17 = vmul.f32 %v2345_v61, %v2343_v60 }
 0x659   : > { %v1631_v12 = vmul.f32 %v2347_v0, %v3007_v28  ;;  %v2349_v6 = vpop.eup %2348  ;;  %v2411_v28 = vld [vmem:[%s2535_s29 + $0xc8] ss:$16 sps:$4 sm:$0xff]  }
 0x65b   : > { %v3122_v29 = vadd.f32 %v1632_v17, %v1631_v12 }
 0x65d   : > { %2350 = vtanh.f32 %v3122_v29 }
 0x667   : > { %v2351_v31 = vpop.eup %2350 }
 0x668   : > { %v1635_v53 = vmul.f32 %v2351_v31, %v2349_v6 }
 0x66a   : > { %v1636_v30 = vpack.c.bf16 %v1635_v53, %v1635_v53 }
 0x66c   : > { %2115 = vst [vmem:[%s2830_s10 + $0x14] sm:$0xf] %v1636_v30  ;;  %1679 = vmatmul.mubr.bf16.vlgmr.msra.gmra.mrb[40].mxu0 %v1636_v30  ;;  %1720 = vmatmul.mubr.bf16.vlgmr.msra.gmra.mrb[40].mxu1 %v1636_v30 }
 0x66d   : > { %1767 = vmatpush1.bf16.msra.mxu0 %v3012_v8  ;;  %1808 = vmatpush1.bf16.msra.mxu1 %v3016_v15  ;;  %v2415_v8 = vld [vmem:[%s2535_s29 + $0xe8] ss:$16 sps:$4 sm:$0xff]  }
 0x66e   : > { %1768 = vmatprep.subr.bf16.mxu0 %v3020_v33  ;;  %1809 = vmatprep.subr.bf16.mxu1 %v3024_v34  ;;  %v3212_v34 = vld [vmem:[#allocation14_spill] sm:$0xff] }
 0x66f   : > { %1798 = vmatprep.mubr.bf16.mxu0 %v3202_v10  ;;  %1839 = vmatprep.mubr.bf16.mxu1 %v3202_v10  ;;  %v2410_v10 = vld [vmem:[%s2535_s29 + $0xc0] ss:$16 sps:$4 sm:$0xff]  }
 0x671   : > { %1769 = vmatpush1.bf16.msra.mxu0 %v3030_v62  ;;  %1810 = vmatpush1.bf16.msra.mxu1 %v3034_v7  ;;  %v3213_v7 = vld [vmem:[#allocation15_spill] sm:$0xff] }
 0x672   : > { %1770 = vmatprep.subr.bf16.mxu0 %v3038_v13  ;;  %1811 = vmatprep.subr.bf16.mxu1 %v3042_v19 }
 0x675   : > { %1771 = vmatpush1.bf16.msra.mxu0 %v3046_v23  ;;  %1812 = vmatpush1.bf16.msra.mxu1 %v3050_v9  ;;  %v3214_v9 = vld [vmem:[#allocation16_spill] sm:$0xff] }
 0x676   : > { %1772 = vmatprep.subr.bf16.mxu0 %v3054_v11  ;;  %1813 = vmatprep.subr.bf16.mxu1 %v3058_v21  ;;  %v3215_v21 = vld [vmem:[#allocation17_spill] sm:$0xff] }
 0x679   : > { %1773 = vmatpush1.bf16.msra.mxu0 %v3062_v16  ;;  %1814 = vmatpush1.bf16.msra.mxu1 %v3066_v44 }
 0x67a   : > { %1774 = vmatprep.subr.bf16.mxu0 %v3070_v20  ;;  %1815 = vmatprep.subr.bf16.mxu1 %v3074_v27 }
 0x67d   : > { %1775 = vmatpush1.bf16.msra.mxu0 %v3078_v14  ;;  %1816 = vmatpush1.bf16.msra.mxu1 %v3082_v22 }
 0x67e   : > { %1776 = vmatprep.subr.bf16.mxu0 %v3086_v24  ;;  %1817 = vmatprep.subr.bf16.mxu1 %v3090_v26 }
 0x681   : > { %1777 = vmatpush1.bf16.msra.mxu0 %v3094_v38  ;;  %1818 = vmatpush1.bf16.msra.mxu1 %v3098_v39 }
 0x682   : > { %1778 = vmatprep.subr.bf16.mxu0 %v3102_v40  ;;  %1819 = vmatprep.subr.bf16.mxu1 %v3106_v41 }
 0x685   : > { %1779 = vmatpush1.bf16.msra.mxu0 %v2410_v10  ;;  %1820 = vmatpush1.bf16.msra.mxu1 %v2411_v28 }
 0x686   : > { %1780 = vmatprep.subr.bf16.mxu0 %v2412_v32  ;;  %1821 = vmatprep.subr.bf16.mxu1 %v2413_v35 }
 0x689   : > { %1781 = vmatpush1.bf16.msra.mxu0 %v2414_v18  ;;  %1822 = vmatpush1.bf16.msra.mxu1 %v2415_v8 }
 0x73f   : > { %v1680_v15 = vpop.f32.mrb[40].mxu0  ;;  %v1721_v33 = vpop.f32.mrb[40].mxu1 }
 0x740   : > { %v1728_v62 = vadd.f32 %v1680_v15, %v3212_v34  ;;  %v1730_v13 = vadd.f32 %v1721_v33, %v3213_v7  ;;  %v1682_v19 = vpop.f32.mrb[41].mxu0  ;;  %v1723_v23 = vpop.f32.mrb[41].mxu1 }
 0x741   : > { %v1729_v11 = vadd.f32 %v1682_v19, %v3214_v9  ;;  %v1731_v16 = vadd.f32 %v1723_v23, %v3215_v21  ;;  %v1684_v44 = vpop.f32.mrb[42].mxu0  ;;  %v1725_v20 = vpop.f32.mrb[42].mxu1 }
 0x742   : > { %v2116_v27 = vmul.f32 -1.442695, %v1728_v62  ;;  %v1685_v14 = vpop.f32.mrb[43].mxu0  ;;  %v1726_v22 = vpop.f32.mrb[43].mxu1 }
 0x743   : > { %v2117_v24 = vmul.f32 -1.442695, %v1729_v11  ;;  %v2118_v26 = vmul.f32 -1.442695, %v1731_v16 }
 0x744   : > { %2352 = vpow2.f32 %v2116_v27 }
 0x745   : > { %2354 = vpow2.f32 %v2117_v24 }
 0x746   : > { %2356 = vpow2.f32 %v2118_v26 }
 0x747   : > { %2358 = vtanh.f32 %v1730_v13 }
 0x74e   : > { %v2353_v38 = vpop.eup %2352 }
 0x74f   : > { %v2355_v39 = vpop.eup %2354  ;;  %v1735_v40 = vadd.f32 1.0, %v2353_v38 }
 0x750   : > { %v1741_v41 = vadd.f32 1.0, %v2355_v39  ;;  %v2357_v42 = vpop.eup %2356 }
 0x751   : > { %2360 = vrcp.f32 %v1735_v40  ;;  %v2359_v43 = vpop.eup %2358  ;;  %v1748_v63 = vadd.f32 1.0, %v2357_v42 }
 0x752   : > { %2362 = vrcp.f32 %v1741_v41 }
 0x753   : > { %2364 = vrcp.f32 %v1748_v63 }
 0x75b   : > { %v2361_v45 = vpop.eup %2360 }
 0x75c   : > { %v2363_v46 = vpop.eup %2362  ;;  %v1752_v47 = vmul.f32 %v2361_v45, %v2359_v43 }
 0x75d   : > { %v1751_v48 = vmul.f32 %v2363_v46, %v3122_v29  ;;  %v2365_v49 = vpop.eup %2364 }
 0x75f   : > { %v1753_v1 = vadd.f32 %v1752_v47, %v1751_v48 }
 0x761   : > { %2366 = vtanh.f32 %v1753_v1 }
 0x76b   : > { %v2367_v2 = vpop.eup %2366 }
 0x76c   : > { %v1755_v50 = vmul.f32 %v2367_v2, %v2365_v49 }
 0x76e   : > { %v1756_v3 = vpack.c.bf16 %v1755_v50, %v1755_v50 }
 0x770   : > { %2119 = vst [vmem:[%s2830_s10 + $0x18] sm:$0xf] %v1756_v3  ;;  %1799 = vmatmul.mubr.bf16.vlgmr.msra.gmra.mrb[44].mxu0 %v1756_v3  ;;  %1840 = vmatmul.mubr.bf16.vlgmr.msra.gmra.mrb[44].mxu1 %v1756_v3 }
 0x843   : > { %v1800_v51 = vpop.f32.mrb[44].mxu0  ;;  %v1841_v4 = vpop.f32.mrb[44].mxu1 }
 0x844   : > { %v1848_v5 = vadd.f32 %v1800_v51, %v3216_v52  ;;  %v1850_v36 = vadd.f32 %v1841_v4, %v3217_v54  ;;  %v1802_v37 = vpop.f32.mrb[45].mxu0  ;;  %v1843_v55 = vpop.f32.mrb[45].mxu1 }
 0x845   : > { %v1849_v57 = vadd.f32 %v1802_v37, %v3218_v56  ;;  %v1851_v59 = vadd.f32 %v1843_v55, %v3219_v58  ;;  %v1804_v60 = vpop.f32.mrb[46].mxu0  ;;  %v1845_v61 = vpop.f32.mrb[46].mxu1 }
 0x846   : > { %v2120_v0 = vmul.f32 -1.442695, %v1848_v5  ;;  %v1805_v17 = vpop.f32.mrb[47].mxu0  ;;  %v1846_v25 = vpop.f32.mrb[47].mxu1 }
 0x847   : > { %v2121_v12 = vmul.f32 -1.442695, %v1849_v57  ;;  %v2122_v29 = vmul.f32 -1.442695, %v1851_v59 }
 0x848   : > { %2368 = vpow2.f32 %v2120_v0 }
 0x849   : > { %2370 = vpow2.f32 %v2121_v12 }
 0x84a   : > { %2372 = vpow2.f32 %v2122_v29 }
 0x84b   : > { %2374 = vtanh.f32 %v1850_v36 }
 0x852   : > { %v2369_v6 = vpop.eup %2368 }
 0x853   : > { %v2371_v31 = vpop.eup %2370  ;;  %v1855_v53 = vadd.f32 1.0, %v2369_v6 }
 0x854   : > { %v1861_v30 = vadd.f32 1.0, %v2371_v31  ;;  %v2373_v10 = vpop.eup %2372 }
 0x855   : > { %2376 = vrcp.f32 %v1855_v53  ;;  %v2375_v28 = vpop.eup %2374  ;;  %v1868_v8 = vadd.f32 1.0, %v2373_v10 }
 0x856   : > { %2378 = vrcp.f32 %v1861_v30 }
 0x857   : > { %2380 = vrcp.f32 %v1868_v8 }
 0x85f   : > { %v2377_v32 = vpop.eup %2376 }
 0x860   : > { %v2379_v35 = vpop.eup %2378  ;;  %v1872_v18 = vmul.f32 %v2377_v32, %v2375_v28 }
 0x861   : > { %v1871_v15 = vmul.f32 %v2379_v35, %v1753_v1  ;;  %v2381_v34 = vpop.eup %2380 }
 0x863   : > { %v1873_v33 = vadd.f32 %v1872_v18, %v1871_v15 }
 0x865   : > { %2382 = vtanh.f32 %v1873_v33 }
 0x86f   : > { %v2383_v62 = vpop.eup %2382 }
 0x870   : > { %v1875_v7 = vmul.f32 %v2383_v62, %v2381_v34 }
 0x872   : > { %v1876_v13 = vpack.c.bf16 %v1875_v7, %v1875_v7 }
 0x874   : > { %2123 = vst [vmem:[%s2830_s10 + $0x1c] sm:$0xf] %v1876_v13 }
 0x875 PF: > { %s14_s17 = sadd.s32 1, %s2438_s17   ;;  %s3220_s15 = smov %s2434_s16 }
 0x876   : > { %p11_p5 = scmp.ge.s32.totalorder %s14_s17, 4   ;;  %s3221_s16 = smov %s3223_s18 }
 0x878   :  { %13 = sbr.rel (!%p11_p5) target bundleno = 2 (0x2), region = 94 }

// kernel: bilstm_crf_forward.5
= control target key start
LH: loop header
LB: loop body
LE: loop exit
PB: predicated region body
PF: predicated region fallthrough
CT: control target
= control target key end

     0   :  { %v1591_v1 = vmov 0.0|0.0   ;;  %vm1592_vm0 = vmmov 0   ;;  %v1593_v37 = vmov 0.0   ;;  %v1594_v59 = vmov 0   ;;  %s1936_s0 = inlined_call_operand.vmem [shape: f32[8,8,128], index: 0, kind: input, shape index: {}]   ;;  %s1937_s1 = inlined_call_operand.vmem [shape: f32[128,128], index: 1, kind: input, shape index: {}]   ;;  %s1938_s2 = inlined_call_operand.vmem [shape: s32[8,1], index: 2, kind: input, shape index: {}]   ;;  %s1939_s3 = inlined_call_operand.vmem [shape: f32[8,1], index: 3, kind: output, shape index: {}]  }
   0x1   :  { %v1618_v0 = vld [vmem:[%s1936_s0] sm:$0xff]  ;;  %1325 = vmatprep.subr.bf16.mxu0 %v1591_v1  ;;  %v15_v3 = vld [vmem:[%s1937_s1 + $0x8] sm:$0xff]  ;;  %1349 = vmatprep.subr.bf16.mxu1 %v1591_v1  ;;  %v16_v4 = vld [vmem:[%s1937_s1 + $0x10] sm:$0xff] }
   0x2   :  { %v14_v2 = vld [vmem:[%s1937_s1] sm:$0xff]  ;;  %109 = vmax.xlane.f32.xlu0 %v1618_v0  ;;  %v17_v5 = vld [vmem:[%s1937_s1 + $0x18] sm:$0xff]  ;;  %v19_v7 = vld [vmem:[%s1937_s1 + $0x28] sm:$0xff]  ;;  %1077 = vmatprep.mubr.msk.f32.mxu0 %vm1592_vm0, %v1593_v37 }
   0x3   :  { %v18_v6 = vld [vmem:[%s1937_s1 + $0x20] sm:$0xff]  ;;  %v20_v8 = vld [vmem:[%s1937_s1 + $0x30] sm:$0xff]  ;;  %v21_v9 = vld [vmem:[%s1937_s1 + $0x38] sm:$0xff]  ;;  %v31_v14 = vmax.f32 %v15_v3, %v19_v7  ;;  %1112 = vmatprep.mubr.msk.f32.mxu1 %vm1592_vm0, %v1593_v37  ;;  %1521 = vset.pattern.permute.xlu0 %v1594_v59 }
   0x4   :  { %v30_v10 = vmax.f32 %v14_v2, %v18_v6  ;;  %v1650_v11 = vld [vmem:[%s1937_s1 + $0x40] sm:$0xff]  ;;  %v1655_v12 = vld [vmem:[%s1937_s1 + $0x48] sm:$0xff]  ;;  %v1660_v13 = vld [vmem:[%s1937_s1 + $0x50] sm:$0xff]  ;;  %v32_v15 = vmax.f32 %v16_v4, %v20_v8  ;;  %v33_v16 = vmax.f32 %v17_v5, %v21_v9  ;;  %1522 = vset.pattern.permute.xlu1 %v1594_v59 }
   0x5   :  { %v1665_v17 = vld [vmem:[%s1937_s1 + $0x58] sm:$0xff]  ;;  %v1670_v18 = vld [vmem:[%s1937_s1 + $0x60] sm:$0xff]  ;;  %v1675_v19 = vld [vmem:[%s1937_s1 + $0x68] sm:$0xff]  ;;  %v35_v23 = vmax.f32 %v31_v14, %v1655_v12 }
   0x6   :  { %v34_v20 = vmax.f32 %v30_v10, %v1650_v11  ;;  %v1681_v21 = vld [vmem:[%s1937_s1 + $0x70] sm:$0xff]  ;;  %v1686_v22 = vld [vmem:[%s1937_s1 + $0x78] sm:$0xff]  ;;  %v36_v24 = vmax.f32 %v32_v15, %v1660_v13  ;;  %v37_v25 = vmax.f32 %v33_v16, %v1665_v17  ;;  %v1712_v54 = vld [vmem:[%s1938_s2] sm:$0xff] }
   0x7   :  { %v39_v27 = vmax.f32 %v35_v23, %v1675_v19  ;;  %vm898_vm1 = vcmp.gt.s32.totalorder %v1712_v54, 2  ;;  %vm896_vm3 = vcmp.gt.s32.totalorder %v1712_v54, 1  ;;  %vm900_vm5 = vcmp.gt.s32.totalorder %v1712_v54, 3 }
   0x8   :  { %v38_v26 = vmax.f32 %v34_v20, %v1670_v18  ;;  %v40_v28 = vmax.f32 %v36_v24, %v1681_v21  ;;  %v41_v29 = vmax.f32 %v37_v25, %v1686_v22  ;;  %v388_v62 = vsel %vm898_vm1, 1, %v1594_v59 }
   0x9   :  { %vm902_vm7 = vcmp.gt.s32.totalorder %v1712_v54, 4  ;;  %vm904_vm9 = vcmp.gt.s32.totalorder %v1712_v54, 5  ;;  %vm906_vm11 = vcmp.gt.s32.totalorder %v1712_v54, 6  ;;  %vm908_vm13 = vcmp.gt.s32.totalorder %v1712_v54, 7  ;;  %v905_v54 = vld [vmem:[%s1936_s0 + $0x30] sm:$0xff] }
   0xa   :  { %v42_v30 = vmax.f32 %v38_v26, %v39_v27  ;;  %v43_v31 = vmax.f32 %v40_v28, %v41_v29 }
   0xc   :  { %v44_v32 = vmax.f32 %v42_v30, %v43_v31 }
   0xe   :  { %v45_v33 = vrot.slane %v44_v32, 4 }
  0x10   :  { %v46_v34 = vmax.f32 %v44_v32, %v45_v33 }
  0x12   :  { %v47_v35 = vrot.slane %v46_v34, 2 }
  0x14   :  { %v48_v36 = vmax.f32 %v46_v34, %v47_v35 }
  0x16   :  { %v49_v38 = vrot.slane %v48_v36, 1 }
  0x18   :  { %v1699_v39 = vmax.f32 %v48_v36, %v49_v38  ;;  %198 = vperm.xlu0 %1521, %v1594_v59  }
  0x1a   :  { %v51_v40 = vsub.f32 %v14_v2, %v1699_v39  ;;  %v52_v41 = vsub.f32 %v15_v3, %v1699_v39  ;;  %v53_v42 = vsub.f32 %v16_v4, %v1699_v39  ;;  %v54_v43 = vsub.f32 %v17_v5, %v1699_v39 }
  0x1b   :  { %v55_v44 = vsub.f32 %v18_v6, %v1699_v39  ;;  %v56_v45 = vsub.f32 %v19_v7, %v1699_v39  ;;  %v57_v51 = vsub.f32 %v20_v8, %v1699_v39  ;;  %v58_v53 = vsub.f32 %v21_v9, %v1699_v39 }
  0x1c   :  { %v67_v46 = vmul.f32 1.442695, %v51_v40  ;;  %v69_v47 = vmul.f32 1.442695, %v52_v41  ;;  %v71_v48 = vmul.f32 1.442695, %v53_v42  ;;  %v59_v56 = vsub.f32 %v1650_v11, %v1699_v39  ;;  %390 = vperm.xlu0 %1521, %v388_v62  }
  0x1d   :  { %v73_v49 = vmul.f32 1.442695, %v54_v43  ;;  %v75_v50 = vmul.f32 1.442695, %v55_v44  ;;  %v77_v52 = vmul.f32 1.442695, %v56_v45  ;;  %v60_v57 = vsub.f32 %v1655_v12, %v1699_v39 }
  0x1e   :  { %1523 = vpow2.f32 %v67_v46  ;;  %v79_v55 = vmul.f32 1.442695, %v57_v51  ;;  %v81_v58 = vmul.f32 1.442695, %v58_v53  ;;  %v83_v60 = vmul.f32 1.442695, %v59_v56 }
  0x1f   :  { %1525 = vpow2.f32 %v69_v47  ;;  %v61_v61 = vsub.f32 %v1660_v13, %v1699_v39  ;;  %v85_v63 = vmul.f32 1.442695, %v60_v57  ;;  %v62_v2 = vsub.f32 %v1665_v17, %v1699_v39 }
  0x20   :  { %1527 = vpow2.f32 %v71_v48  ;;  %v63_v8 = vsub.f32 %v1670_v18, %v1699_v39  ;;  %v64_v11 = vsub.f32 %v1675_v19, %v1699_v39  ;;  %v65_v16 = vsub.f32 %v1681_v21, %v1699_v39 }
  0x21   :  { %1529 = vpow2.f32 %v73_v49  ;;  %v87_v7 = vmul.f32 1.442695, %v61_v61  ;;  %v89_v10 = vmul.f32 1.442695, %v62_v2  ;;  %v66_v18 = vsub.f32 %v1686_v22, %v1699_v39  ;;  %v895_v2 = vld [vmem:[%s1936_s0 + $0x8] sm:$0xff] }
  0x22   :  { %1531 = vpow2.f32 %v75_v50  ;;  %v91_v15 = vmul.f32 1.442695, %v63_v8  ;;  %v93_v17 = vmul.f32 1.442695, %v64_v11  ;;  %v95_v24 = vmul.f32 1.442695, %v65_v16 }
  0x23   :  { %1533 = vpow2.f32 %v77_v52  ;;  %v97_v21 = vmul.f32 1.442695, %v66_v18  ;;  %v292_v52 = vsel %vm896_vm3, 1, %v1594_v59  ;;  %v897_v18 = vld [vmem:[%s1936_s0 + $0x10] sm:$0xff] }
  0x24   :  { %1535 = vpow2.f32 %v79_v55 }
  0x25   :  { %1537 = vpow2.f32 %v81_v58 }
  0x26   :  { %1539 = vpow2.f32 %v83_v60 }
  0x27   :  { %1541 = vpow2.f32 %v85_v63 }
  0x28   :  { %v1524_v3 = vpop.eup %1523  ;;  %1543 = vpow2.f32 %v87_v7  ;;  %v484_v7 = vsel %vm900_vm5, 1, %v1594_v59 }
  0x29   :  { %v1526_v4 = vpop.eup %1525  ;;  %1545 = vpow2.f32 %v89_v10 }
  0x2a   :  { %v1528_v5 = vpop.eup %1527  ;;  %v1727_v6 = vpack.c.bf16 %v1526_v4, %v1524_v3  ;;  %1547 = vpow2.f32 %v91_v15 }
  0x2b   :  { %v1530_v9 = vpop.eup %1529  ;;  %1549 = vpow2.f32 %v93_v17 }
  0x2c   :  { %v1532_v12 = vpop.eup %1531  ;;  %1327 = vmatpush3.bf16.msra.mxu0 %v1727_v6  ;;  %v1734_v13 = vpack.c.bf16 %v1530_v9, %v1528_v5  ;;  %1351 = vmatpush3.bf16.msra.mxu1 %v1727_v6  ;;  %1551 = vpow2.f32 %v95_v24 }
  0x2d   :  { %v1534_v14 = vpop.eup %1533  ;;  %1328 = vmatprep.subr.bf16.mxu0 %v1591_v1  ;;  %1352 = vmatprep.subr.bf16.mxu1 %v1591_v1  ;;  %1553 = vpow2.f32 %v97_v21 }
  0x2e   :  { %v1536_v19 = vpop.eup %1535  ;;  %v1744_v20 = vpack.c.bf16 %v1534_v14, %v1532_v12 }
  0x2f   :  { %v1538_v23 = vpop.eup %1537 }
  0x30   :  { %1330 = vmatpush3.bf16.msra.mxu0 %v1734_v13  ;;  %1354 = vmatpush3.bf16.msra.mxu1 %v1734_v13  ;;  %v1540_v25 = vpop.eup %1539  ;;  %v1750_v22 = vpack.c.bf16 %v1538_v23, %v1536_v19 }
  0x31   :  { %1331 = vmatprep.subr.bf16.mxu0 %v1591_v1  ;;  %1355 = vmatprep.subr.bf16.mxu1 %v1591_v1  ;;  %v1542_v26 = vpop.eup %1541 }
  0x32   :  { %v1544_v27 = vpop.eup %1543  ;;  %v1756_v28 = vpack.c.bf16 %v1542_v26, %v1540_v25  ;;  %v580_v25 = vsel %vm902_vm7, 1, %v1594_v59 }
  0x33   :  { %v1546_v29 = vpop.eup %1545 }
  0x34   :  { %1333 = vmatpush3.bf16.msra.mxu0 %v1744_v20  ;;  %1357 = vmatpush3.bf16.msra.mxu1 %v1744_v20  ;;  %v1548_v30 = vpop.eup %1547  ;;  %v1762_v31 = vpack.c.bf16 %v1546_v29, %v1544_v27 }
  0x35   :  { %1334 = vmatprep.subr.bf16.mxu0 %v1591_v1  ;;  %1358 = vmatprep.subr.bf16.mxu1 %v1591_v1  ;;  %v1550_v32 = vpop.eup %1549 }
  0x36   :  { %v1552_v33 = vpop.eup %1551  ;;  %v1768_v34 = vpack.c.bf16 %v1550_v32, %v1548_v30 }
  0x37   :  { %v1554_v35 = vpop.eup %1553 }
  0x38   :  { %1336 = vmatpush3.bf16.msra.mxu0 %v1750_v22  ;;  %1360 = vmatpush3.bf16.msra.mxu1 %v1750_v22  ;;  %v1774_v36 = vpack.c.bf16 %v1554_v35, %v1552_v33 }
  0x39   :  { %1337 = vmatprep.subr.bf16.mxu0 %v1591_v1  ;;  %1361 = vmatprep.subr.bf16.mxu1 %v1591_v1 }
  0x3c   :  { %1339 = vmatpush3.bf16.msra.mxu0 %v1756_v28  ;;  %1363 = vmatpush3.bf16.msra.mxu1 %v1756_v28 }
  0x3d   :  { %1340 = vmatprep.subr.bf16.mxu0 %v1591_v1  ;;  %1364 = vmatprep.subr.bf16.mxu1 %v1591_v1 }
  0x40   :  { %1342 = vmatpush3.bf16.msra.mxu0 %v1762_v31  ;;  %1366 = vmatpush3.bf16.msra.mxu1 %v1762_v31 }
  0x41   :  { %1343 = vmatprep.subr.bf16.mxu0 %v1591_v1  ;;  %1367 = vmatprep.subr.bf16.mxu1 %v1591_v1 }
  0x44   :  { %1345 = vmatpush3.bf16.msra.mxu0 %v1768_v34  ;;  %1369 = vmatpush3.bf16.msra.mxu1 %v1768_v34 }
  0x45   :  { %1346 = vmatprep.subr.bf16.mxu0 %v1591_v1  ;;  %1370 = vmatprep.subr.bf16.mxu1 %v1591_v1 }
  0x48   :  { %1348 = vmatpush3.bf16.msra.mxu0 %v1774_v36  ;;  %1372 = vmatpush3.bf16.msra.mxu1 %v1774_v36 }
  0x49   :  { %1373 = vmatprep.subr.bf16.mxu0 %v1591_v1  ;;  %1397 = vmatprep.subr.bf16.mxu1 %v1591_v1 }
  0x8f   :  { %v110_v38 = vpop.xlane.xlu0 %109 }
  0x90   :  { %v111_v40 = vsub.f32 %v1618_v0, %v110_v38  ;;  %v184_v46 = vadd.f32 %v110_v38, %v1699_v39 }
  0x92   :  { %v112_v41 = vmul.f32 1.442695, %v111_v40 }
  0x94   :  { %1555 = vpow2.f32 %v112_v41  ;;  %v899_v41 = vld [vmem:[%s1936_s0 + $0x18] sm:$0xff] }
  0x97   :  { %v199_v49 = vpop.permute.xlu0 %198 }
  0x98   :  { %vm200_vm2 = vcmp.eq.s32.totalorder %v199_v49, 1 }
  0x9b   :  { %v391_v19 = vpop.permute.xlu0 %390 }
  0x9c   :  { %vm392_vm6 = vcmp.eq.s32.totalorder %v391_v19, 1 }
  0x9e   :  { %v1556_v42 = vpop.eup %1555 }
  0x9f   :  { %1078 = vmatmul.mubr.f32.vlgmr.msra.gmra.mrb[0].mxu0 %v1556_v42 }
  0xa0   :  { %1375 = vmatpush3.bf16.msra.mxu0 %v1727_v6  ;;  %1147 = vmatprep.mubr.msk.f32.mxu0 %vm1592_vm0, %v1593_v37 }
  0xa1   :  { %1376 = vmatprep.subr.bf16.mxu0 %v1591_v1 }
  0xa4   :  { %1378 = vmatpush3.bf16.msra.mxu0 %v1734_v13 }
  0xa5   :  { %1379 = vmatprep.subr.bf16.mxu0 %v1591_v1 }
  0xa8   :  { %1381 = vmatpush3.bf16.msra.mxu0 %v1744_v20 }
  0xa9   :  { %1382 = vmatprep.subr.bf16.mxu0 %v1591_v1 }
  0xac   :  { %1384 = vmatpush3.bf16.msra.mxu0 %v1750_v22 }
  0xad   :  { %1385 = vmatprep.subr.bf16.mxu0 %v1591_v1 }
  0xb0   :  { %1387 = vmatpush3.bf16.msra.mxu0 %v1756_v28 }
  0xb1   :  { %1388 = vmatprep.subr.bf16.mxu0 %v1591_v1 }
  0xb4   :  { %1390 = vmatpush3.bf16.msra.mxu0 %v1762_v31 }
  0xb5   :  { %1391 = vmatprep.subr.bf16.mxu0 %v1591_v1 }
  0xb8   :  { %1393 = vmatpush3.bf16.msra.mxu0 %v1768_v34 }
  0xb9   :  { %1394 = vmatprep.subr.bf16.mxu0 %v1591_v1 }
  0xbc   :  { %1396 = vmatpush3.bf16.msra.mxu0 %v1774_v36 }
  0xbd   :  { %1421 = vmatprep.subr.bf16.mxu0 %v1591_v1 }
 0x172   :  { %v180_v43 = vpop.f32.mrb[0].mxu0 }
 0x173   :  { %1557 = vlog2.f32 %v180_v43  ;;  %v1079_v44 = vpop.f32.mrb[1].mxu0 }
 0x17d   :  { %v1558_v45 = vpop.eup %1557 }
 0x17e   :  { %v186_v47 = vmul.f32 0.6931472, %v1558_v45 }
 0x180   :  { %v187_v48 = vadd.f32 %v186_v47, %v184_v46  ;;  %v676_v46 = vsel %vm904_vm9, 1, %v1594_v59 }
 0x182   :  { %v188_v50 = vadd.f32 %v187_v48, %v1618_v0 }
 0x184   :  { %v201_v51 = vsel %vm200_vm2, %v188_v50, %v1618_v0 }
 0x185   :  { %205 = vmax.xlane.f32.xlu1 %v201_v51 }
 0x196   :  { %294 = vperm.xlu1 %1522, %v292_v52  }
 0x212   :  { %v206_v53 = vpop.xlane.xlu1 %205 }
 0x213   :  { %v207_v55 = vsub.f32 %v201_v51, %v206_v53  ;;  %v280_v61 = vadd.f32 %v206_v53, %v1699_v39 }
 0x215   :  { %v208_v56 = vmul.f32 1.442695, %v207_v55 }
 0x216   :  { %v295_v63 = vpop.permute.xlu1 %294 }
 0x217   :  { %1559 = vpow2.f32 %v208_v56  ;;  %vm296_vm4 = vcmp.eq.s32.totalorder %v295_v63, 1 }
 0x221   :  { %v1560_v57 = vpop.eup %1559 }
 0x222   :  { %1113 = vmatmul.mubr.f32.vlgmr.msra.gmra.mrb[0].mxu1 %v1560_v57  ;;  %v901_v57 = vld [vmem:[%s1936_s0 + $0x20] sm:$0xff] }
 0x223   :  { %1399 = vmatpush3.bf16.msra.mxu1 %v1727_v6  ;;  %1182 = vmatprep.mubr.msk.f32.mxu1 %vm1592_vm0, %v1593_v37 }
 0x224   :  { %1400 = vmatprep.subr.bf16.mxu1 %v1591_v1 }
 0x227   :  { %1402 = vmatpush3.bf16.msra.mxu1 %v1734_v13 }
 0x228   :  { %1403 = vmatprep.subr.bf16.mxu1 %v1591_v1 }
 0x22b   :  { %1405 = vmatpush3.bf16.msra.mxu1 %v1744_v20 }
 0x22c   :  { %1406 = vmatprep.subr.bf16.mxu1 %v1591_v1 }
 0x22f   :  { %1408 = vmatpush3.bf16.msra.mxu1 %v1750_v22 }
 0x230   :  { %1409 = vmatprep.subr.bf16.mxu1 %v1591_v1 }
 0x233   :  { %1411 = vmatpush3.bf16.msra.mxu1 %v1756_v28 }
 0x234   :  { %1412 = vmatprep.subr.bf16.mxu1 %v1591_v1 }
 0x237   :  { %1414 = vmatpush3.bf16.msra.mxu1 %v1762_v31 }
 0x238   :  { %1415 = vmatprep.subr.bf16.mxu1 %v1591_v1 }
 0x23b   :  { %1417 = vmatpush3.bf16.msra.mxu1 %v1768_v34 }
 0x23c   :  { %1418 = vmatprep.subr.bf16.mxu1 %v1591_v1 }
 0x23f   :  { %1420 = vmatpush3.bf16.msra.mxu1 %v1774_v36 }
 0x240   :  { %1445 = vmatprep.subr.bf16.mxu1 %v1591_v1 }
 0x2f5   :  { %v276_v0 = vpop.f32.mrb[0].mxu1 }
 0x2f6   :  { %1561 = vlog2.f32 %v276_v0  ;;  %v1114_v58 = vpop.f32.mrb[1].mxu1 }
 0x300   :  { %v1562_v60 = vpop.eup %1561 }
 0x301   :  { %v282_v62 = vmul.f32 0.6931472, %v1562_v60 }
 0x303   :  { %v283_v3 = vadd.f32 %v282_v62, %v280_v61  ;;  %v772_v62 = vsel %vm906_vm11, 1, %v1594_v59 }
 0x305   :  { %v284_v4 = vadd.f32 %v895_v2, %v283_v3 }
 0x307   :  { %v297_v5 = vsel %vm296_vm4, %v284_v4, %v201_v51 }
 0x308   :  { %301 = vmax.xlane.f32.xlu1 %v297_v5 }
 0x319   :  { %486 = vperm.xlu1 %1522, %v484_v7  }
 0x395   :  { %v302_v8 = vpop.xlane.xlu1 %301 }
 0x396   :  { %v303_v9 = vsub.f32 %v297_v5, %v302_v8  ;;  %v376_v16 = vadd.f32 %v302_v8, %v1699_v39 }
 0x398   :  { %v304_v10 = vmul.f32 1.442695, %v303_v9 }
 0x399   :  { %v487_v42 = vpop.permute.xlu1 %486 }
 0x39a   :  { %1563 = vpow2.f32 %v304_v10  ;;  %vm488_vm8 = vcmp.eq.s32.totalorder %v487_v42, 1 }
 0x3a4   :  { %v1564_v11 = vpop.eup %1563 }
 0x3a5   :  { %1148 = vmatmul.mubr.f32.vlgmr.msra.gmra.mrb[2].mxu0 %v1564_v11 }
 0x3a6   :  { %1423 = vmatpush3.bf16.msra.mxu0 %v1727_v6  ;;  %1217 = vmatprep.mubr.msk.f32.mxu0 %vm1592_vm0, %v1593_v37 }
 0x3a7   :  { %1424 = vmatprep.subr.bf16.mxu0 %v1591_v1 }
 0x3aa   :  { %1426 = vmatpush3.bf16.msra.mxu0 %v1734_v13 }
 0x3ab   :  { %1427 = vmatprep.subr.bf16.mxu0 %v1591_v1 }
 0x3ae   :  { %1429 = vmatpush3.bf16.msra.mxu0 %v1744_v20 }
 0x3af   :  { %1430 = vmatprep.subr.bf16.mxu0 %v1591_v1 }
 0x3b2   :  { %1432 = vmatpush3.bf16.msra.mxu0 %v1750_v22 }
 0x3b3   :  { %1433 = vmatprep.subr.bf16.mxu0 %v1591_v1 }
 0x3b6   :  { %1435 = vmatpush3.bf16.msra.mxu0 %v1756_v28 }
 0x3b7   :  { %1436 = vmatprep.subr.bf16.mxu0 %v1591_v1 }
 0x3ba   :  { %1438 = vmatpush3.bf16.msra.mxu0 %v1762_v31 }
 0x3bb   :  { %1439 = vmatprep.subr.bf16.mxu0 %v1591_v1 }
 0x3be   :  { %1441 = vmatpush3.bf16.msra.mxu0 %v1768_v34 }
 0x3bf   :  { %1442 = vmatprep.subr.bf16.mxu0 %v1591_v1 }
 0x3c2   :  { %1444 = vmatpush3.bf16.msra.mxu0 %v1774_v36 }
 0x3c3   :  { %1469 = vmatprep.subr.bf16.mxu0 %v1591_v1 }
 0x478   :  { %v372_v12 = vpop.f32.mrb[2].mxu0 }
 0x479   :  { %1565 = vlog2.f32 %v372_v12  ;;  %v1149_v14 = vpop.f32.mrb[3].mxu0 }
 0x483   :  { %v1566_v15 = vpop.eup %1565 }
 0x484   :  { %v378_v17 = vmul.f32 0.6931472, %v1566_v15 }
 0x486   :  { %v379_v23 = vadd.f32 %v378_v17, %v376_v16 }
 0x488   :  { %v380_v24 = vadd.f32 %v897_v18, %v379_v23 }
 0x48a   :  { %v393_v21 = vsel %vm392_vm6, %v380_v24, %v297_v5 }
 0x48b   :  { %397 = vmax.xlane.f32.xlu0 %v393_v21 }
 0x4a1   :  { %582 = vperm.xlu0 %1521, %v580_v25  }
 0x518   :  { %v398_v26 = vpop.xlane.xlu0 %397 }
 0x519   :  { %v399_v27 = vsub.f32 %v393_v21, %v398_v26  ;;  %v472_v38 = vadd.f32 %v398_v26, %v1699_v39 }
 0x51b   :  { %v400_v29 = vmul.f32 1.442695, %v399_v27 }
 0x51d   :  { %1567 = vpow2.f32 %v400_v29 }
 0x520   :  { %v583_v0 = vpop.permute.xlu0 %582 }
 0x521   :  { %vm584_vm10 = vcmp.eq.s32.totalorder %v583_v0, 1 }
 0x527   :  { %v1568_v30 = vpop.eup %1567 }
 0x528   :  { %1183 = vmatmul.mubr.f32.vlgmr.msra.gmra.mrb[2].mxu1 %v1568_v30 }
 0x529   :  { %1447 = vmatpush3.bf16.msra.mxu1 %v1727_v6  ;;  %1252 = vmatprep.mubr.msk.f32.mxu1 %vm1592_vm0, %v1593_v37 }
 0x52a   :  { %1448 = vmatprep.subr.bf16.mxu1 %v1591_v1 }
 0x52d   :  { %1450 = vmatpush3.bf16.msra.mxu1 %v1734_v13 }
 0x52e   :  { %1451 = vmatprep.subr.bf16.mxu1 %v1591_v1 }
 0x531   :  { %1453 = vmatpush3.bf16.msra.mxu1 %v1744_v20 }
 0x532   :  { %1454 = vmatprep.subr.bf16.mxu1 %v1591_v1 }
 0x535   :  { %1456 = vmatpush3.bf16.msra.mxu1 %v1750_v22 }
 0x536   :  { %1457 = vmatprep.subr.bf16.mxu1 %v1591_v1 }
 0x539   :  { %1459 = vmatpush3.bf16.msra.mxu1 %v1756_v28 }
 0x53a   :  { %1460 = vmatprep.subr.bf16.mxu1 %v1591_v1 }
 0x53d   :  { %1462 = vmatpush3.bf16.msra.mxu1 %v1762_v31 }
 0x53e   :  { %1463 = vmatprep.subr.bf16.mxu1 %v1591_v1 }
 0x541   :  { %1465 = vmatpush3.bf16.msra.mxu1 %v1768_v34 }
 0x542   :  { %1466 = vmatprep.subr.bf16.mxu1 %v1591_v1 }
 0x545   :  { %1468 = vmatpush3.bf16.msra.mxu1 %v1774_v36 }
 0x546   :  { %1493 = vmatprep.subr.bf16.mxu1 %v1591_v1 }
 0x5fb   :  { %v468_v32 = vpop.f32.mrb[2].mxu1 }
 0x5fc   :  { %1569 = vlog2.f32 %v468_v32  ;;  %v1184_v33 = vpop.f32.mrb[3].mxu1 }
 0x5fd   :  { %v907_v33 = vld [vmem:[%s1936_s0 + $0x38] sm:$0xff] }
 0x606   :  { %v1570_v35 = vpop.eup %1569 }
 0x607   :  { %v474_v40 = vmul.f32 0.6931472, %v1570_v35 }
 0x609   :  { %v475_v43 = vadd.f32 %v474_v40, %v472_v38 }
 0x60b   :  { %v476_v44 = vadd.f32 %v899_v41, %v475_v43 }
 0x60d   :  { %v489_v45 = vsel %vm488_vm8, %v476_v44, %v393_v21 }
 0x60e   :  { %493 = vmax.xlane.f32.xlu1 %v489_v45 }
 0x61f   :  { %678 = vperm.xlu1 %1522, %v676_v46  }
 0x69b   :  { %v494_v47 = vpop.xlane.xlu1 %493 }
 0x69c   :  { %v495_v48 = vsub.f32 %v489_v45, %v494_v47  ;;  %v568_v55 = vadd.f32 %v494_v47, %v1699_v39 }
 0x69e   :  { %v496_v49 = vmul.f32 1.442695, %v495_v48 }
 0x6a0   :  { %1571 = vpow2.f32 %v496_v49 }
 0x6aa   :  { %v1572_v50 = vpop.eup %1571 }
 0x6ab   :  { %1218 = vmatmul.mubr.f32.vlgmr.msra.gmra.mrb[4].mxu0 %v1572_v50 }
 0x6ac   :  { %1471 = vmatpush3.bf16.msra.mxu0 %v1727_v6  ;;  %1287 = vmatprep.mubr.msk.f32.mxu0 %vm1592_vm0, %v1593_v37 }
 0x6ad   :  { %1472 = vmatprep.subr.bf16.mxu0 %v1591_v1 }
 0x6b0   :  { %1474 = vmatpush3.bf16.msra.mxu0 %v1734_v13 }
 0x6b1   :  { %1475 = vmatprep.subr.bf16.mxu0 %v1591_v1 }
 0x6b4   :  { %1477 = vmatpush3.bf16.msra.mxu0 %v1744_v20 }
 0x6b5   :  { %1478 = vmatprep.subr.bf16.mxu0 %v1591_v1 }
 0x6b8   :  { %1480 = vmatpush3.bf16.msra.mxu0 %v1750_v22 }
 0x6b9   :  { %1481 = vmatprep.subr.bf16.mxu0 %v1591_v1 }
 0x6bc   :  { %1483 = vmatpush3.bf16.msra.mxu0 %v1756_v28 }
 0x6bd   :  { %1484 = vmatprep.subr.bf16.mxu0 %v1591_v1 }
 0x6c0   :  { %1486 = vmatpush3.bf16.msra.mxu0 %v1762_v31 }
 0x6c1   :  { %1487 = vmatprep.subr.bf16.mxu0 %v1591_v1 }
 0x6c4   :  { %1489 = vmatpush3.bf16.msra.mxu0 %v1768_v34 }
 0x6c5   :  { %1490 = vmatprep.subr.bf16.mxu0 %v1591_v1 }
 0x6c8   :  { %1492 = vmatpush3.bf16.msra.mxu0 %v1774_v36 }
 0x77e   :  { %v564_v51 = vpop.f32.mrb[4].mxu0 }
 0x77f   :  { %1573 = vlog2.f32 %v564_v51  ;;  %v1219_v52 = vpop.f32.mrb[5].mxu0 }
 0x789   :  { %v1574_v53 = vpop.eup %1573 }
 0x78a   :  { %v570_v56 = vmul.f32 0.6931472, %v1574_v53 }
 0x78c   :  { %v571_v58 = vadd.f32 %v570_v56, %v568_v55 }
 0x78e   :  { %v572_v60 = vadd.f32 %v901_v57, %v571_v58 }
 0x790   :  { %v585_v61 = vsel %vm584_vm10, %v572_v60, %v489_v45 }
 0x791   :  { %589 = vmax.xlane.f32.xlu0 %v585_v61 }
 0x7a7   :  { %774 = vperm.xlu0 %1521, %v772_v62  }
 0x81e   :  { %v590_v63 = vpop.xlane.xlu0 %589 }
 0x81f   :  { %v591_v2 = vsub.f32 %v585_v61, %v590_v63 }
 0x821   :  { %v592_v3 = vmul.f32 1.442695, %v591_v2 }
 0x823   :  { %1575 = vpow2.f32 %v592_v3 }
 0x826   :  { %v775_v17 = vpop.permute.xlu0 %774 }
 0x827   :  { %vm776_vm14 = vcmp.eq.s32.totalorder %v775_v17, 1 }
 0x82d   :  { %v1576_v4 = vpop.eup %1575 }
 0x82e   :  { %1253 = vmatmul.mubr.f32.vlgmr.msra.gmra.mrb[4].mxu1 %v1576_v4 }
 0x82f   :  { %1495 = vmatpush3.bf16.msra.mxu1 %v1727_v6  ;;  %1322 = vmatprep.mubr.msk.f32.mxu1 %vm1592_vm0, %v1593_v37  ;;  %vm888_vm0 = vcmask 7168  }
 0x830   :  { %1496 = vmatprep.subr.bf16.mxu1 %v1591_v1 }
 0x833   :  { %1498 = vmatpush3.bf16.msra.mxu1 %v1734_v13 }
 0x834   :  { %1499 = vmatprep.subr.bf16.mxu1 %v1591_v1 }
 0x837   :  { %1501 = vmatpush3.bf16.msra.mxu1 %v1744_v20  ;;  %v664_v20 = vadd.f32 %v590_v63, %v1699_v39 }
 0x838   :  { %1502 = vmatprep.subr.bf16.mxu1 %v1591_v1 }
 0x83b   :  { %1504 = vmatpush3.bf16.msra.mxu1 %v1750_v22 }
 0x83c   :  { %1505 = vmatprep.subr.bf16.mxu1 %v1591_v1 }
 0x83f   :  { %1507 = vmatpush3.bf16.msra.mxu1 %v1756_v28  ;;  %v903_v28 = vld [vmem:[%s1936_s0 + $0x28] sm:$0xff] }
 0x840   :  { %1508 = vmatprep.subr.bf16.mxu1 %v1591_v1 }
 0x843   :  { %1510 = vmatpush3.bf16.msra.mxu1 %v1762_v31  ;;  %v679_v31 = vpop.permute.xlu1 %678 }
 0x844   :  { %1511 = vmatprep.subr.bf16.mxu1 %v1591_v1  ;;  %vm680_vm12 = vcmp.eq.s32.totalorder %v679_v31, 1 }
 0x847   :  { %1513 = vmatpush3.bf16.msra.mxu1 %v1768_v34 }
 0x848   :  { %1514 = vmatprep.subr.bf16.mxu1 %v1591_v1  ;;  %v868_v1 = vsel %vm908_vm13, 1, %v1594_v59 }
 0x84b   :  { %1516 = vmatpush3.bf16.msra.mxu1 %v1774_v36 }
 0x901   :  { %v660_v37 = vpop.f32.mrb[4].mxu1 }
 0x902   :  { %1577 = vlog2.f32 %v660_v37  ;;  %v1254_v6 = vpop.f32.mrb[5].mxu1 }
 0x90c   :  { %v1578_v13 = vpop.eup %1577 }
 0x90d   :  { %v666_v22 = vmul.f32 0.6931472, %v1578_v13 }
 0x90f   :  { %v667_v5 = vadd.f32 %v666_v22, %v664_v20 }
 0x911   :  { %v668_v7 = vadd.f32 %v903_v28, %v667_v5 }
 0x913   :  { %v681_v34 = vsel %vm680_vm12, %v668_v7, %v585_v61 }
 0x914   :  { %685 = vmax.xlane.f32.xlu1 %v681_v34 }
 0x925   :  { %870 = vperm.xlu1 %1522, %v868_v1  }
 0x9a1   :  { %v686_v36 = vpop.xlane.xlu1 %685 }
 0x9a2   :  { %v687_v8 = vsub.f32 %v681_v34, %v686_v36  ;;  %v760_v15 = vadd.f32 %v686_v36, %v1699_v39 }
 0x9a4   :  { %v688_v9 = vmul.f32 1.442695, %v687_v8 }
 0x9a5   :  { %v871_v35 = vpop.permute.xlu1 %870 }
 0x9a6   :  { %1579 = vpow2.f32 %v688_v9  ;;  %vm872_vm15 = vcmp.eq.s32.totalorder %v871_v35, 1 }
 0x9b0   :  { %v1580_v10 = vpop.eup %1579 }
 0x9b1   :  { %1288 = vmatmul.mubr.f32.vlgmr.msra.gmra.mrb[6].mxu0 %v1580_v10 }
 0xa84   :  { %v756_v11 = vpop.f32.mrb[6].mxu0 }
 0xa85   :  { %1581 = vlog2.f32 %v756_v11  ;;  %v1289_v12 = vpop.f32.mrb[7].mxu0 }
 0xa8f   :  { %v1582_v14 = vpop.eup %1581 }
 0xa90   :  { %v762_v16 = vmul.f32 0.6931472, %v1582_v14 }
 0xa92   :  { %v763_v59 = vadd.f32 %v762_v16, %v760_v15 }
 0xa94   :  { %v764_v18 = vadd.f32 %v905_v54, %v763_v59 }
 0xa96   :  { %v777_v19 = vsel %vm776_vm14, %v764_v18, %v681_v34 }
 0xa97   :  { %781 = vmax.xlane.f32.xlu0 %v777_v19 }
 0xb24   :  { %v782_v23 = vpop.xlane.xlu0 %781 }
 0xb25   :  { %v783_v24 = vsub.f32 %v777_v19, %v782_v23  ;;  %v856_v30 = vadd.f32 %v782_v23, %v1699_v39 }
 0xb27   :  { %v784_v21 = vmul.f32 1.442695, %v783_v24 }
 0xb29   :  { %1583 = vpow2.f32 %v784_v21 }
 0xb33   :  { %v1584_v25 = vpop.eup %1583 }
 0xb34   :  { %1323 = vmatmul.mubr.f32.vlgmr.msra.gmra.mrb[6].mxu1 %v1584_v25 }
 0xc07   :  { %v852_v26 = vpop.f32.mrb[6].mxu1 }
 0xc08   :  { %1585 = vlog2.f32 %v852_v26  ;;  %v1324_v27 = vpop.f32.mrb[7].mxu1 }
 0xc12   :  { %v1586_v29 = vpop.eup %1585 }
 0xc13   :  { %v858_v32 = vmul.f32 0.6931472, %v1586_v29 }
 0xc15   :  { %v859_v38 = vadd.f32 %v858_v32, %v856_v30 }
 0xc17   :  { %v860_v40 = vadd.f32 %v907_v33, %v859_v38 }
 0xc19   :  { %v873_v41 = vsel %vm872_vm15, %v860_v40, %v777_v19 }
 0xc1a   :  { %878 = vmax.xlane.f32.xlu1 %v873_v41 }
 0xca7   :  { %v879_v42 = vpop.xlane.xlu1 %878 }
 0xca8   :  { %v880_v43 = vsub.f32 %v873_v41, %v879_v42 }
 0xcaa   :  { %v881_v44 = vmul.f32 1.442695, %v880_v43 }
 0xcac   :  { %1587 = vpow2.f32 %v881_v44 }
 0xcb6   :  { %v1588_v45 = vpop.eup %1587 }
 0xcb7   :  { %883 = vadd.xlane.f32.xlu0 %v1588_v45 }
 0xd44   :  { %v884_v46 = vpop.xlane.xlu0 %883 }
 0xd45   :  { %1589 = vlog2.f32 %v884_v46 }
 0xd4f   :  { %v1590_v39 = vpop.eup %1589 }
 0xd50   :  { %v886_v47 = vmul.f32 0.6931472, %v1590_v39 }
 0xd52   :  { %v887_v48 = vadd.f32 %v886_v47, %v879_v42 }
 0xd54   :  { %889 = vst.msk [vmem:[%s1939_s3] sm:$0xff] %vm888_vm0, %v887_v48 }

</bundles_post_ra>
